<compile_context>
chip_gen: v6e
topology: v6e:2x2x1
jax: 0.10.0
libtpu: 0.0.40
codegen_flags: <defaults>
</compile_context>

<pallas_src>
import functools

import jax
import jax.numpy as jnp
from jax import lax
from jax.experimental import pallas as pl
from jax.experimental.pallas import tpu as pltpu

EPS = 1e-6
NEG_INF = -1e9          # additive causal-mask value (f32)


def _rmsnorm_f32(x, w, eps=EPS):
    # x: (rows, H) f32, w: (1, H) f32
    var = jnp.mean(x * x, axis=-1, keepdims=True)
    return x * lax.rsqrt(var + eps) * w


@functools.lru_cache(maxsize=1)
def _vmem_limit_bytes():
    """Generation-aware VMEM budget: ~3/4 of physical VMEM, capped at 100 MiB."""
    try:
        cap = int(pltpu.get_tpu_info().vmem_capacity_bytes)
    except Exception:                       # fall back to a v7x-safe assumption
        cap = 64 * 1024 * 1024
    return min(cap * 3 // 4, 100 * 1024 * 1024)


def _pick_tile(full, pref):
    """Largest tile <= pref that divides `full` (falls through 1024..8)."""
    if full <= pref:
        return full
    for cand in (pref, 1024, 512, 256, 128, 64, 32, 16, 8):
        if cand <= pref and full % cand == 0:
            return cand
    # TODO(synk): pad the dimension to a multiple of 128 instead of one full-size tile.
    return full


def _head_group(num_heads, pref=4):
    """Heads per QKV-prologue grid step (keeps the weight block bounded on v7x)."""
    for g in range(min(num_heads, pref), 0, -1):
        if num_heads % g == 0:
            return g
    return 1


# ----------------------------- kernel 1: RMSNorm + QKV proj + RoPE ------------------------------

def qkv_rope_kernel(x_ref, ln_ref, w_ref, cos_ref, sin_ref, q_ref, k_ref, v_ref):
    d = cos_ref.shape[-1]
    half = d // 2
    heads_per_group = w_ref.shape[0]
    scale = 1.0 / (d ** 0.5)

    x = x_ref[0].astype(jnp.float32)                                   # (TS, H)
    xn = _rmsnorm_f32(x, ln_ref[...].astype(jnp.float32)).astype(jnp.bfloat16)
    cos = cos_ref[...]                                                 # (TS, d) f32
    sin_r = sin_ref[...]                                               # (TS, d) f32, rotate-half sign folded in

    # Small static unroll over the heads of this group (<= 4); each head is one clean 2D MXU matmul
    # producing [q | k | v] columns, then RoPE on the XLU (roll) + VPU (mul/add).
    for g in range(heads_per_group):
        qkv = jnp.dot(xn, w_ref[g], preferred_element_type=jnp.float32)   # (TS, 3d) f32
        qh = qkv[:, :d]
        kh = qkv[:, d:2 * d]
        vh = qkv[:, 2 * d:]
        qh = qh * cos + pltpu.roll(qh, shift=half, axis=1) * sin_r
        kh = kh * cos + pltpu.roll(kh, shift=half, axis=1) * sin_r
        q_ref[0, g] = (qh * scale).astype(q_ref.dtype)                 # pre-scaled by 1/sqrt(d)
        k_ref[0, g] = kh.astype(k_ref.dtype)
        v_ref[0, g] = vh.astype(v_ref.dtype)


def fused_qkv_rope(x, ln1, wqkv_hm, cos, sin_rot, num_heads, head_dim):
    B, S, H = x.shape
    d = head_dim
    TS = _pick_tile(S, 256)
    HG = _head_group(num_heads)
    n_hg = num_heads // HG
    ns = S // TS

    out_dt = jnp.bfloat16
    out_shapes = tuple(jax.ShapeDtypeStruct((B, num_heads, S, d), out_dt) for _ in range(3))

    return pl.pallas_call(
        qkv_rope_kernel,
        out_shape=out_shapes,
        grid=(B, n_hg, ns),
        in_specs=[
            pl.BlockSpec((1, TS, H), lambda b, hg, i: (b, i, 0)),            # x
            pl.BlockSpec((1, H), lambda b, hg, i: (0, 0),
                         pipeline_mode=pl.Buffered(1)),                      # input_layernorm weight
            pl.BlockSpec((HG, H, 3 * d), lambda b, hg, i: (hg, 0, 0)),       # packed [q|k|v] head-major weights
            pl.BlockSpec((TS, d), lambda b, hg, i: (i, 0)),                  # cos
            pl.BlockSpec((TS, d), lambda b, hg, i: (i, 0)),                  # sin (rotate-half sign folded)
        ],
        out_specs=[
            pl.BlockSpec((1, HG, TS, d), lambda b, hg, i: (b, hg, i, 0)),    # q (head-major, RoPE'd, scaled)
            pl.BlockSpec((1, HG, TS, d), lambda b, hg, i: (b, hg, i, 0)),    # k (head-major, RoPE'd)
            pl.BlockSpec((1, HG, TS, d), lambda b, hg, i: (b, hg, i, 0)),    # v (head-major)
        ],
        compiler_params=pltpu.CompilerParams(
            dimension_semantics=("parallel", "parallel", "parallel"),
            vmem_limit_bytes=_vmem_limit_bytes()),
    )(x, ln1, wqkv_hm, cos, sin_rot)


# ----------------------------- kernel 2: flash attention + out proj + residual ------------------

def flash_attn_kernel(x_ref, q_ref, k_ref, v_ref, wo_ref, o_ref, m_s, l_s, acc_s):
    qi = pl.program_id(1)
    ki = pl.program_id(2)
    nkv = pl.num_programs(2)
    nh, tq, d = acc_s.shape
    tk = k_ref.shape[2]

    @pl.when(ki == 0)
    def _init():
        m_s[...] = jnp.full(m_s.shape, -1e30, m_s.dtype)
        l_s[...] = jnp.zeros(l_s.shape, l_s.dtype)
        acc_s[...] = jnp.zeros(acc_s.shape, acc_s.dtype)

    def _flash_update(apply_causal_mask):
        # q already carries the 1/sqrt(d) scale; all heads batched on the MXU.
        s = jnp.einsum('hqd,hkd->hqk', q_ref[0], k_ref[0],
                       preferred_element_type=jnp.float32)               # (nh, tq, tk) f32
        if apply_causal_mask:                                            # diagonal tiles only
            rows = lax.broadcasted_iota(jnp.int32, (tq, tk), 0)
            cols = lax.broadcasted_iota(jnp.int32, (tq, tk), 1)
            s = s + jnp.where(cols > rows, jnp.float32(NEG_INF), jnp.float32(0.0))[None]
        m_prev = m_s[...]                                                # (nh, tq)
        m_new = jnp.maximum(m_prev, jnp.max(s, axis=-1))
        alpha = jnp.exp(m_prev - m_new)
        p = jnp.exp(s - m_new[:, :, None])
        l_s[...] = alpha * l_s[...] + jnp.sum(p, axis=-1)
        acc_s[...] = alpha[:, :, None] * acc_s[...] + jnp.einsum(
            'hqk,hkd->hqd', p.astype(jnp.bfloat16), v_ref[0],
            preferred_element_type=jnp.float32)
        m_s[...] = m_new

    @pl.when(ki == qi)            # diagonal tile: mask math needed
    def _diag():
        _flash_update(True)

    @pl.when(ki < qi)             # below-diagonal tile: fully unmasked, skip mask math
    def _off_diag():
        _flash_update(False)

    @pl.when(ki == nkv - 1)
    def _finalize():
        inv_l = pl.reciprocal(l_s[...], approx=True)                     # (nh, tq)
        attn = (acc_s[...] * inv_l[:, :, None]).astype(jnp.bfloat16)     # (nh, tq, d)
        # lane-concat heads (cheap vreg placement, no scratch / per-head stores), one wo matmul
        attn_p = jnp.concatenate([attn[h] for h in range(nh)], axis=-1)  # (tq, nh*d)
        out = jnp.dot(attn_p, wo_ref[...], preferred_element_type=jnp.float32)
        # fused "hidden_states = residual + hidden_states" (residual is the raw x tile)
        o_ref[0] = (x_ref[0].astype(jnp.float32) + out).astype(o_ref.dtype)


def fused_flash_attention(x, q, k, v, wo):
    B, S, H = x.shape
    _, nh, _, d = q.shape
    assert H == nh * d
    TQ = _pick_tile(S, 128)
    TK = TQ                                  # causal tile skipping assumes TK == TQ
    nq = S // TQ
    nkv = S // TK

    return pl.pallas_call(
        flash_attn_kernel,
        out_shape=jax.ShapeDtypeStruct((B, S, H), x.dtype),
        grid=(B, nq, nkv),
        in_specs=[
            pl.BlockSpec((1, TQ, H), lambda b, i, j: (b, i, 0)),                 # x (residual)
            pl.BlockSpec((1, nh, TQ, d), lambda b, i, j: (b, 0, i, 0)),          # q (all heads)
            # kv index clamped to min(i, j): causally-skipped tiles reuse the resident block (no DMA)
            pl.BlockSpec((1, nh, TK, d), lambda b, i, j: (b, 0, jnp.minimum(i, j), 0)),
            pl.BlockSpec((1, nh, TK, d), lambda b, i, j: (b, 0, jnp.minimum(i, j), 0)),
            pl.BlockSpec((H, H), lambda b, i, j: (0, 0),
                         pipeline_mode=pl.Buffered(1)),                          # wo (single-buffered)
        ],
        out_specs=pl.BlockSpec((1, TQ, H), lambda b, i, j: (b, i, 0)),
        scratch_shapes=[
            pltpu.VMEM((nh, TQ), jnp.float32),        # running max (no padded trailing dim)
            pltpu.VMEM((nh, TQ), jnp.float32),        # running sum
            pltpu.VMEM((nh, TQ, d), jnp.float32),     # output accumulator
        ],
        compiler_params=pltpu.CompilerParams(
            dimension_semantics=("parallel", "parallel", "arbitrary"),
            vmem_limit_bytes=_vmem_limit_bytes()),
    )(x, q, k, v, wo)


# ----------------------------- kernel 3: RMSNorm + MLP + residual -------------------------------

def mlp_block_kernel(x_ref, ln_ref, wgu_ref, wd_ref, o_ref, xn_s, acc_s, *, inter_tile):
    j = pl.program_id(2)
    nI = pl.num_programs(2)

    @pl.when(j == 0)
    def _init():
        x = x_ref[0].astype(jnp.float32)
        xn_s[...] = _rmsnorm_f32(x, ln_ref[...].astype(jnp.float32)).astype(jnp.bfloat16)
        acc_s[...] = jnp.zeros(acc_s.shape, acc_s.dtype)

    # fused gate|up weights: one (TM, H) x (H, 2*TI) MXU matmul per intermediate tile
    gu = jnp.dot(xn_s[...], wgu_ref[0], preferred_element_type=jnp.float32)   # (TM, 2*TI) f32
    g = gu[:, :inter_tile]
    u = gu[:, inter_tile:]
    hmid = (g * jax.nn.sigmoid(g)) * u                                        # SiLU(gate) * up
    acc_s[...] += jnp.dot(hmid.astype(jnp.bfloat16), wd_ref[...],
                          preferred_element_type=jnp.float32)                 # partial down-proj

    @pl.when(j == nI - 1)
    def _finalize():
        # fused "hidden_states = residual + hidden_states"
        o_ref[0] = (x_ref[0].astype(jnp.float32) + acc_s[...]).astype(o_ref.dtype)


def fused_mlp_block(x, ln2, wg, wu, wd):
    B, S, H = x.shape
    I = wg.shape[1]
    big_vmem = _vmem_limit_bytes() > 56 * 1024 * 1024      # v5e/v6e: bigger row tiles; v7x: keep 256
    TM = _pick_tile(S, 512 if big_vmem else 256)
    TI = _pick_tile(I, 512)
    nm = S // TM
    nI = I // TI

    # host-side packing of gate|up column tiles into one weight stream: (nI, H, 2*TI) bf16
    wgu = jnp.concatenate(
        [wg.reshape(H, nI, TI).transpose(1, 0, 2),
         wu.reshape(H, nI, TI).transpose(1, 0, 2)], axis=2).astype(jnp.bfloat16)
    wd_b = wd.astype(jnp.bfloat16)

    kernel = functools.partial(mlp_block_kernel, inter_tile=TI)
    return pl.pallas_call(
        kernel,
        out_shape=jax.ShapeDtypeStruct((B, S, H), x.dtype),
        grid=(B, nm, nI),
        in_specs=[
            pl.BlockSpec((1, TM, H), lambda b, i, j: (b, i, 0)),       # x (also the residual)
            pl.BlockSpec((1, H), lambda b, i, j: (0, 0),
                         pipeline_mode=pl.Buffered(1)),                # post_attention_layernorm weight
            pl.BlockSpec((1, H, 2 * TI), lambda b, i, j: (j, 0, 0)),   # fused gate|up tile
            pl.BlockSpec((TI, H), lambda b, i, j: (j, 0)),             # down_proj tile
        ],
        out_specs=pl.BlockSpec((1, TM, H), lambda b, i, j: (b, i, 0)),
        scratch_shapes=[
            pltpu.VMEM((TM, H), jnp.bfloat16),    # normalized activations (reused over I-tiles)
            pltpu.VMEM((TM, H), jnp.float32),     # down-proj accumulator
        ],
        compiler_params=pltpu.CompilerParams(
            dimension_semantics=("parallel", "parallel", "arbitrary"),
            vmem_limit_bytes=_vmem_limit_bytes()),
    )(x, ln2, wgu, wd_b)


# ----------------------------- top-level decoder ------------------------------------------------

def _pack_qkv_weights(wq, wk, wv, num_heads, head_dim):
    """Head-major packed [q|k|v] weights: (nh, H, 3*d) bf16."""
    H = wq.shape[0]
    stack = jnp.stack([wq.reshape(H, num_heads, head_dim),
                       wk.reshape(H, num_heads, head_dim),
                       wv.reshape(H, num_heads, head_dim)], axis=2)     # (H, nh, 3, d)
    return stack.transpose(1, 0, 2, 3).reshape(num_heads, H, 3 * head_dim).astype(jnp.bfloat16)


def llama_fast_decoder(hidden_states, params, attention_mask, cos, sin, num_heads, head_dim):
    """Forward of LlamaFastDecoder with all fast_* flags == 0 (standard path)."""
    # TODO(synk): attention_mask is accepted for API parity; the kernel generates the standard
    # causal mask in-kernel (arbitrary padding masks, use_cache / output_attentions outputs and the
    # NPU fast_* paths are not implemented).
    del attention_mask

    B, S, H = hidden_states.shape
    assert H == num_heads * head_dim
    half = head_dim // 2

    # fold the rotate-half sign into the sin table so in-kernel RoPE is just roll * sin + cos * x
    sin_rot = jnp.concatenate([-sin[:, :half], sin[:, half:]], axis=-1)

    wqkv_hm = _pack_qkv_weights(params["wq"], params["wk"], params["wv"], num_heads, head_dim)
    wo = params["wo"].astype(jnp.bfloat16)

    # (1) input_layernorm + Q/K/V projection + RoPE (computed once, head-major bf16 layout)
    q, k, v = fused_qkv_rope(hidden_states, params["ln1"], wqkv_hm, cos, sin_rot,
                             num_heads, head_dim)
    # (2) flash attention + output projection + residual
    hs = fused_flash_attention(hidden_states, q, k, v, wo)
    # (3) post_attention_layernorm + MLP + residual
    hs = fused_mlp_block(hs, params["ln2"], params["wg"], params["wu"], params["wd"])
    return hs


# ----------------------------- host-side helpers / reference ------------------------------------

def rope_tables(seq_len, head_dim, base=10000.0):
    inv_freq = 1.0 / (base ** (jnp.arange(0, head_dim, 2, dtype=jnp.float32) / head_dim))
    pos = jnp.arange(seq_len, dtype=jnp.float32)
    freqs = jnp.outer(pos, inv_freq)                       # (S, d/2)
    emb = jnp.concatenate([freqs, freqs], axis=-1)         # (S, d)
    return jnp.cos(emb), jnp.sin(emb)


def causal_mask(B, S, dtype=jnp.float32):
    i = jnp.arange(S)[:, None]
    j = jnp.arange(S)[None, :]
    m = jnp.where(j <= i, 0.0, NEG_INF).astype(dtype)      # additive mask
    return jnp.broadcast_to(m[None, None], (B, 1, S, S))


def ref_decoder(x, p, mask, cos, sin, nh, d):
    """Pure-JAX f32 reference (mirrors HF Llama decoder layer math)."""
    def rms(t, w):
        tf = t.astype(jnp.float32)
        return (tf * lax.rsqrt(jnp.mean(tf * tf, -1, keepdims=True) + EPS) * w).astype(t.dtype)

    B, S, H = x.shape
    res = x
    xn = rms(x, p["ln1"])
    q = xn @ p["wq"]; k = xn @ p["wk"]; v = xn @ p["wv"]
    split = lambda t: t.reshape(B, S, nh, d).transpose(0, 2, 1, 3)
    q, k, v = split(q), split(k), split(v)
    rot = lambda t: jnp.concatenate([-t[..., d // 2:], t[..., :d // 2]], -1)
    cb, sb = cos[None, None], sin[None, None]
    q = q * cb + rot(q) * sb
    k = k * cb + rot(k) * sb
    s = jnp.einsum("bhqd,bhkd->bhqk", q, k) / (d ** 0.5) + mask
    pw = jax.nn.softmax(s, -1)
    o = jnp.einsum("bhqk,bhkd->bhqd", pw, v).transpose(0, 2, 1, 3).reshape(B, S, H)
    hs = res + o @ p["wo"]
    res = hs
    xn = rms(hs, p["ln2"])
    hs = res + (jax.nn.silu(xn @ p["wg"]) * (xn @ p["wu"])) @ p["wd"]
    return hs


# ----------------------------- main --------------------------------------------------------------

if __name__ == "__main__":
    # Small but representative: head_dim = 128 keeps every lane slice / roll 128-aligned, and
    # S = 256 exercises multi-tile flash (diagonal, off-diagonal and skipped kv tiles).
    B, S, H = 2, 256, 256
    NUM_HEADS, HEAD_DIM = 2, 128
    INTER = 1024

    key = jax.random.PRNGKey(0)
    keys = jax.random.split(key, 10)
    scale = 0.04
    params = {
        "ln1": jnp.ones((1, H), jnp.float32) + 0.1 * jax.random.normal(keys[0], (1, H), jnp.float32),
        "ln2": jnp.ones((1, H), jnp.float32) + 0.1 * jax.random.normal(keys[1], (1, H), jnp.float32),
        "wq": scale * jax.random.normal(keys[2], (H, H), jnp.float32),
        "wk": scale * jax.random.normal(keys[3], (H, H), jnp.float32),
        "wv": scale * jax.random.normal(keys[4], (H, H), jnp.float32),
        "wo": scale * jax.random.normal(keys[5], (H, H), jnp.float32),
        "wg": scale * jax.random.normal(keys[6], (H, INTER), jnp.float32),
        "wu": scale * jax.random.normal(keys[7], (H, INTER), jnp.float32),
        "wd": scale * jax.random.normal(keys[8], (INTER, H), jnp.float32),
    }
    x = jax.random.normal(keys[9], (B, S, H), jnp.float32)

    cos, sin = rope_tables(S, HEAD_DIM)
    mask = causal_mask(B, S)

    out = llama_fast_decoder(x, params, mask, cos, sin, NUM_HEADS, HEAD_DIM)
    out = jax.block_until_ready(out)

    ref = ref_decoder(x, params, mask, cos, sin, NUM_HEADS, HEAD_DIM)
    assert out.shape == (B, S, H) and out.dtype == jnp.float32
    assert jnp.allclose(out, ref, rtol=5e-2, atol=5e-2), "mismatch vs pure-JAX reference"

    print("KERNEL_OK")
</pallas_src>

<mosaic_0001>
module attributes {stable_mosaic.version = 11 : i64} {
  func.func @qkv_rope_kernel(%arg0: i32, %arg1: i32, %arg2: i32, %arg3: memref<1x256x256xf32, #tpu.memory_space<vmem>>, %arg4: memref<1x256xf32, #tpu.memory_space<vmem>>, %arg5: memref<2x256x384xbf16, #tpu.memory_space<vmem>>, %arg6: memref<256x128xf32, #tpu.memory_space<vmem>>, %arg7: memref<256x128xf32, #tpu.memory_space<vmem>>, %arg8: memref<1x2x256x128xbf16, #tpu.memory_space<vmem>>, %arg9: memref<1x2x256x128xbf16, #tpu.memory_space<vmem>>, %arg10: memref<1x2x256x128xbf16, #tpu.memory_space<vmem>>) attributes {dimension_semantics = [#tpu.dimension_semantics<parallel>, #tpu.dimension_semantics<parallel>, #tpu.dimension_semantics<parallel>], iteration_bounds = array<i64: 2, 1, 1>, scalar_prefetch = 0 : i64, scratch_operands = 0 : i64, tpu.core_type = #tpu.core_type<tc>, window_params = [{transform_indices = @transform_0, window_bounds = array<i64: 1, 256, 256>}, {pipeline_mode = #tpu.pipeline_mode<synchronous>, transform_indices = @transform_1, window_bounds = array<i64: 1, 256>}, {transform_indices = @transform_2, window_bounds = array<i64: 2, 256, 384>}, {transform_indices = @transform_3, window_bounds = array<i64: 256, 128>}, {transform_indices = @transform_4, window_bounds = array<i64: 256, 128>}, {transform_indices = @transform_5, window_bounds = array<i64: 1, 2, 256, 128>}, {transform_indices = @transform_6, window_bounds = array<i64: 1, 2, 256, 128>}, {transform_indices = @transform_7, window_bounds = array<i64: 1, 2, 256, 128>}]} {
    %c0 = arith.constant 0 : index
    %c0_0 = arith.constant 0 : index
    %c0_1 = arith.constant 0 : index
    %0 = vector.load %arg3[%c0, %c0_0, %c0_1] : memref<1x256x256xf32, #tpu.memory_space<vmem>>, vector<1x256x256xf32>
    %1 = vector.shape_cast %0 : vector<1x256x256xf32> to vector<256x256xf32>
    %c0_2 = arith.constant 0 : index
    %c0_3 = arith.constant 0 : index
    %2 = vector.load %arg4[%c0_2, %c0_3] : memref<1x256xf32, #tpu.memory_space<vmem>>, vector<1x256xf32>
    %3 = arith.mulf %1, %1 : vector<256x256xf32>
    %cst = arith.constant dense<0.000000e+00> : vector<256xf32>
    %4 = vector.multi_reduction <add>, %3, %cst [1] : vector<256x256xf32> to vector<256xf32>
    %5 = vector.shape_cast %4 : vector<256xf32> to vector<256x1xf32>
    %cst_4 = arith.constant 2.560000e+02 : f32
    %6 = vector.broadcast %cst_4 : f32 to vector<256x1xf32>
    %7 = arith.divf %5, %6 : vector<256x1xf32>
    %cst_5 = arith.constant 9.99999997E-7 : f32
    %8 = vector.broadcast %cst_5 : f32 to vector<256x1xf32>
    %9 = arith.addf %7, %8 : vector<256x1xf32>
    %10 = math.rsqrt %9 : vector<256x1xf32>
    %11 = vector.broadcast %10 : vector<256x1xf32> to vector<256x256xf32>
    %12 = arith.mulf %1, %11 : vector<256x256xf32>
    %13 = vector.broadcast %2 : vector<1x256xf32> to vector<256x256xf32>
    %14 = arith.mulf %12, %13 : vector<256x256xf32>
    %15 = arith.truncf %14 : vector<256x256xf32> to vector<256x256xbf16>
    %c0_6 = arith.constant 0 : index
    %c0_7 = arith.constant 0 : index
    %16 = vector.load %arg6[%c0_6, %c0_7] : memref<256x128xf32, #tpu.memory_space<vmem>>, vector<256x128xf32>
    %c0_8 = arith.constant 0 : index
    %c0_9 = arith.constant 0 : index
    %17 = vector.load %arg7[%c0_8, %c0_9] : memref<256x128xf32, #tpu.memory_space<vmem>>, vector<256x128xf32>
    %c0_10 = arith.constant 0 : index
    %c0_11 = arith.constant 0 : index
    %c0_12 = arith.constant 0 : index
    %18 = vector.load %arg5[%c0_10, %c0_11, %c0_12] : memref<2x256x384xbf16, #tpu.memory_space<vmem>>, vector<1x256x384xbf16>
    %19 = vector.shape_cast %18 : vector<1x256x384xbf16> to vector<256x384xbf16>
    %cst_13 = arith.constant dense<0.000000e+00> : vector<256x384xf32>
    %20 = tpu.matmul %15, %19, %cst_13 {dimension_numbers = #tpu.dot_dimension_numbers<[1], [0], [0], [1], [0, 0, 1, 1], [], []>} : vector<256x256xbf16>, vector<256x384xbf16>, vector<256x384xf32> -> vector<256x384xf32>
    %21 = vector.extract_strided_slice %20 {offsets = [0, 0], sizes = [256, 128], strides = [1, 1]} : vector<256x384xf32> to vector<256x128xf32>
    %22 = vector.extract_strided_slice %20 {offsets = [0, 128], sizes = [256, 128], strides = [1, 1]} : vector<256x384xf32> to vector<256x128xf32>
    %23 = vector.extract_strided_slice %20 {offsets = [0, 256], sizes = [256, 128], strides = [1, 1]} : vector<256x384xf32> to vector<256x128xf32>
    %24 = arith.mulf %21, %16 : vector<256x128xf32>
    %c64_i32 = arith.constant 64 : i32
    %25 = tpu.dynamic_rotate %21 by %c64_i32 dim 1 : vector<256x128xf32>, i32 -> vector<256x128xf32>
    %26 = arith.mulf %25, %17 : vector<256x128xf32>
    %27 = arith.addf %24, %26 : vector<256x128xf32>
    %28 = arith.mulf %22, %16 : vector<256x128xf32>
    %c64_i32_14 = arith.constant 64 : i32
    %29 = tpu.dynamic_rotate %22 by %c64_i32_14 dim 1 : vector<256x128xf32>, i32 -> vector<256x128xf32>
    %30 = arith.mulf %29, %17 : vector<256x128xf32>
    %31 = arith.addf %28, %30 : vector<256x128xf32>
    %cst_15 = arith.constant 0.0883883461 : f32
    %32 = vector.broadcast %cst_15 : f32 to vector<256x128xf32>
    %33 = arith.mulf %27, %32 : vector<256x128xf32>
    %34 = arith.truncf %33 : vector<256x128xf32> to vector<256x128xbf16>
    %c0_16 = arith.constant 0 : index
    %c0_17 = arith.constant 0 : index
    %c0_18 = arith.constant 0 : index
    %c0_19 = arith.constant 0 : index
    %35 = vector.load %arg8[%c0_16, %c0_17, %c0_18, %c0_19] : memref<1x2x256x128xbf16, #tpu.memory_space<vmem>>, vector<1x1x256x128xbf16>
    %36 = vector.shape_cast %35 : vector<1x1x256x128xbf16> to vector<256x128xbf16>
    %37 = vector.shape_cast %34 : vector<256x128xbf16> to vector<1x1x256x128xbf16>
    tpu.vector_store %arg8[%c0_16, %c0_17, %c0_18, %c0_19], %37 {strides = array<i32>} : memref<1x2x256x128xbf16, #tpu.memory_space<vmem>>, vector<1x1x256x128xbf16>,
    %38 = arith.truncf %31 : vector<256x128xf32> to vector<256x128xbf16>
    %c0_20 = arith.constant 0 : index
    %c0_21 = arith.constant 0 : index
    %c0_22 = arith.constant 0 : index
    %c0_23 = arith.constant 0 : index
    %39 = vector.load %arg9[%c0_20, %c0_21, %c0_22, %c0_23] : memref<1x2x256x128xbf16, #tpu.memory_space<vmem>>, vector<1x1x256x128xbf16>
    %40 = vector.shape_cast %39 : vector<1x1x256x128xbf16> to vector<256x128xbf16>
    %41 = vector.shape_cast %38 : vector<256x128xbf16> to vector<1x1x256x128xbf16>
    tpu.vector_store %arg9[%c0_20, %c0_21, %c0_22, %c0_23], %41 {strides = array<i32>} : memref<1x2x256x128xbf16, #tpu.memory_space<vmem>>, vector<1x1x256x128xbf16>,
    %42 = arith.truncf %23 : vector<256x128xf32> to vector<256x128xbf16>
    %c0_24 = arith.constant 0 : index
    %c0_25 = arith.constant 0 : index
    %c0_26 = arith.constant 0 : index
    %c0_27 = arith.constant 0 : index
    %43 = vector.load %arg10[%c0_24, %c0_25, %c0_26, %c0_27] : memref<1x2x256x128xbf16, #tpu.memory_space<vmem>>, vector<1x1x256x128xbf16>
    %44 = vector.shape_cast %43 : vector<1x1x256x128xbf16> to vector<256x128xbf16>
    %45 = vector.shape_cast %42 : vector<256x128xbf16> to vector<1x1x256x128xbf16>
    tpu.vector_store %arg10[%c0_24, %c0_25, %c0_26, %c0_27], %45 {strides = array<i32>} : memref<1x2x256x128xbf16, #tpu.memory_space<vmem>>, vector<1x1x256x128xbf16>,
    %c1 = arith.constant 1 : index
    %c0_28 = arith.constant 0 : index
    %c0_29 = arith.constant 0 : index
    %46 = vector.load %arg5[%c1, %c0_28, %c0_29] : memref<2x256x384xbf16, #tpu.memory_space<vmem>>, vector<1x256x384xbf16>
    %47 = vector.shape_cast %46 : vector<1x256x384xbf16> to vector<256x384xbf16>
    %cst_30 = arith.constant dense<0.000000e+00> : vector<256x384xf32>
    %48 = tpu.matmul %15, %47, %cst_30 {dimension_numbers = #tpu.dot_dimension_numbers<[1], [0], [0], [1], [0, 0, 1, 1], [], []>} : vector<256x256xbf16>, vector<256x384xbf16>, vector<256x384xf32> -> vector<256x384xf32>
    %49 = vector.extract_strided_slice %48 {offsets = [0, 0], sizes = [256, 128], strides = [1, 1]} : vector<256x384xf32> to vector<256x128xf32>
    %50 = vector.extract_strided_slice %48 {offsets = [0, 128], sizes = [256, 128], strides = [1, 1]} : vector<256x384xf32> to vector<256x128xf32>
    %51 = vector.extract_strided_slice %48 {offsets = [0, 256], sizes = [256, 128], strides = [1, 1]} : vector<256x384xf32> to vector<256x128xf32>
    %52 = arith.mulf %49, %16 : vector<256x128xf32>
    %c64_i32_31 = arith.constant 64 : i32
    %53 = tpu.dynamic_rotate %49 by %c64_i32_31 dim 1 : vector<256x128xf32>, i32 -> vector<256x128xf32>
    %54 = arith.mulf %53, %17 : vector<256x128xf32>
    %55 = arith.addf %52, %54 : vector<256x128xf32>
    %56 = arith.mulf %50, %16 : vector<256x128xf32>
    %c64_i32_32 = arith.constant 64 : i32
    %57 = tpu.dynamic_rotate %50 by %c64_i32_32 dim 1 : vector<256x128xf32>, i32 -> vector<256x128xf32>
    %58 = arith.mulf %57, %17 : vector<256x128xf32>
    %59 = arith.addf %56, %58 : vector<256x128xf32>
    %cst_33 = arith.constant 0.0883883461 : f32
    %60 = vector.broadcast %cst_33 : f32 to vector<256x128xf32>
    %61 = arith.mulf %55, %60 : vector<256x128xf32>
    %62 = arith.truncf %61 : vector<256x128xf32> to vector<256x128xbf16>
    %c0_34 = arith.constant 0 : index
    %c1_35 = arith.constant 1 : index
    %c0_36 = arith.constant 0 : index
    %c0_37 = arith.constant 0 : index
    %63 = vector.load %arg8[%c0_34, %c1_35, %c0_36, %c0_37] : memref<1x2x256x128xbf16, #tpu.memory_space<vmem>>, vector<1x1x256x128xbf16>
    %64 = vector.shape_cast %63 : vector<1x1x256x128xbf16> to vector<256x128xbf16>
    %65 = vector.shape_cast %62 : vector<256x128xbf16> to vector<1x1x256x128xbf16>
    tpu.vector_store %arg8[%c0_34, %c1_35, %c0_36, %c0_37], %65 {strides = array<i32>} : memref<1x2x256x128xbf16, #tpu.memory_space<vmem>>, vector<1x1x256x128xbf16>,
    %66 = arith.truncf %59 : vector<256x128xf32> to vector<256x128xbf16>
    %c0_38 = arith.constant 0 : index
    %c1_39 = arith.constant 1 : index
    %c0_40 = arith.constant 0 : index
    %c0_41 = arith.constant 0 : index
    %67 = vector.load %arg9[%c0_38, %c1_39, %c0_40, %c0_41] : memref<1x2x256x128xbf16, #tpu.memory_space<vmem>>, vector<1x1x256x128xbf16>
    %68 = vector.shape_cast %67 : vector<1x1x256x128xbf16> to vector<256x128xbf16>
    %69 = vector.shape_cast %66 : vector<256x128xbf16> to vector<1x1x256x128xbf16>
    tpu.vector_store %arg9[%c0_38, %c1_39, %c0_40, %c0_41], %69 {strides = array<i32>} : memref<1x2x256x128xbf16, #tpu.memory_space<vmem>>, vector<1x1x256x128xbf16>,
    %70 = arith.truncf %51 : vector<256x128xf32> to vector<256x128xbf16>
    %c0_42 = arith.constant 0 : index
    %c1_43 = arith.constant 1 : index
    %c0_44 = arith.constant 0 : index
    %c0_45 = arith.constant 0 : index
    %71 = vector.load %arg10[%c0_42, %c1_43, %c0_44, %c0_45] : memref<1x2x256x128xbf16, #tpu.memory_space<vmem>>, vector<1x1x256x128xbf16>
    %72 = vector.shape_cast %71 : vector<1x1x256x128xbf16> to vector<256x128xbf16>
    %73 = vector.shape_cast %70 : vector<256x128xbf16> to vector<1x1x256x128xbf16>
    tpu.vector_store %arg10[%c0_42, %c1_43, %c0_44, %c0_45], %73 {strides = array<i32>} : memref<1x2x256x128xbf16, #tpu.memory_space<vmem>>, vector<1x1x256x128xbf16>,
    return
  }
  func.func @transform_0(%arg0: i32, %arg1: i32, %arg2: i32) -> (i32, i32, i32) {
    %c0_i32 = arith.constant 0 : i32
    %c0_i32_0 = arith.constant 0 : i32
    return %arg0, %arg2, %c0_i32 : i32, i32, i32
  }
  func.func @transform_1(%arg0: i32, %arg1: i32, %arg2: i32) -> (i32, i32) {
    %c0_i32 = arith.constant 0 : i32
    %c0_i32_0 = arith.constant 0 : i32
    %c0_i32_1 = arith.constant 0 : i32
    return %c0_i32, %c0_i32_0 : i32, i32
  }
  func.func @transform_2(%arg0: i32, %arg1: i32, %arg2: i32) -> (i32, i32, i32) {
    %c0_i32 = arith.constant 0 : i32
    %c0_i32_0 = arith.constant 0 : i32
    %c0_i32_1 = arith.constant 0 : i32
    return %arg1, %c0_i32, %c0_i32_0 : i32, i32, i32
  }
  func.func @transform_3(%arg0: i32, %arg1: i32, %arg2: i32) -> (i32, i32) {
    %c0_i32 = arith.constant 0 : i32
    %c0_i32_0 = arith.constant 0 : i32
    return %arg2, %c0_i32 : i32, i32
  }
  func.func @transform_4(%arg0: i32, %arg1: i32, %arg2: i32) -> (i32, i32) {
    %c0_i32 = arith.constant 0 : i32
    %c0_i32_0 = arith.constant 0 : i32
    return %arg2, %c0_i32 : i32, i32
  }
  func.func @transform_5(%arg0: i32, %arg1: i32, %arg2: i32) -> (i32, i32, i32, i32) {
    %c0_i32 = arith.constant 0 : i32
    %c0_i32_0 = arith.constant 0 : i32
    return %arg0, %arg1, %arg2, %c0_i32 : i32, i32, i32, i32
  }
  func.func @transform_6(%arg0: i32, %arg1: i32, %arg2: i32) -> (i32, i32, i32, i32) {
    %c0_i32 = arith.constant 0 : i32
    %c0_i32_0 = arith.constant 0 : i32
    return %arg0, %arg1, %arg2, %c0_i32 : i32, i32, i32, i32
  }
  func.func @transform_7(%arg0: i32, %arg1: i32, %arg2: i32) -> (i32, i32, i32, i32) {
    %c0_i32 = arith.constant 0 : i32
    %c0_i32_0 = arith.constant 0 : i32
    return %arg0, %arg1, %arg2, %c0_i32 : i32, i32, i32, i32
  }
}

</mosaic_0001>

<bundles_post_ra>
// kernel: tpu_custom_call.1
= control target key start
LH: loop header
LB: loop body
LE: loop exit
PB: predicated region body
PF: predicated region fallthrough
CT: control target
= control target key end

     0   :  { %s8153_s0 = inlined_call_operand.hbm [shape: f32[2,256,256], index: 0, kind: input, shape index: {}]   ;;  %s8154_s1 = inlined_call_operand.hbm [shape: f32[1,256], index: 1, kind: input, shape index: {}]   ;;  %s8155_s2 = inlined_call_operand.hbm [shape: bf16[2,256,384], index: 2, kind: input, shape index: {}]   ;;  %s8156_s3 = inlined_call_operand.hbm [shape: f32[256,128], index: 3, kind: input, shape index: {}]   ;;  %s8157_s4 = inlined_call_operand.hbm [shape: f32[256,128], index: 4, kind: input, shape index: {}]   ;;  %s8158_s5 = inlined_call_operand.hbm [shape: bf16[2,2,256,128], index: 5, kind: output, shape index: {0}]   ;;  %s8159_s6 = inlined_call_operand.hbm [shape: bf16[2,2,256,128], index: 6, kind: output, shape index: {1}]   ;;  %s8160_s7 = inlined_call_operand.hbm [shape: bf16[2,2,256,128], index: 7, kind: output, shape index: {2}]  }
   0x1   :  { %8261 = sst [smem:[#allocation68_spill]] %s8153_s0 }
   0x2   :  { %8262 = sst [smem:[#allocation69_spill]] %s8154_s1 }
   0x3   :  { %8263 = sst [smem:[#allocation70_spill]] %s8155_s2 }
   0x4   :  { %8264 = sst [smem:[#allocation71_spill]] %s8156_s3 }
   0x5   :  { %13 = vsyncpa [#allocation3], 0 }
   0x6   :  { %15 = vsyncpa [#allocation3 + $0x1], 0 }
   0x7   :  { %16 = vsyncpa [#allocation6], 0 }
   0x8   :  { %17 = vsyncpa [#allocation9], 0 }
   0x9   :  { %18 = vsyncpa [#allocation4], 0 }
   0xa   :  { %20 = vsyncpa [#allocation4 + $0x1], 0 }
   0xb   :  { %21 = vsyncpa [#allocation13], 0 }
   0xc   :  { %23 = vsyncpa [#allocation13 + $0x1], 0  ;;  %s6458_s24 = smov 0   ;;  %s6460_s25 = smov 0  }
   0xd   :  { %s6462_s26 = smov 0   ;;  %s6464_s27 = smov 0  }
   0xe   :  { %s6466_s28 = smov 0   ;;  %s6468_s29 = smov 0  }
   0xf LB: > { %s6489_s30 = sadd.s32 4294967295, %s6400_s29   ;;  %s8164_s8 = sadd.s32 4294967294, %s6400_s29   ;;  %s6400_s29 = sphi %s6468_s29, %s29_s29   ;;  %s6396_s28 = sphi %s6466_s28, %s8436_s28   ;;  %s6392_s27 = sphi %s6464_s27, %s8435_s27   ;;  %s6388_s26 = sphi %s6462_s26, %s8434_s26   ;;  %s6384_s25 = sphi %s6460_s25, %s8433_s25   ;;  %s6380_s24 = sphi %s6458_s24, %s8432_s24  }
  0x10   : > { %p70_p0 = scmp.ne.s32.totalorder %s6384_s25, %s6380_s24  ;;  %p8161_p1 = scmp.eq.s32.totalorder %s6489_s30, 0 }
  0x11   : > { %p203_p3 = scmp.eq.s32.totalorder %s8164_s8, 1  ;;  %p4296_p5 = scmp.ge.s32.totalorder %s6400_s29, 1 }
  0x12   : > { %p6500_p4 = por %p8161_p1, %p70_p0  ;;  %p270_p7 = scmp.lt.s32.totalorder %s6400_s29, 3 }
  0x13   : > { %p6505_p6 = por %p203_p3, %p70_p0  ;;  %s6402_s12 = smov [#allocation5]  }
  0x14   : > { %s8265_s9 = scalar_select %p6500_p4, 1, 0 }
  0x15   : > { %s8266_s10 = scalar_select %p6505_p6, 1, 0 }
  0x16   : > { %p6510_p8 = pnand %p4296_p5, %p270_p7  ;;  %s283_s13 = sshll.u32 %s6402_s12, 4  ;;  %s284_s13 = int_to_ptr.vmem [resolvable:$true] %s283_s13 }
  0x17   : > { %s6403_s14 = smov [#allocation8]   ;;  %s6404_s17 = smov [#allocation7]  }
  0x18   : > { %s8267_s11 = scalar_select %p6510_p8, 1, 0 }
  0x19   : > { %p5742_p10 = pneg %p6510_p8  ;;  %s313_s15 = sshll.u32 %s6403_s14, 4  ;;  %s314_s15 = int_to_ptr.vmem [resolvable:$true] %s313_s15 }
  0x1a   : > { %s297_s18 = sshll.u32 %s6404_s17, 4  ;;  %s6135_s19 = scalar_lea.vmem %s284_s13, 32  ;;  %s298_s18 = int_to_ptr.vmem [resolvable:$true] %s297_s18 }
  0x1b   : > { %p6519_p11 = pnand %p5742_p10, %p8161_p1  ;;  %p6136_p13 = scmp.ne.s32.totalorder %s284_s13, %s6135_s19 }
  0x1c   : > { %p6143_p5 = scmp.lt.s32.totalorder %s284_s13, %s284_s13  ;;  %p6144_p7 = scmp.lt.s32.totalorder %s6135_s19, %s6135_s19 }
  0x1d   : > { %p6126_p12 = pneg %p6519_p11 }
  0x1e   : > { %p6145_p9 = por %p6144_p7, %p6143_p5 }
  0x1f   : > { %p6138_p0 = pnand %p6136_p13, %p6126_p12 }
  0x21   : > { %p6139_p3 = pneg %p6138_p0 }
  0x23   : > { %p6146_p10 = pnand %p6145_p9, %p6139_p3 }
  0x25   : > { %6149 = shalt.err (!%p6146_p10)
}
  0x26   : > { %s8269_s1 = sld [smem:[#allocation69_spill]]  ;;  %s6161_s22 = scalar_lea.vmem %s314_s15, 4096 }
  0x27   : > { %p6162_p1 = scmp.ne.s32.totalorder %s314_s15, %s6161_s22  ;;  %p6169_p13 = scmp.lt.s32.totalorder %s314_s15, %s314_s15 }
  0x28   : > { %p6170_p0 = scmp.lt.s32.totalorder %s6161_s22, %s6161_s22 }
  0x29   : > { %p6164_p2 = pnand %p6162_p1, %p6126_p12 }
  0x2a   : > { %p6171_p4 = por %p6170_p0, %p6169_p13 }
  0x2b   : > { %p6165_p6 = pneg %p6164_p2 }
  0x2c   : > { %5745 = dma.hbm_to_vmem [thread:$0]  (!%p6519_p11), %s8269_s1, 32, %s284_s13, [#allocation6]  }
  0x2d   : > { %p6172_p8 = pnand %p6171_p4, %p6165_p6 }
  0x2f   : > { %6175 = shalt.err (!%p6172_p8)
}
  0x30   : > { %s6405_s23 = smov 128   ;;  %s6406_s12 = smov 8  }
  0x31   : > { %s8270_s3 = sld [smem:[#allocation71_spill]]  ;;  %s6187_s17 = scalar_lea.vmem %s298_s18, 12288 }
  0x32   : > { %p6188_p1 = scmp.ne.s32.totalorder %s298_s18, %s6187_s17  ;;  %p6195_p6 = scmp.lt.s32.totalorder %s298_s18, %s298_s18 }
  0x33   : > { %p6196_p8 = scmp.lt.s32.totalorder %s6187_s17, %s6187_s17 }
  0x34   : > { %p6190_p2 = pnand %p6188_p1, %p6126_p12 }
  0x35   : > { %p6197_p9 = por %p6196_p8, %p6195_p6 }
  0x36   : > { %p6191_p4 = pneg %p6190_p2 }
  0x37   : > { %5751 = dma.hbm_to_vmem [thread:$0]  (!%p6519_p11), %s8270_s3, 4096, %s314_s15, [#allocation9], %s6405_s23, %s6405_s23, %s6406_s12  }
  0x38   : > { %p6198_p3 = pnand %p6197_p9, %p6191_p4 }
  0x3a   : > { %6201 = shalt.err (!%p6198_p3)
}
  0x3b   : > { %s6407_s19 = smov 192   ;;  %s6408_s20 = smov 12  }
  0x3c   : > { %s8271_s2 = sld [smem:[#allocation70_spill]]  ;;  %s6409_s15 = smov [#allocation10]  }
  0x3d   : > { %s329_s13 = sshll.u32 %s6409_s15, 4  ;;  %s330_s13 = int_to_ptr.vmem [resolvable:$true] %s329_s13 }
  0x3e   : > { %s6213_s14 = scalar_lea.vmem %s330_s13, 4096  ;;  %p6221_p13 = scmp.lt.s32.totalorder %s330_s13, %s330_s13 }
  0x3f   : > { %p6214_p5 = scmp.ne.s32.totalorder %s330_s13, %s6213_s14  ;;  %p6222_p0 = scmp.lt.s32.totalorder %s6213_s14, %s6213_s14 }
  0x41   : > { %p6216_p7 = pnand %p6214_p5, %p6126_p12  ;;  %p6223_p1 = por %p6222_p0, %p6221_p13 }
  0x42   : > { %5748 = dma.hbm_to_vmem [thread:$0]  (!%p6519_p11), %s8271_s2, 12288, %s298_s18, [#allocation6], %s6407_s19, %s6407_s19, %s6408_s20  }
  0x43   : > { %p6217_p10 = pneg %p6216_p7 }
  0x45   : > { %p6224_p2 = pnand %p6223_p1, %p6217_p10 }
  0x47   : > { %6227 = shalt.err (!%p6224_p2)
}
  0x48   : > { %5754 = dma.hbm_to_vmem [thread:$0]  (!%p6519_p11), %s8157_s4, 4096, %s330_s13, [#allocation9], %s6405_s23, %s6405_s23, %s6406_s12  }
  0x49   : > { %s48_s19 = sadd.s32 1, %s6396_s28  ;;  %s57_s16 = sadd.s32 1, %s6388_s26 }
  0x4a   : > { %p50_p12 = scmp.ge.s32.totalorder %s48_s19, 2  ;;  %p64_p4 = scmp.ne.s32.totalorder %s6388_s26, %s6384_s25 }
  0x4b   : > { %p65_p6 = scmp.eq.s32.totalorder %s6400_s29, 0  ;;  %p5773_p8 = scmp.lt.s32.totalorder %s6400_s29, 2 }
  0x4c   : > { %s8438_s19 = smov (%p50_p12, %s48_s19), 0  ;;  %p8272_p3 = scmp.eq.s32.totalorder %s6489_s30, 1 }
  0x4d   : > { %p66_p9 = por %p65_p6, %p64_p4  ;;  %s52_s21 = ssub.s32 %s6396_s28, %s8438_s19 }
  0x4e   : > { %p6573_p5 = por %p8272_p3, %p64_p4  ;;  %s343_s22 = sand.u32 1, %s6388_s26  }
  0x4f   : > { %p55_p7 = scmp.eq.s32.totalorder %s52_s21, 0  ;;  %s4302_s23 = sshll.u32 %s343_s22, 9 }
  0x50   : > { %s4709_s12 = sshll.u32 %s6396_s28, 13  ;;  %s8274_s0 = sld [smem:[#allocation68_spill]] }
  0x51   : > { %s6582_s15 = scalar_select %p55_p7, %s6388_s26, %s57_s16  }
  0x52   : > { %s347_s17 = scalar_lea.vmem [#allocation2], %s4302_s23  ;;  %p6589_p11 = pnand %p5773_p8, %p66_p9 }
  0x53   : > { %s357_s8 = sshll.u32 %s347_s17, 4  ;;  %s344_s2 = scalar_lea.sflag [#allocation3], %s343_s22  ;;  %s358_s8 = int_to_ptr.vmem [resolvable:$true] %s357_s8 }
  0x54   : > { %p6230_p10 = pneg %p6589_p11  ;;  %s6241_s21 = scalar_lea.vmem %s358_s8, 8192 }
  0x55   : > { %p6242_p13 = scmp.ne.s32.totalorder %s358_s8, %s6241_s21  ;;  %s6410_s16 = smov [#allocation2]  }
  0x56   : > { %s356_s18 = scalar_lea.hbm %s8274_s0, %s4709_s12  ;;  %s6246_s3 = sshll.u32 %s6410_s16, 4  ;;  %s6247_s3 = int_to_ptr.vmem [resolvable:$false] %s6246_s3 }
  0x57   : > { %p6244_p0 = pnand %p6242_p13, %p6230_p10  ;;  %s6248_s12 = scalar_lea.vmem %s6247_s3, 16384 }
  0x58   : > { %p6249_p2 = scmp.lt.s32.totalorder %s358_s8, %s6247_s3  ;;  %p6250_p12 = scmp.lt.s32.totalorder %s6248_s12, %s6241_s21 }
  0x59   : > { %p6245_p1 = pneg %p6244_p0 }
  0x5a   : > { %p6251_p4 = por %p6250_p12, %p6249_p2 }
  0x5c   : > { %p6252_p6 = pnand %p6251_p4, %p6245_p1 }
  0x5e   : > { %6255 = shalt.err (!%p6252_p6)
}
  0x5f   : > { %s6411_s23 = smov 256   ;;  %s6412_s13 = smov 16  }
  0x60   : > { %5758 = dma.hbm_to_vmem [thread:$0]  (!%p6589_p11), %s356_s18, 8192, %s358_s8, %s344_s2, %s6411_s23, %s6411_s23, %s6412_s13  }
  0x61   : > { %p8276_p8 = scmp.ne.s32.totalorder %s8267_s11, 0 }
  0x63   : > { %369 = sbr.rel (%p8276_p8) target bundleno = 916 (0x394), region = 40 }
  0x68   : > { %s6600_s22 = sand.u32 1, %s6384_s25   ;;  %p8277_p9 = scmp.ne.s32.totalorder %s8265_s9, 0 }
  0x69   : > { %s4306_s14 = sshll.u32 %s6600_s22, 9  ;;  %s372_s3 = scalar_lea.sflag [#allocation3], %s6600_s22 }
  0x6a   : > { %s6604_s17 = scalar_lea.vmem [#allocation2], %s4306_s14 }
  0x6b   : > { %6359 = dma.done.wait (%p8277_p9), %s372_s3, 8192  }
  0x6c   : > { %6361 = vsyncadd (%p8277_p9), %s372_s3, 4294959104  ;;  %p8278_p3 = scmp.eq.s32.totalorder %s6489_s30, 0 }
  0x6e   : > { %6363 = dma.done.wait (%p8278_p3), [#allocation6], 12320   ;;  %p8279_p7 = pmov %p8278_p3 }
  0x6f   : > { %p8280_p11 = pmov %p8278_p3 }
  0x70   : > { %6365 = vsyncadd (%p8279_p7), [#allocation6], 4294954976 }
  0x71   : > { %6367 = dma.done.wait (%p8280_p11), [#allocation9], 8192   ;;  %p8281_p10 = pmov %p8278_p3 }
  0x72   : > { %v6619_v0 = vld [vmem:[%s6604_s17] sm:$0xff]  ;;  %v6622_v1 = vld [vmem:[%s6604_s17 + $0x8] sm:$0xff]  ;;  %v6625_v2 = vld [vmem:[%s6604_s17 + $0x10] sm:$0xff]  ;;  %s8259_s1 = smov 64   ;;  %s7121_s2 = sshll.u32 %s6600_s22, 8 }
  0x73   : > { %6369 = vsyncadd (%p8281_p10), [#allocation9], 4294959104  ;;  %v508_v3 = vmul.f32 %v6619_v0, %v6619_v0  ;;  %v509_v4 = vmul.f32 %v6622_v1, %v6622_v1  ;;  %v6632_v5 = vld [vmem:[%s6604_s17 + $0x18] sm:$0xff]  ;;  %v510_v6 = vmul.f32 %v6625_v2, %v6625_v2  ;;  %v6637_v7 = vld [vmem:[%s6604_s17 + $0x20] sm:$0xff]  ;;  %s7136_s8 = scalar_lea.vmem [#allocation14], %s7121_s2  ;;  %s7412_s9 = scalar_lea.vmem [#allocation11], %s7121_s2 }
  0x74   : > { %v6640_v8 = vld [vmem:[%s6604_s17 + $0x28] sm:$0xff]  ;;  %v511_v9 = vmul.f32 %v6632_v5, %v6632_v5  ;;  %v512_v10 = vmul.f32 %v6637_v7, %v6637_v7  ;;  %v6649_v12 = vld [vmem:[%s6604_s17 + $0x30] sm:$0xff]  ;;  %v6652_v13 = vld [vmem:[%s6604_s17 + $0x38] sm:$0xff]  ;;  %s7423_s11 = scalar_lea.vmem [#allocation12], %s7121_s2  ;;  %s4902_s21 = sshll.u32 %s6392_s27, 12 }
  0x75   : > { %v513_v11 = vmul.f32 %v6640_v8, %v6640_v8  ;;  %v453_v14 = vld [vmem:[%s6604_s17 + $0x50] sm:$0xff]  ;;  %v572_v15 = vadd.f32 %v509_v4, %v508_v3  ;;  %v514_v16 = vmul.f32 %v6649_v12, %v6649_v12  ;;  %v515_v17 = vmul.f32 %v6652_v13, %v6652_v13  ;;  %v6660_v18 = vld [vmem:[%s6604_s17 + $0x58] sm:$0xff]  ;;  %v6663_v19 = vld [vmem:[%s6604_s17 + $0x40] sm:$0xff]  ;;  %s4045_s16 = sshll.u32 %s7412_s9, 4  ;;  %s4066_s12 = sshll.u32 %s7423_s11, 4  ;;  %s8032_s16 = int_to_ptr.vmem [resolvable:$true] %s4045_s16  ;;  %s8039_s12 = int_to_ptr.vmem [resolvable:$true] %s4066_s12 }
  0x76   : > { %v6666_v20 = vld [vmem:[%s6604_s17 + $0x48] sm:$0xff]  ;;  %v575_v22 = vadd.f32 %v511_v9, %v510_v6  ;;  %v516_v23 = vmul.f32 %v6663_v19, %v6663_v19  ;;  %v518_v26 = vmul.f32 %v453_v14, %v453_v14  ;;  %v519_v27 = vmul.f32 %v6660_v18, %v6660_v18  ;;  %v455_v28 = vld [vmem:[%s6604_s17 + $0x60] sm:$0xff]  ;;  %v457_v30 = vld [vmem:[%s6604_s17 + $0x70] sm:$0xff]  ;;  %s4087_s23 = sshll.u32 %s7136_s8, 4  ;;  %s8030_s14 = scalar_lea.hbm %s8158_s5, %s4902_s21  ;;  %s8047_s23 = int_to_ptr.vmem [resolvable:$true] %s4087_s23 }
  0x77   : > { %v578_v21 = vadd.f32 %v513_v11, %v512_v10  ;;  %573 = vadd.xlane.f32.xlu0 %v572_v15  ;;  %v517_v24 = vmul.f32 %v6666_v20, %v6666_v20  ;;  %v581_v25 = vadd.f32 %v515_v17, %v514_v16  ;;  %v6676_v29 = vld [vmem:[%s6604_s17 + $0x68] sm:$0xff]  ;;  %v6680_v31 = vld [vmem:[%s6604_s17 + $0x78] sm:$0xff]  ;;  %v520_v33 = vmul.f32 %v455_v28, %v455_v28  ;;  %v459_v38 = vld [vmem:[%s6604_s17 + $0x80] sm:$0xff]  ;;  %s8037_s2 = scalar_lea.hbm %s8159_s6, %s4902_s21  ;;  %s8045_s27 = scalar_lea.hbm %s8160_s7, %s4902_s21 }
  0x78   : > { %v521_v34 = vmul.f32 %v6676_v29, %v6676_v29  ;;  %v587_v35 = vadd.f32 %v519_v27, %v518_v26  ;;  %v522_v36 = vmul.f32 %v457_v30, %v457_v30  ;;  %v523_v37 = vmul.f32 %v6680_v31, %v6680_v31  ;;  %v460_v39 = vld [vmem:[%s6604_s17 + $0x88] sm:$0xff]  ;;  %v461_v40 = vld [vmem:[%s6604_s17 + $0x90] sm:$0xff]  ;;  %v462_v41 = vld [vmem:[%s6604_s17 + $0x98] sm:$0xff]  ;;  %s6414_s3 = smov [#allocation11]  }
  0x79   : > { %579 = vadd.xlane.f32.xlu1 %v578_v21  ;;  %v584_v32 = vadd.f32 %v517_v24, %v516_v23  ;;  %v524_v43 = vmul.f32 %v459_v38, %v459_v38  ;;  %v525_v44 = vmul.f32 %v460_v39, %v460_v39  ;;  %v526_v46 = vmul.f32 %v461_v40, %v461_v40  ;;  %v463_v48 = vld [vmem:[%s6604_s17 + $0xa0] sm:$0xff]  ;;  %v464_v49 = vld [vmem:[%s6604_s17 + $0xa8] sm:$0xff]  ;;  %v465_v50 = vld [vmem:[%s6604_s17 + $0xb0] sm:$0xff] }
  0x7a   : > { %v590_v42 = vadd.f32 %v521_v34, %v520_v33  ;;  %v593_v45 = vadd.f32 %v523_v37, %v522_v36  ;;  %v527_v47 = vmul.f32 %v462_v41, %v462_v41  ;;  %v466_v51 = vld [vmem:[%s6604_s17 + $0xb8] sm:$0xff]  ;;  %v467_v52 = vld [vmem:[%s6604_s17 + $0xc0] sm:$0xff]  ;;  %v528_v54 = vmul.f32 %v463_v48, %v463_v48  ;;  %v469_v56 = vld [vmem:[%s6604_s17 + $0xd0] sm:$0xff] }
  0x7b   : > { %576 = vadd.xlane.f32.xlu0 %v575_v22  ;;  %v596_v53 = vadd.f32 %v525_v44, %v524_v43  ;;  %v529_v55 = vmul.f32 %v464_v49, %v464_v49  ;;  %v468_v57 = vld [vmem:[%s6604_s17 + $0xc8] sm:$0xff]  ;;  %v530_v59 = vmul.f32 %v465_v50, %v465_v50  ;;  %v531_v60 = vmul.f32 %v466_v51, %v466_v51  ;;  %v470_v63 = vld [vmem:[%s6604_s17 + $0xd8] sm:$0xff]  ;;  %v471_v4 = vld [vmem:[%s6604_s17 + $0xe0] sm:$0xff] }
  0x7c   : > { %v599_v58 = vadd.f32 %v527_v47, %v526_v46  ;;  %v5839_v61 = vld [vmem:[#allocation7 + $0xac] ss:$12 sps:$4 sm:$0xff]   ;;  %v5841_v62 = vld [vmem:[#allocation7 + $0xa8] ss:$12 sps:$4 sm:$0xff]   ;;  %v532_v9 = vmul.f32 %v467_v52, %v467_v52  ;;  %v533_v10 = vmul.f32 %v468_v57, %v468_v57  ;;  %v5844_v11 = vld [vmem:[#allocation7 + $0x90] ss:$12 sps:$4 sm:$0xff]   ;;  %v534_v15 = vmul.f32 %v469_v56, %v469_v56 }
  0x7d   : > { %582 = vadd.xlane.f32.xlu1 %v581_v25  ;;  %v5842_v3 = vld [vmem:[#allocation7 + $0x94] ss:$12 sps:$4 sm:$0xff]   ;;  %1320 = vmatprep.subr.bf16.mxu0 %v5839_v61  ;;  %v602_v6 = vadd.f32 %v529_v55, %v528_v54  ;;  %v605_v14 = vadd.f32 %v531_v60, %v530_v59  ;;  %v535_v16 = vmul.f32 %v470_v63, %v470_v63  ;;  %v472_v17 = vld [vmem:[%s6604_s17 + $0xe8] sm:$0xff]  ;;  %v5867_v63 = vld [vmem:[#allocation7 + $0xb0] ss:$12 sps:$4 sm:$0xff]  }
  0x7e   : > { %1321 = vmatpush1.bf16.msra.mxu0 %v5841_v62  ;;  %v5845_v21 = vld [vmem:[#allocation7 + $0x7c] ss:$12 sps:$4 sm:$0xff]   ;;  %v473_v22 = vld [vmem:[%s6604_s17 + $0xf0] sm:$0xff]  ;;  %v608_v25 = vadd.f32 %v533_v10, %v532_v9  ;;  %v536_v26 = vmul.f32 %v471_v4, %v471_v4  ;;  %v537_v27 = vmul.f32 %v472_v17, %v472_v17  ;;  %v5847_v28 = vld [vmem:[#allocation7 + $0x78] ss:$12 sps:$4 sm:$0xff]  }
  0x7f   : > { %585 = vadd.xlane.f32.xlu0 %v584_v32  ;;  %1322 = vmatprep.subr.bf16.mxu0 %v5842_v3  ;;  %v474_v23 = vld [vmem:[%s6604_s17 + $0xf8] sm:$0xff]  ;;  %v475_v24 = vld [vmem:[%s6604_s17 + $0x100] sm:$0xff]  ;;  %v611_v30 = vadd.f32 %v535_v16, %v534_v15  ;;  %v538_v32 = vmul.f32 %v473_v22, %v473_v22  ;;  %v476_v34 = vld [vmem:[%s6604_s17 + $0x108] sm:$0xff] }
  0x80   : > { %v539_v33 = vmul.f32 %v474_v23, %v474_v23  ;;  %v477_v36 = vld [vmem:[%s6604_s17 + $0x110] sm:$0xff]  ;;  %v478_v37 = vld [vmem:[%s6604_s17 + $0x118] sm:$0xff]  ;;  %v479_v38 = vld [vmem:[%s6604_s17 + $0x120] sm:$0xff]  ;;  %v614_v39 = vadd.f32 %v537_v27, %v536_v26  ;;  %v540_v40 = vmul.f32 %v475_v24, %v475_v24  ;;  %v541_v41 = vmul.f32 %v476_v34, %v476_v34 }
  0x81   : > { %588 = vadd.xlane.f32.xlu1 %v587_v35  ;;  %v5848_v35 = vld [vmem:[#allocation7 + $0x64] ss:$12 sps:$4 sm:$0xff]   ;;  %v542_v44 = vmul.f32 %v477_v36, %v477_v36  ;;  %v5851_v47 = vld [vmem:[#allocation7 + $0x4c] ss:$12 sps:$4 sm:$0xff]   ;;  %v5853_v52 = vld [vmem:[#allocation7 + $0x48] ss:$12 sps:$4 sm:$0xff]   ;;  %v544_v54 = vmul.f32 %v479_v38, %v479_v38 }
  0x82   : > { %1323 = vmatpush1.bf16.msra.mxu0 %v5844_v11  ;;  %v617_v43 = vadd.f32 %v539_v33, %v538_v32  ;;  %v480_v46 = vld [vmem:[%s6604_s17 + $0x128] sm:$0xff]  ;;  %v481_v48 = vld [vmem:[%s6604_s17 + $0x130] sm:$0xff]  ;;  %v482_v49 = vld [vmem:[%s6604_s17 + $0x138] sm:$0xff] }
  0x83   : > { %591 = vadd.xlane.f32.xlu0 %v590_v42  ;;  %1324 = vmatprep.subr.bf16.mxu0 %v5845_v21  ;;  %v5850_v42 = vld [vmem:[#allocation7 + $0x60] ss:$12 sps:$4 sm:$0xff]   ;;  %v545_v55 = vmul.f32 %v480_v46, %v480_v46  ;;  %v486_v57 = vld [vmem:[%s6604_s17 + $0x158] sm:$0xff]  ;;  %v546_v60 = vmul.f32 %v481_v48, %v481_v48  ;;  %v547_v61 = vmul.f32 %v482_v49, %v482_v49 }
  0x84   : > { %v483_v50 = vld [vmem:[%s6604_s17 + $0x140] sm:$0xff]  ;;  %v484_v51 = vld [vmem:[%s6604_s17 + $0x148] sm:$0xff]  ;;  %v485_v56 = vld [vmem:[%s6604_s17 + $0x150] sm:$0xff]  ;;  %v551_v22 = vmul.f32 %v486_v57, %v486_v57 }
  0x85   : > { %594 = vadd.xlane.f32.xlu1 %v593_v45  ;;  %v543_v45 = vmul.f32 %v478_v37, %v478_v37  ;;  %v5854_v62 = vld [vmem:[#allocation7 + $0x34] ss:$12 sps:$4 sm:$0xff]   ;;  %v488_v4 = vld [vmem:[%s6604_s17 + $0x168] sm:$0xff]  ;;  %v548_v9 = vmul.f32 %v483_v50, %v483_v50  ;;  %v549_v10 = vmul.f32 %v484_v51, %v484_v51  ;;  %v5856_v15 = vld [vmem:[#allocation7 + $0x30] ss:$12 sps:$4 sm:$0xff]   ;;  %v629_v17 = vadd.f32 %v547_v61, %v546_v60 }
  0x86   : > { %1325 = vmatpush1.bf16.msra.mxu0 %v5847_v28  ;;  %v487_v3 = vld [vmem:[%s6604_s17 + $0x160] sm:$0xff]  ;;  %v489_v11 = vld [vmem:[%s6604_s17 + $0x170] sm:$0xff]  ;;  %v550_v21 = vmul.f32 %v485_v56, %v485_v56  ;;  %v492_v26 = vld [vmem:[%s6604_s17 + $0x188] sm:$0xff]  ;;  %v553_v32 = vmul.f32 %v488_v4, %v488_v4 }
  0x87   : > { %597 = vadd.xlane.f32.xlu0 %v596_v53  ;;  %1326 = vmatprep.subr.bf16.mxu0 %v5848_v35  ;;  %v620_v53 = vadd.f32 %v541_v41, %v540_v40  ;;  %v623_v59 = vadd.f32 %v543_v45, %v542_v44  ;;  %v5870_v16 = vld [vmem:[#allocation7 + $0x158] ss:$12 sps:$4 sm:$0xff]   ;;  %v5857_v23 = vld [vmem:[#allocation7 + $0x1c] ss:$12 sps:$4 sm:$0xff]   ;;  %v5875_v27 = vld [vmem:[#allocation7 + $0x140] ss:$12 sps:$4 sm:$0xff]   ;;  %v632_v28 = vadd.f32 %v549_v10, %v548_v9 }
  0x88   : > { %v5872_v24 = vld [vmem:[#allocation7 + $0x98] ss:$12 sps:$4 sm:$0xff]   ;;  %v493_v33 = vld [vmem:[%s6604_s17 + $0x190] sm:$0xff]  ;;  %v635_v36 = vadd.f32 %v551_v22, %v550_v21  ;;  %v554_v37 = vmul.f32 %v489_v11, %v489_v11  ;;  %v557_v46 = vmul.f32 %v492_v26, %v492_v26 }
  0x89   : > { %600 = vadd.xlane.f32.xlu1 %v599_v58  ;;  %v5865_v58 = vld [vmem:[#allocation7 + $0x170] ss:$12 sps:$4 sm:$0xff]   ;;  %v5859_v35 = vld [vmem:[#allocation7 + $0x18] ss:$12 sps:$4 sm:$0xff]   ;;  %v5877_v40 = vld [vmem:[#allocation7 + $0x80] ss:$12 sps:$4 sm:$0xff]   ;;  %v558_v50 = vmul.f32 %v493_v33, %v493_v33 }
  0x8a   : > { %1327 = vmatpush1.bf16.msra.mxu0 %v5850_v42  ;;  %5478 = vmatprep.subr.bf16.mxu1 %v5865_v58  ;;  %v494_v34 = vld [vmem:[%s6604_s17 + $0x198] sm:$0xff]  ;;  %v495_v41 = vld [vmem:[%s6604_s17 + $0x1a0] sm:$0xff]  ;;  %v496_v42 = vld [vmem:[%s6604_s17 + $0x1a8] sm:$0xff] }
  0x8b   : > { %603 = vadd.xlane.f32.xlu0 %v602_v6  ;;  %1328 = vmatprep.subr.bf16.mxu0 %v5851_v47  ;;  %v626_v6 = vadd.f32 %v545_v55, %v544_v54  ;;  %v497_v47 = vld [vmem:[%s6604_s17 + $0x1b0] sm:$0xff]  ;;  %v559_v51 = vmul.f32 %v494_v34, %v494_v34  ;;  %v499_v55 = vld [vmem:[%s6604_s17 + $0x1c0] sm:$0xff]  ;;  %v560_v58 = vmul.f32 %v495_v41, %v495_v41  ;;  %v502_v61 = vld [vmem:[%s6604_s17 + $0x1d8] sm:$0xff] }
  0x8c   : > { %5479 = vmatpush3.bf16.msra.mxu1 %v5867_v63  ;;  %v5862_v48 = vld [vmem:[#allocation7] ss:$12 sps:$4 sm:$0xff]   ;;  %v5882_v54 = vld [vmem:[#allocation7 + $0x68] ss:$12 sps:$4 sm:$0xff]   ;;  %v5885_v56 = vld [vmem:[#allocation7 + $0x110] ss:$12 sps:$4 sm:$0xff]  }
  0x8d   : > { %606 = vadd.xlane.f32.xlu1 %v605_v14  ;;  %v490_v14 = vld [vmem:[%s6604_s17 + $0x178] sm:$0xff]  ;;  %5480 = vmatprep.subr.bf16.mxu1 %v5870_v16  ;;  %v501_v60 = vld [vmem:[%s6604_s17 + $0x1d0] sm:$0xff]  ;;  %v647_v63 = vadd.f32 %v559_v51, %v558_v50  ;;  %v503_v11 = vld [vmem:[%s6604_s17 + $0x1e0] sm:$0xff] }
  0x8e   : > { %1329 = vmatpush1.bf16.msra.mxu0 %v5853_v52  ;;  %v555_v38 = vmul.f32 %v490_v14, %v490_v14  ;;  %v5863_v52 = vld [vmem:[#allocation7 + $0x16c] ss:$12 sps:$4 sm:$0xff]   ;;  %v5868_v9 = vld [vmem:[#allocation7 + $0x154] ss:$12 sps:$4 sm:$0xff]   ;;  %v5887_v10 = vld [vmem:[#allocation7 + $0x50] ss:$12 sps:$4 sm:$0xff]   ;;  %v566_v26 = vmul.f32 %v501_v60, %v501_v60  ;;  %v568_v34 = vmul.f32 %v503_v11, %v503_v11 }
  0x8f   : > { %609 = vadd.xlane.f32.xlu0 %v608_v25  ;;  %1330 = vmatprep.subr.bf16.mxu0 %v5854_v62  ;;  %v491_v25 = vld [vmem:[%s6604_s17 + $0x180] sm:$0xff]  ;;  %v5866_v62 = vld [vmem:[#allocation7 + $0x168] ss:$12 sps:$4 sm:$0xff]  }
  0x90   : > { %5481 = vmatpush3.bf16.msra.mxu1 %v5872_v24  ;;  %v556_v45 = vmul.f32 %v491_v25, %v491_v25  ;;  %v641_v49 = vadd.f32 %v555_v38, %v554_v37  ;;  %v504_v14 = vld [vmem:[%s6604_s17 + $0x1e8] sm:$0xff]  ;;  %v505_v22 = vld [vmem:[%s6604_s17 + $0x1f0] sm:$0xff] }
  0x91   : > { %612 = vadd.xlane.f32.xlu1 %v611_v30  ;;  %v552_v30 = vmul.f32 %v487_v3, %v487_v3  ;;  %5482 = vmatprep.subr.bf16.mxu1 %v5875_v27  ;;  %v562_v3 = vmul.f32 %v497_v47, %v497_v47  ;;  %v5871_v24 = vld [vmem:[#allocation7 + $0x150] ss:$12 sps:$4 sm:$0xff]   ;;  %v567_v27 = vmul.f32 %v502_v61, %v502_v61  ;;  %v5897_v41 = vld [vmem:[#allocation7 + $0x20] ss:$12 sps:$4 sm:$0xff]   ;;  %v5902_v47 = vld [vmem:[#allocation7 + $0x8] ss:$12 sps:$4 sm:$0xff]  }
  0x92   : > { %1331 = vmatpush1.bf16.msra.mxu0 %v5856_v15  ;;  %v644_v57 = vadd.f32 %v557_v46, %v556_v45  ;;  %v5890_v15 = vld [vmem:[#allocation7 + $0xf8] ss:$12 sps:$4 sm:$0xff]   ;;  %v570_v38 = vmul.f32 %v505_v22, %v505_v22  ;;  %v5888_v50 = vld [vmem:[#allocation7 + $0xf4] ss:$12 sps:$4 sm:$0xff]   ;;  %v5891_v51 = vld [vmem:[#allocation7 + $0xf0] ss:$12 sps:$4 sm:$0xff]  }
  0x93   : > { %615 = vadd.xlane.f32.xlu0 %v614_v39  ;;  %1332 = vmatprep.subr.bf16.mxu0 %v5857_v23  ;;  %v5860_v39 = vld [vmem:[#allocation7 + $0x4] ss:$12 sps:$4 sm:$0xff]   ;;  %v638_v44 = vadd.f32 %v553_v32, %v552_v30  ;;  %v506_v23 = vld [vmem:[%s6604_s17 + $0x1f8] sm:$0xff]  ;;  %v5895_v32 = vld [vmem:[#allocation7 + $0xe0] ss:$12 sps:$4 sm:$0xff]   ;;  %v659_v37 = vadd.f32 %v567_v27, %v566_v26 }
  0x94   : > { %5483 = vmatpush3.bf16.msra.mxu1 %v5877_v40  ;;  %v5892_v30 = vld [vmem:[#allocation7 + $0x38] ss:$12 sps:$4 sm:$0xff]  }
  0x95   : > { %618 = vadd.xlane.f32.xlu1 %v617_v43  ;;  %v5880_v43 = vld [vmem:[#allocation7 + $0x128] ss:$12 sps:$4 sm:$0xff]   ;;  %v5878_v40 = vld [vmem:[#allocation7 + $0x124] ss:$12 sps:$4 sm:$0xff]   ;;  %v5883_v45 = vld [vmem:[#allocation7 + $0x10c] ss:$12 sps:$4 sm:$0xff]  }
  0x96   : > { %1333 = vmatpush1.bf16.msra.mxu0 %v5859_v35  ;;  %5484 = vmatprep.subr.bf16.mxu1 %v5880_v43  ;;  %v569_v35 = vmul.f32 %v504_v14, %v504_v14 }
  0x97   : > { %621 = vadd.xlane.f32.xlu0 %v620_v53  ;;  %1334 = vmatprep.subr.bf16.mxu0 %v5860_v39  ;;  %v498_v53 = vld [vmem:[%s6604_s17 + $0x1b8] sm:$0xff]  ;;  %v571_v39 = vmul.f32 %v506_v23, %v506_v23 }
  0x98   : > { %v563_v4 = vmul.f32 %v498_v53, %v498_v53  ;;  %5485 = vmatpush3.bf16.msra.mxu1 %v5882_v54  ;;  %v662_v43 = vadd.f32 %v569_v35, %v568_v34  ;;  %v5896_v53 = vld [vmem:[#allocation7 + $0xd8] ss:$12 sps:$4 sm:$0xff]  }
  0x99   : > { %624 = vadd.xlane.f32.xlu1 %v623_v59  ;;  %v561_v59 = vmul.f32 %v496_v42, %v496_v42  ;;  %5486 = vmatprep.subr.bf16.mxu1 %v5885_v56  ;;  %v5900_v42 = vld [vmem:[#allocation7 + $0xc8] ss:$12 sps:$4 sm:$0xff]   ;;  %v665_v46 = vadd.f32 %v571_v39, %v570_v38  ;;  %v5898_v54 = vld [vmem:[#allocation7 + $0xc4] ss:$12 sps:$4 sm:$0xff]  }
  0x9a   : > { %1335 = vmatpush1.bf16.msra.mxu0 %v5862_v48  ;;  %v653_v25 = vadd.f32 %v563_v4, %v562_v3  ;;  %v5905_v48 = vld [vmem:[#allocation7 + $0x22c] ss:$12 sps:$4 sm:$0xff]   ;;  %v6734_v56 = vld [vmem:[#allocation7 + $0x2f0] ss:$12 sps:$4 sm:$0xff]  }
  0x9b   : > { %627 = vadd.xlane.f32.xlu0 %v626_v6  ;;  %v500_v6 = vld [vmem:[%s6604_s17 + $0x1c8] sm:$0xff]  ;;  %1336 = vmatprep.subr.bf16.mxu0 %v5863_v52  ;;  %v650_v16 = vadd.f32 %v561_v59, %v560_v58 }
  0x9c   : > { %v565_v21 = vmul.f32 %v500_v6, %v500_v6  ;;  %5487 = vmatpush3.bf16.msra.mxu1 %v5887_v10  ;;  %v5893_v52 = vld [vmem:[#allocation7 + $0xdc] ss:$12 sps:$4 sm:$0xff]   ;;  %v830_v10 = vlaneseq }
  0x9d   : > { %630 = vadd.xlane.f32.xlu1 %v629_v17  ;;  %v564_v17 = vmul.f32 %v499_v55, %v499_v55  ;;  %5488 = vmatprep.subr.bf16.mxu1 %v5890_v15  ;;  %v5901_v55 = vld [vmem:[#allocation7 + $0xc0] ss:$12 sps:$4 sm:$0xff]  }
  0x9e   : > { %1337 = vmatpush2.bf16.msra.mxu0 %v5866_v62  ;;  %v831_v22 = vshrl.u32 %v830_v10, 7 }
  0x9f   : > { %633 = vadd.xlane.f32.xlu0 %v632_v28  ;;  %1338 = vmatprep.subr.bf16.mxu0 %v5868_v9  ;;  %v5873_v28 = vld [vmem:[#allocation7 + $0x13c] ss:$12 sps:$4 sm:$0xff]   ;;  %v656_v33 = vadd.f32 %v565_v21, %v564_v17 }
  0xa0   : > { %5489 = vmatpush3.bf16.msra.mxu1 %v5892_v30  ;;  %v836_v30 = vsub.s32 1, %v831_v22  ;;  %v832_v34 = vsub.s32 0, %v831_v22 }
  0xa1   : > { %636 = vadd.xlane.f32.xlu1 %v635_v36  ;;  %v5876_v36 = vld [vmem:[#allocation7 + $0x138] ss:$12 sps:$4 sm:$0xff]   ;;  %5490 = vmatprep.subr.bf16.mxu1 %v5895_v32 }
  0xa2   : > { %1339 = vmatpush2.bf16.msra.mxu0 %v5871_v24 }
  0xa3   : > { %639 = vadd.xlane.f32.xlu0 %v638_v44  ;;  %1340 = vmatprep.subr.bf16.mxu0 %v5873_v28  ;;  %v5881_v44 = vld [vmem:[#allocation7 + $0x120] ss:$12 sps:$4 sm:$0xff]  }
  0xa4   : > { %5491 = vmatpush3.bf16.msra.mxu1 %v5897_v41 }
  0xa5   : > { %642 = vadd.xlane.f32.xlu1 %v641_v49  ;;  %v5886_v49 = vld [vmem:[#allocation7 + $0x108] ss:$12 sps:$4 sm:$0xff]   ;;  %5492 = vmatprep.subr.bf16.mxu1 %v5900_v42 }
  0xa6   : > { %1341 = vmatpush2.bf16.msra.mxu0 %v5876_v36 }
  0xa7   : > { %645 = vadd.xlane.f32.xlu0 %v644_v57  ;;  %1342 = vmatprep.subr.bf16.mxu0 %v5878_v40 }
  0xa8   : > { %5493 = vmatpush3.bf16.msra.mxu1 %v5902_v47 }
  0xa9   : > { %648 = vadd.xlane.f32.xlu1 %v647_v63  ;;  %2827 = vmatprep.subr.bf16.mxu1 %v5905_v48 }
  0xaa   : > { %1343 = vmatpush2.bf16.msra.mxu0 %v5881_v44 }
  0xab   : > { %651 = vadd.xlane.f32.xlu0 %v650_v16  ;;  %1344 = vmatprep.subr.bf16.mxu0 %v5883_v45 }
  0xad   : > { %654 = vadd.xlane.f32.xlu1 %v653_v25 }
  0xae   : > { %1345 = vmatpush2.bf16.msra.mxu0 %v5886_v49 }
  0xaf   : > { %657 = vadd.xlane.f32.xlu0 %v656_v33  ;;  %1346 = vmatprep.subr.bf16.mxu0 %v5888_v50  ;;  %v507_v33 = vld [vmem:[#allocation5] sm:$0x3] }
  0xb0   : > { %v6737_v41 = vrot.slane %v507_v33, %v836_v30  ;;  %v6741_v44 = vrot.slane %v507_v33, %v832_v34 }
  0xb1   : > { %660 = vadd.xlane.f32.xlu1 %v659_v37 }
  0xb2   : > { %1347 = vmatpush2.bf16.msra.mxu0 %v5891_v51 }
  0xb3   : > { %663 = vadd.xlane.f32.xlu0 %v662_v43  ;;  %1348 = vmatprep.subr.bf16.mxu0 %v5893_v52 }
  0xb5   : > { %666 = vadd.xlane.f32.xlu1 %v665_v46 }
  0xb6   : > { %1349 = vmatpush2.bf16.msra.mxu0 %v5896_v53 }
  0xb7   : > { %1350 = vmatprep.subr.bf16.mxu0 %v5898_v54 }
  0xba   : > { %1351 = vmatpush2.bf16.msra.mxu0 %v5901_v55 }
  0xbb   : > { %5590 = vmatprep.subr.bf16.mxu0 %v6734_v56 }
 0x100   : > { %v574_v57 = vpop.xlane.xlu0 %573 }
 0x101   : > { %v669_v58 = vmul.f32 0.00390625, %v574_v57 }
 0x102   : > { %v580_v59 = vpop.xlane.xlu1 %579 }
 0x103   : > { %v671_v60 = vmul.f32 0.00390625, %v580_v59  ;;  %v701_v61 = vadd.f32 1e-06, %v669_v58 }
 0x104   : > { %v577_v62 = vpop.xlane.xlu0 %576 }
 0x105   : > { %v703_v63 = vadd.f32 1e-06, %v671_v60  ;;  %5967 = vrsqrt.f32 %v701_v61  ;;  %v670_v3 = vmul.f32 0.00390625, %v577_v62 }
 0x106   : > { %v583_v4 = vpop.xlane.xlu1 %582 }
 0x107   : > { %5969 = vrsqrt.f32 %v703_v63  ;;  %v672_v6 = vmul.f32 0.00390625, %v583_v4  ;;  %v702_v9 = vadd.f32 1e-06, %v670_v3  ;;  %v5903_v63 = vld [vmem:[#allocation7 + $0x228] ss:$12 sps:$4 sm:$0xff]  }
 0x108   : > { %v586_v14 = vpop.xlane.xlu0 %585 }
 0x109   : > { %v704_v11 = vadd.f32 1e-06, %v672_v6  ;;  %5971 = vrsqrt.f32 %v702_v9  ;;  %v673_v16 = vmul.f32 0.00390625, %v586_v14  ;;  %v5908_v9 = vld [vmem:[#allocation7 + $0x214] ss:$12 sps:$4 sm:$0xff]  }
 0x10a   : > { %v589_v15 = vpop.xlane.xlu1 %588 }
 0x10b   : > { %5973 = vrsqrt.f32 %v704_v11  ;;  %v674_v17 = vmul.f32 0.00390625, %v589_v15  ;;  %v705_v21 = vadd.f32 1e-06, %v673_v16  ;;  %v6771_v15 = vld [vmem:[#allocation7 + $0x2d8] ss:$12 sps:$4 sm:$0xff]  }
 0x10c   : > { %v592_v24 = vpop.xlane.xlu0 %591 }
 0x10d   : > { %v706_v23 = vadd.f32 1e-06, %v674_v17  ;;  %5975 = vrsqrt.f32 %v705_v21  ;;  %v675_v26 = vmul.f32 0.00390625, %v592_v24 }
 0x10e   : > { %v595_v25 = vpop.xlane.xlu1 %594 }
 0x10f   : > { %5977 = vrsqrt.f32 %v706_v23  ;;  %v676_v27 = vmul.f32 0.00390625, %v595_v25  ;;  %v707_v28 = vadd.f32 1e-06, %v675_v26  ;;  %v5911_v25 = vld [vmem:[#allocation7 + $0x1fc] ss:$12 sps:$4 sm:$0xff]  }
 0x110   : > { %v598_v35 = vpop.xlane.xlu0 %597 }
 0x111   : > { %v708_v32 = vadd.f32 1e-06, %v676_v27  ;;  %v677_v37 = vmul.f32 0.00390625, %v598_v35  ;;  %5979 = vrsqrt.f32 %v707_v28  ;;  %v6778_v27 = vld [vmem:[#allocation7 + $0x218] ss:$12 sps:$4 sm:$0xff]  }
 0x112   : > { %v601_v36 = vpop.xlane.xlu1 %600  ;;  %v5968_v38 = vpop.eup %5967 }
 0x113   : > { %v678_v39 = vmul.f32 0.00390625, %v601_v36  ;;  %5981 = vrsqrt.f32 %v708_v32  ;;  %v766_v42 = vmul.f32 %v5968_v38, %v6622_v1  ;;  %v765_v43 = vmul.f32 %v5968_v38, %v6619_v0  ;;  %v6031_v32 = vld [vmem:[%s6604_s17 + $0x50] sm:$0xff]  ;;  %v5909_v38 = vld [vmem:[#allocation7 + $0x1f8] ss:$12 sps:$4 sm:$0xff]  }
 0x114   : > { %v5970_v40 = vpop.eup %5969  ;;  %v709_v46 = vadd.f32 1e-06, %v677_v37  ;;  %v604_v49 = vpop.xlane.xlu0 %603 }
 0x115   : > { %v770_v45 = vmul.f32 %v5970_v40, %v6640_v8  ;;  %v710_v48 = vadd.f32 1e-06, %v678_v39  ;;  %v841_v53 = vmul.f32 %v6737_v41, %v766_v42  ;;  %v840_v54 = vmul.f32 %v6741_v44, %v765_v43  ;;  %v6789_v39 = vld [vmem:[#allocation7 + $0x2c0] ss:$12 sps:$4 sm:$0xff]  }
 0x116   : > { %v5972_v47 = vpop.eup %5971  ;;  %v607_v55 = vpop.xlane.xlu1 %606  ;;  %5983 = vrsqrt.f32 %v709_v46  ;;  %v679_v58 = vmul.f32 0.00390625, %v604_v49 }
 0x117   : > { %v768_v51 = vmul.f32 %v5972_v47, %v6632_v5  ;;  %v767_v52 = vmul.f32 %v5972_v47, %v6625_v2  ;;  %v845_v0 = vmul.f32 %v6737_v41, %v770_v45  ;;  %5985 = vrsqrt.f32 %v710_v48  ;;  %v6800_v47 = vld [vmem:[#allocation7 + $0x2a8] ss:$12 sps:$4 sm:$0xff]  }
 0x118   : > { %v5974_v50 = vpop.eup %5973  ;;  %v769_v2 = vmul.f32 %v5970_v40, %v6637_v7  ;;  %v680_v3 = vmul.f32 0.00390625, %v607_v55  ;;  %v711_v7 = vadd.f32 1e-06, %v679_v58  ;;  %v610_v14 = vpop.xlane.xlu0 %609  ;;  %v5914_v40 = vld [vmem:[#allocation7 + $0x1e4] ss:$12 sps:$4 sm:$0xff]  }
 0x119   : > { %v772_v1 = vmul.f32 %v5974_v50, %v6652_v13  ;;  %v843_v8 = vmul.f32 %v6737_v41, %v768_v51  ;;  %v842_v57 = vmul.f32 %v6741_v44, %v767_v52  ;;  %v771_v60 = vmul.f32 %v5974_v50, %v6649_v12  ;;  %v6765_v12 = vld [vmem:[#allocation7 + $0x230] ss:$12 sps:$4 sm:$0xff]   ;;  %v5912_v52 = vld [vmem:[#allocation7 + $0x1e0] ss:$12 sps:$4 sm:$0xff]  }
 0x11a   : > { %v5976_v59 = vpop.eup %5975  ;;  %v844_v11 = vmul.f32 %v6741_v44, %v769_v2  ;;  %v712_v17 = vadd.f32 1e-06, %v680_v3  ;;  %v613_v23 = vpop.xlane.xlu1 %612  ;;  %5987 = vrsqrt.f32 %v711_v7  ;;  %v681_v26 = vmul.f32 0.00390625, %v610_v14  ;;  %v6033_v58 = vld [vmem:[%s6604_s17 + $0x70] sm:$0xff]  ;;  %v6034_v2 = vld [vmem:[%s6604_s17 + $0x88] sm:$0xff] }
 0x11b   : > { %v847_v5 = vmul.f32 %v6737_v41, %v772_v1  ;;  %v6755_v62 = vpack.c.bf16 %v843_v8, %v841_v53  ;;  %v6757_v13 = vpack.c.bf16 %v842_v57, %v840_v54  ;;  %v774_v4 = vmul.f32 %v5976_v59, %v6666_v20  ;;  %v5917_v1 = vld [vmem:[#allocation7 + $0x1cc] ss:$12 sps:$4 sm:$0xff]   ;;  %v6032_v8 = vld [vmem:[%s6604_s17 + $0x60] sm:$0xff]  ;;  %v5915_v3 = vld [vmem:[#allocation7 + $0x1c8] ss:$12 sps:$4 sm:$0xff]  }
 0x11c   : > { %v5978_v61 = vpop.eup %5977  ;;  %v846_v20 = vmul.f32 %v6741_v44, %v771_v60  ;;  %v773_v30 = vmul.f32 %v5976_v59, %v6663_v19  ;;  %v682_v34 = vmul.f32 0.00390625, %v613_v23  ;;  %5989 = vrsqrt.f32 %v712_v17  ;;  %v6792_v19 = vld [vmem:[#allocation7 + $0x200] ss:$12 sps:$4 sm:$0xff]   ;;  %v616_v46 = vpop.xlane.xlu0 %615  ;;  %v6834_v17 = vld [vmem:[#allocation7 + $0x278] ss:$12 sps:$4 sm:$0xff]  }
 0x11d   : > { %v6760_v6 = vpack.c.bf16 %v847_v5, %v845_v0  ;;  %v776_v10 = vmul.f32 %v5978_v61, %v6660_v18  ;;  %1352 = vmatprep.mubr.bf16.mxu0 %v6755_v62  ;;  %1545 = vmatprep.mubr.bf16.mxu1 %v6755_v62  ;;  %v5906_v18 = vld [vmem:[#allocation7 + $0x210] ss:$12 sps:$4 sm:$0xff]   ;;  %v849_v21 = vmul.f32 %v6737_v41, %v774_v4  ;;  %v713_v49 = vadd.f32 1e-06, %v681_v26  ;;  %v6810_v0 = vld [vmem:[#allocation7 + $0x1e8] ss:$12 sps:$4 sm:$0xff]  }
 0x11e   : > { %1353 = vmatmul.mubr.bf16.vlgmr.msra.gmra.mxu0 %v6757_v13  ;;  %1546 = vmatmul.mubr.bf16.vlgmr.msra.gmra.mxu1 %v6757_v13  ;;  %v5980_v16 = vpop.eup %5979  ;;  %v6780_v28 = vpack.c.bf16 %v846_v20, %v844_v11  ;;  %v775_v33 = vmul.f32 %v6031_v32, %v5978_v61  ;;  %v848_v43 = vmul.f32 %v6741_v44, %v773_v30  ;;  %v619_v45 = vpop.xlane.xlu1 %618  ;;  %v683_v54 = vmul.f32 0.00390625, %v616_v46  ;;  %v6035_v61 = vld [vmem:[%s6604_s17 + $0x98] sm:$0xff] }
 0x11f   : > { %2828 = vmatpush1.bf16.msra.mxu1 %v5903_v63  ;;  %1362 = vmatprep.mubr.bf16.mxu0 %v6760_v6  ;;  %v851_v22 = vmul.f32 %v6737_v41, %v776_v10  ;;  %v778_v36 = vmul.f32 %v5980_v16, %v6676_v29  ;;  %v684_v53 = vmul.f32 0.00390625, %v619_v45  ;;  %v777_v57 = vmul.f32 %v6032_v8, %v5980_v16  ;;  %v6823_v4 = vld [vmem:[#allocation7 + $0x290] ss:$12 sps:$4 sm:$0xff]  }
 0x120   : > { %v5982_v24 = vpop.eup %5981  ;;  %1553 = vmatprep.mubr.bf16.mxu1 %v6760_v6  ;;  %2829 = vmatprep.subr.bf16.mxu1 %v5908_v9  ;;  %v850_v29 = vmul.f32 %v6741_v44, %v775_v33  ;;  %v5920_v9 = vld [vmem:[#allocation7 + $0x1b4] ss:$12 sps:$4 sm:$0xff]   ;;  %v6826_v10 = vld [vmem:[#allocation7 + $0x1d0] ss:$12 sps:$4 sm:$0xff]   ;;  %v6842_v33 = vld [vmem:[#allocation7 + $0x1b8] ss:$12 sps:$4 sm:$0xff]  }
 0x121   : > { %5591 = vmatpush3.bf16.msra.mxu0 %v6765_v12  ;;  %v6785_v35 = vpack.c.bf16 %v851_v22, %v849_v21  ;;  %v780_v37 = vmul.f32 %v5982_v24, %v6680_v31  ;;  %v714_v31 = vadd.f32 1e-06, %v682_v34  ;;  %v853_v50 = vmul.f32 %v6737_v41, %v778_v36  ;;  %v5923_v32 = vld [vmem:[#allocation7 + $0x19c] ss:$12 sps:$4 sm:$0xff]  }
 0x122   : > { %5592 = vmatprep.subr.bf16.mxu0 %v6771_v15  ;;  %v6812_v55 = vpack.c.bf16 %v850_v29, %v848_v43  ;;  %v779_v59 = vmul.f32 %v6033_v58, %v5982_v24  ;;  %v852_v11 = vmul.f32 %v6741_v44, %v777_v57  ;;  %v716_v14 = vadd.f32 1e-06, %v684_v53  ;;  %v625_v16 = vpop.xlane.xlu1 %624  ;;  %v6036_v36 = vld [vmem:[%s6604_s17 + $0x80] sm:$0xff]  ;;  %v6038_v29 = vld [vmem:[%s6604_s17 + $0xa8] sm:$0xff]  ;;  %v6039_v45 = vld [vmem:[%s6604_s17 + $0xb8] sm:$0xff] }
 0x123   : > { %2830 = vmatpush1.bf16.msra.mxu1 %v5906_v18  ;;  %v6794_v42 = vpop.eup %5983  ;;  %v855_v51 = vmul.f32 %v6737_v41, %v780_v37  ;;  %5991 = vrsqrt.f32 %v714_v31  ;;  %v622_v18 = vpop.xlane.xlu0 %621  ;;  %v715_v21 = vadd.f32 1e-06, %v683_v54  ;;  %v686_v26 = vmul.f32 0.00390625, %v625_v16  ;;  %v6041_v16 = vld [vmem:[%s6604_s17 + $0xb0] sm:$0xff] }
 0x124   : > { %2831 = vmatprep.subr.bf16.mxu1 %v5911_v25  ;;  %v6802_v48 = vpop.eup %5985  ;;  %5993 = vrsqrt.f32 %v713_v49  ;;  %v782_v60 = vmul.f32 %v6034_v2, %v6794_v42  ;;  %v854_v20 = vmul.f32 %v6741_v44, %v779_v59  ;;  %v5918_v25 = vld [vmem:[#allocation7 + $0x1b0] ss:$12 sps:$4 sm:$0xff]   ;;  %v685_v30 = vmul.f32 0.00390625, %v622_v18  ;;  %v5921_v49 = vld [vmem:[#allocation7 + $0x198] ss:$12 sps:$4 sm:$0xff]  }
 0x125   : > { %5593 = vmatpush3.bf16.msra.mxu0 %v6778_v27  ;;  %v6817_v5 = vpack.c.bf16 %v855_v51, %v853_v50  ;;  %v784_v63 = vmul.f32 %v6035_v61, %v6802_v48  ;;  %5995 = vrsqrt.f32 %v716_v14  ;;  %v781_v37 = vmul.f32 %v6036_v36, %v6794_v42  ;;  %v6856_v50 = vld [vmem:[#allocation7 + $0x260] ss:$12 sps:$4 sm:$0xff]   ;;  %v5926_v42 = vld [vmem:[#allocation7 + $0x184] ss:$12 sps:$4 sm:$0xff]  }
 0x126   : > { %1363 = vmatmul.mubr.bf16.gmra.mxu0 %v6780_v28  ;;  %1554 = vmatmul.mubr.bf16.gmra.mxu1 %v6780_v28  ;;  %v857_v22 = vmul.f32 %v6737_v41, %v782_v60  ;;  %v6844_v34 = vpack.c.bf16 %v854_v20, %v852_v11  ;;  %5997 = vrsqrt.f32 %v715_v21  ;;  %v718_v51 = vadd.f32 1e-06, %v686_v26  ;;  %v631_v54 = vpop.xlane.xlu1 %630  ;;  %v5924_v61 = vld [vmem:[#allocation7 + $0x180] ss:$12 sps:$4 sm:$0xff]   ;;  %v6043_v26 = vld [vmem:[%s6604_s17 + $0xd8] sm:$0xff] }
 0x127   : > { %1372 = vmatprep.mubr.bf16.mxu0 %v6785_v35  ;;  %1561 = vmatprep.mubr.bf16.mxu1 %v6785_v35  ;;  %v6828_v7 = vpop.eup %5987  ;;  %v859_v23 = vmul.f32 %v6737_v41, %v784_v63  ;;  %v717_v57 = vadd.f32 1e-06, %v685_v30  ;;  %v628_v2 = vpop.xlane.xlu0 %627  ;;  %v688_v63 = vmul.f32 0.00390625, %v631_v54  ;;  %v6040_v20 = vld [vmem:[%s6604_s17 + $0xa0] sm:$0xff] }
 0x128   : > { %2832 = vmatpush1.bf16.msra.mxu1 %v5909_v38  ;;  %5594 = vmatprep.subr.bf16.mxu0 %v6789_v39  ;;  %v6037_v38 = vld [vmem:[%s6604_s17 + $0x90] sm:$0xff]  ;;  %v786_v31 = vmul.f32 %v6038_v29, %v6828_v7  ;;  %5999 = vrsqrt.f32 %v718_v51  ;;  %v785_v14 = vmul.f32 %v6040_v20, %v6828_v7  ;;  %v687_v21 = vmul.f32 0.00390625, %v628_v2  ;;  %v6047_v20 = vld [vmem:[%s6604_s17 + $0xf8] sm:$0xff] }
 0x129   : > { %2833 = vmatprep.subr.bf16.mxu1 %v5914_v40  ;;  %5595 = vmatpush3.bf16.msra.mxu0 %v6792_v19  ;;  %v5990_v24 = vpop.eup %5989  ;;  %v783_v40 = vmul.f32 %v6037_v38, %v6802_v48  ;;  %v6851_v43 = vpack.c.bf16 %v859_v23, %v857_v22  ;;  %v6859_v48 = vld [vmem:[#allocation7 + $0x1a0] ss:$12 sps:$4 sm:$0xff]   ;;  %6001 = vrsqrt.f32 %v717_v57  ;;  %v5930_v51 = vld [vmem:[#allocation7 + $0x2d0] ss:$12 sps:$4 sm:$0xff]  }
 0x12a   : > { %5596 = vmatprep.subr.bf16.mxu0 %v6800_v47  ;;  %v788_v46 = vmul.f32 %v6039_v45, %v5990_v24  ;;  %v861_v58 = vmul.f32 %v6737_v41, %v786_v31  ;;  %v787_v18 = vmul.f32 %v6041_v16, %v5990_v24  ;;  %v6042_v23 = vld [vmem:[%s6604_s17 + $0xc8] sm:$0xff]  ;;  %v5932_v36 = vld [vmem:[#allocation7 + $0x2d4] ss:$12 sps:$4 sm:$0xff]   ;;  %v860_v7 = vmul.f32 %v6741_v44, %v785_v14  ;;  %v637_v38 = vpop.xlane.xlu1 %636 }
 0x12b   : > { %v858_v53 = vmul.f32 %v6741_v44, %v783_v40  ;;  %v634_v40 = vpop.xlane.xlu0 %633  ;;  %v719_v31 = vadd.f32 1e-06, %v687_v21  ;;  %v6044_v57 = vld [vmem:[%s6604_s17 + $0xc0] sm:$0xff] }
 0x12c   : > { %2834 = vmatpush1.bf16.msra.mxu1 %v5912_v52  ;;  %v856_v52 = vmul.f32 %v6741_v44, %v781_v37  ;;  %v863_v59 = vmul.f32 %v6737_v41, %v788_v46  ;;  %v862_v24 = vmul.f32 %v6741_v44, %v787_v18  ;;  %v720_v37 = vadd.f32 1e-06, %v688_v63  ;;  %v6046_v63 = vld [vmem:[%s6604_s17 + $0xe8] sm:$0xff] }
 0x12d   : > { %2835 = vmatprep.subr.bf16.mxu1 %v5917_v1  ;;  %5597 = vmatpush3.bf16.msra.mxu0 %v6810_v0  ;;  %v6865_v1 = vld [vmem:[#allocation7 + $0x248] ss:$12 sps:$4 sm:$0xff]   ;;  %v5933_v16 = vld [vmem:[#allocation7 + $0x2b8] ss:$12 sps:$4 sm:$0xff]  }
 0x12e   : > { %1373 = vmatmul.mubr.bf16.gmra.mxu0 %v6812_v55  ;;  %1562 = vmatmul.mubr.bf16.gmra.mxu1 %v6812_v55  ;;  %v6875_v11 = vpack.c.bf16 %v858_v53, %v856_v52  ;;  %v6881_v22 = vpack.c.bf16 %v863_v59, %v861_v58  ;;  %v689_v52 = vmul.f32 0.00390625, %v634_v40  ;;  %v5935_v53 = vld [vmem:[#allocation7 + $0x2bc] ss:$12 sps:$4 sm:$0xff]   ;;  %v6894_v54 = vpack.c.bf16 %v862_v24, %v860_v7  ;;  %v6045_v59 = vld [vmem:[%s6604_s17 + $0xd0] sm:$0xff] }
 0x12f   : > { %1382 = vmatprep.mubr.bf16.mxu0 %v6817_v5  ;;  %1569 = vmatprep.mubr.bf16.mxu1 %v6817_v5  ;;  %6003 = vrsqrt.f32 %v720_v37  ;;  %v5938_v21 = vld [vmem:[#allocation7 + $0x2a4] ss:$12 sps:$4 sm:$0xff]   ;;  %v5936_v24 = vld [vmem:[#allocation7 + $0x2a0] ss:$12 sps:$4 sm:$0xff]  }
 0x130   : > { %2836 = vmatpush1.bf16.msra.mxu1 %v5915_v3  ;;  %5598 = vmatprep.subr.bf16.mxu0 %v6823_v4  ;;  %v5992_v8 = vpop.eup %5991  ;;  %v5929_v3 = vld [vmem:[#allocation7 + $0x2ec] ss:$12 sps:$4 sm:$0xff]   ;;  %6005 = vrsqrt.f32 %v719_v31  ;;  %v6048_v31 = vld [vmem:[%s6604_s17 + $0xe0] sm:$0xff] }
 0x131   : > { %2837 = vmatprep.subr.bf16.mxu1 %v5920_v9  ;;  %5599 = vmatpush3.bf16.msra.mxu0 %v6826_v10  ;;  %v5994_v60 = vpop.eup %5993  ;;  %v6873_v9 = vld [vmem:[#allocation7 + $0x188] ss:$12 sps:$4 sm:$0xff]   ;;  %v792_v30 = vmul.f32 %v6043_v26, %v5992_v8  ;;  %v791_v2 = vmul.f32 %v6045_v59, %v5992_v8  ;;  %v721_v26 = vadd.f32 1e-06, %v689_v52 }
 0x132   : > { %5600 = vmatprep.subr.bf16.mxu0 %v6834_v17  ;;  %v5996_v29 = vpop.eup %5995  ;;  %v789_v58 = vmul.f32 %v6044_v57, %v5994_v60 }
 0x133   : > { %v867_v46 = vmul.f32 %v6737_v41, %v792_v30  ;;  %v796_v14 = vmul.f32 %v6047_v20, %v5996_v29  ;;  %v866_v8 = vmul.f32 %v6741_v44, %v791_v2  ;;  %v5941_v2 = vld [vmem:[#allocation7 + $0x288] ss:$12 sps:$4 sm:$0xff]  }
 0x134   : > { %2838 = vmatpush1.bf16.msra.mxu1 %v5918_v25  ;;  %v790_v25 = vmul.f32 %v6042_v23, %v5994_v60  ;;  %v864_v60 = vmul.f32 %v6741_v44, %v789_v58  ;;  %v6051_v58 = vld [vmem:[%s6604_s17 + $0x118] sm:$0xff] }
 0x135   : > { %2839 = vmatprep.subr.bf16.mxu1 %v5923_v32  ;;  %5601 = vmatpush3.bf16.msra.mxu0 %v6842_v33  ;;  %v5927_v32 = vld [vmem:[#allocation7 + $0x2e8] ss:$12 sps:$4 sm:$0xff]  }
 0x136   : > { %1383 = vmatmul.mubr.bf16.gmra.mxu0 %v6844_v34  ;;  %1570 = vmatmul.mubr.bf16.gmra.mxu1 %v6844_v34  ;;  %v865_v45 = vmul.f32 %v6737_v41, %v790_v25  ;;  %v640_v25 = vpop.xlane.xlu0 %639  ;;  %v6910_v40 = vpack.c.bf16 %v866_v8, %v864_v60 }
 0x137   : > { %1392 = vmatprep.mubr.bf16.mxu0 %v6851_v43  ;;  %1577 = vmatprep.mubr.bf16.mxu1 %v6851_v43  ;;  %v691_v37 = vmul.f32 0.00390625, %v640_v25  ;;  %v5948_v25 = vld [vmem:[#allocation7 + $0x270] ss:$12 sps:$4 sm:$0xff]  }
 0x138   : > { %2840 = vmatpush1.bf16.msra.mxu1 %v5921_v49  ;;  %5602 = vmatprep.subr.bf16.mxu0 %v6856_v50  ;;  %v5998_v49 = vpop.eup %5997 }
 0x139   : > { %2841 = vmatprep.subr.bf16.mxu1 %v5926_v42  ;;  %5603 = vmatpush3.bf16.msra.mxu0 %v6859_v48  ;;  %v690_v42 = vmul.f32 0.00390625, %v637_v38  ;;  %v6000_v23 = vpop.eup %5999  ;;  %v5943_v38 = vld [vmem:[#allocation7 + $0x28c] ss:$12 sps:$4 sm:$0xff]  }
 0x13a   : > { %5604 = vmatprep.subr.bf16.mxu0 %v6865_v1  ;;  %v6002_v7 = vpop.eup %6001  ;;  %v800_v59 = vmul.f32 %v6051_v58, %v6000_v23  ;;  %v646_v20 = vpop.xlane.xlu0 %645 }
 0x13b   : > { %v722_v18 = vadd.f32 1e-06, %v690_v42 }
 0x13c   : > { %2842 = vmatpush1.bf16.msra.mxu1 %v5924_v61  ;;  %v6898_v61 = vpack.c.bf16 %v867_v46, %v865_v45  ;;  %v793_v45 = vmul.f32 %v6048_v31, %v5998_v49  ;;  %v6049_v46 = vld [vmem:[%s6604_s17 + $0xf0] sm:$0xff] }
 0x13d   : > { %2843 = vmatprep.subr.bf16.mxu1 %v5929_v3  ;;  %5605 = vmatpush3.bf16.msra.mxu0 %v6873_v9  ;;  %v794_v3 = vmul.f32 %v6046_v63, %v5998_v49  ;;  %6007 = vrsqrt.f32 %v722_v18  ;;  %v723_v63 = vadd.f32 1e-06, %v691_v37  ;;  %v6053_v37 = vld [vmem:[%s6604_s17 + $0x110] sm:$0xff] }
 0x13e   : > { %1393 = vmatmul.mubr.bf16.gmra.mxu0 %v6875_v11  ;;  %1578 = vmatmul.mubr.bf16.gmra.mxu1 %v6875_v11  ;;  %6009 = vrsqrt.f32 %v721_v26  ;;  %v868_v49 = vmul.f32 %v6741_v44, %v793_v45  ;;  %v693_v26 = vmul.f32 0.00390625, %v646_v20 }
 0x13f   : > { %1402 = vmatprep.mubr.bf16.mxu0 %v6881_v22  ;;  %1585 = vmatprep.mubr.bf16.mxu1 %v6881_v22  ;;  %v869_v30 = vmul.f32 %v6737_v41, %v794_v3  ;;  %v5950_v3 = vld [vmem:[#allocation7 + $0x274] ss:$12 sps:$4 sm:$0xff]   ;;  %6011 = vrsqrt.f32 %v723_v63 }
 0x140   : > { %2844 = vmatpush2.bf16.msra.mxu1 %v5927_v32  ;;  %v871_v32 = vmul.f32 %v6737_v41, %v796_v14  ;;  %v6004_v14 = vpop.eup %6003  ;;  %v725_v58 = vadd.f32 1e-06, %v693_v26 }
 0x141   : > { %2845 = vmatprep.subr.bf16.mxu1 %v5932_v36  ;;  %v643_v36 = vpop.xlane.xlu1 %642  ;;  %v6006_v8 = vpop.eup %6005 }
 0x142   : > { %v692_v42 = vmul.f32 0.00390625, %v643_v36  ;;  %v6914_v52 = vpack.c.bf16 %v871_v32, %v869_v30  ;;  %v5957_v30 = vld [vmem:[#allocation7 + $0x25c] ss:$12 sps:$4 sm:$0xff]  }
 0x143   : > { %v6052_v36 = vld [vmem:[%s6604_s17 + $0x100] sm:$0xff] }
 0x144   : > { %2846 = vmatpush2.bf16.msra.mxu1 %v5930_v51  ;;  %v795_v51 = vmul.f32 %v6049_v46, %v5996_v29  ;;  %v6054_v46 = vld [vmem:[%s6604_s17 + $0x128] sm:$0xff] }
 0x145   : > { %2847 = vmatprep.subr.bf16.mxu1 %v5935_v53  ;;  %v6050_v53 = vld [vmem:[%s6604_s17 + $0x108] sm:$0xff]  ;;  %v649_v60 = vpop.xlane.xlu1 %648 }
 0x146   : > { %1403 = vmatmul.mubr.bf16.gmra.mxu0 %v6894_v54  ;;  %1586 = vmatmul.mubr.bf16.gmra.mxu1 %v6894_v54  ;;  %v798_v57 = vmul.f32 %v6050_v53, %v6002_v7  ;;  %v870_v29 = vmul.f32 %v6741_v44, %v795_v51  ;;  %v694_v31 = vmul.f32 0.00390625, %v649_v60  ;;  %v802_v51 = vmul.f32 %v6054_v46, %v6006_v8  ;;  %v6059_v46 = vld [vmem:[%s6604_s17 + $0x158] sm:$0xff] }
 0x147   : > { %1412 = vmatprep.mubr.bf16.mxu0 %v6898_v61  ;;  %1593 = vmatprep.mubr.bf16.mxu1 %v6898_v61 }
 0x148   : > { %2848 = vmatpush2.bf16.msra.mxu1 %v5933_v16  ;;  %v724_v16 = vadd.f32 1e-06, %v692_v42  ;;  %v873_v18 = vmul.f32 %v6737_v41, %v798_v57  ;;  %v6926_v32 = vpack.c.bf16 %v870_v29, %v868_v49  ;;  %v6055_v42 = vld [vmem:[%s6604_s17 + $0x138] sm:$0xff]  ;;  %v726_v63 = vadd.f32 1e-06, %v694_v31 }
 0x149   : > { %2849 = vmatprep.subr.bf16.mxu1 %v5938_v21  ;;  %v875_v21 = vmul.f32 %v6737_v41, %v800_v59  ;;  %v804_v53 = vmul.f32 %v6055_v42, %v6004_v14  ;;  %v5955_v57 = vld [vmem:[#allocation7 + $0x258] ss:$12 sps:$4 sm:$0xff]   ;;  %v877_v49 = vmul.f32 %v6737_v41, %v802_v51 }
 0x14a   : > { %6013 = vrsqrt.f32 %v724_v16  ;;  %v5964_v59 = vld [vmem:[#allocation7 + $0x244] ss:$12 sps:$4 sm:$0xff]   ;;  %v655_v16 = vpop.xlane.xlu1 %654 }
 0x14b   : > { %v6930_v45 = vpack.c.bf16 %v875_v21, %v873_v18  ;;  %v879_v29 = vmul.f32 %v6737_v41, %v804_v53  ;;  %v5962_v18 = vld [vmem:[#allocation7 + $0x240] ss:$12 sps:$4 sm:$0xff]   ;;  %6015 = vrsqrt.f32 %v725_v58 }
 0x14c   : > { %2850 = vmatpush2.bf16.msra.mxu1 %v5936_v24  ;;  %v797_v24 = vmul.f32 %v6052_v36, %v6002_v7  ;;  %6017 = vrsqrt.f32 %v726_v63 }
 0x14d   : > { %2851 = vmatprep.subr.bf16.mxu1 %v5943_v38  ;;  %v799_v38 = vmul.f32 %v6053_v37, %v6000_v23  ;;  %v696_v37 = vmul.f32 0.00390625, %v655_v16  ;;  %v6061_v16 = vld [vmem:[%s6604_s17 + $0x150] sm:$0xff] }
 0x14e   : > { %1413 = vmatmul.mubr.bf16.gmra.mxu0 %v6910_v40  ;;  %1594 = vmatmul.mubr.bf16.gmra.mxu1 %v6910_v40  ;;  %v872_v23 = vmul.f32 %v6741_v44, %v797_v24  ;;  %v6946_v24 = vpack.c.bf16 %v879_v29, %v877_v49  ;;  %v6060_v49 = vld [vmem:[%s6604_s17 + $0x140] sm:$0xff] }
 0x14f   : > { %1422 = vmatprep.mubr.bf16.mxu0 %v6914_v52  ;;  %1601 = vmatprep.mubr.bf16.mxu1 %v6914_v52  ;;  %v874_v7 = vmul.f32 %v6741_v44, %v799_v38  ;;  %v6058_v38 = vld [vmem:[%s6604_s17 + $0x148] sm:$0xff]  ;;  %v728_v58 = vadd.f32 1e-06, %v696_v37 }
 0x150   : > { %2852 = vmatpush2.bf16.msra.mxu1 %v5941_v2  ;;  %v6008_v2 = vpop.eup %6007 }
 0x151   : > { %2853 = vmatprep.subr.bf16.mxu1 %v5950_v3  ;;  %v652_v3 = vpop.xlane.xlu0 %651  ;;  %v6010_v20 = vpop.eup %6009  ;;  %v6942_v60 = vpack.c.bf16 %v874_v7, %v872_v23  ;;  %v808_v51 = vmul.f32 %v6059_v46, %v6008_v2 }
 0x152   : > { %v695_v21 = vmul.f32 0.00390625, %v652_v3  ;;  %v806_v31 = vmul.f32 %v6058_v38, %v6010_v20  ;;  %v6012_v53 = vpop.eup %6011  ;;  %v661_v23 = vpop.xlane.xlu1 %660  ;;  %v805_v29 = vmul.f32 %v6060_v49, %v6010_v20 }
 0x154   : > { %2854 = vmatpush2.bf16.msra.mxu1 %v5948_v25  ;;  %v6056_v25 = vld [vmem:[%s6604_s17 + $0x120] sm:$0xff]  ;;  %v727_v42 = vadd.f32 1e-06, %v695_v21  ;;  %v698_v21 = vmul.f32 0.00390625, %v661_v23  ;;  %v880_v20 = vmul.f32 %v6741_v44, %v805_v29  ;;  %v6065_v23 = vld [vmem:[%s6604_s17 + $0x170] sm:$0xff] }
 0x155   : > { %2855 = vmatprep.subr.bf16.mxu1 %v5957_v30  ;;  %v801_v26 = vmul.f32 %v6056_v25, %v6006_v8  ;;  %v6057_v30 = vld [vmem:[%s6604_s17 + $0x130] sm:$0xff] }
 0x156   : > { %1423 = vmatmul.mubr.bf16.gmra.mxu0 %v6926_v32  ;;  %1602 = vmatmul.mubr.bf16.gmra.mxu1 %v6926_v32  ;;  %v803_v36 = vmul.f32 %v6057_v30, %v6004_v14  ;;  %6019 = vrsqrt.f32 %v727_v42  ;;  %v730_v46 = vadd.f32 1e-06, %v698_v21 }
 0x157   : > { %1432 = vmatprep.mubr.bf16.mxu0 %v6930_v45  ;;  %1609 = vmatprep.mubr.bf16.mxu1 %v6930_v45  ;;  %v876_v14 = vmul.f32 %v6741_v44, %v801_v26  ;;  %v6014_v7 = vpop.eup %6013  ;;  %6021 = vrsqrt.f32 %v728_v58  ;;  %v6062_v26 = vld [vmem:[%s6604_s17 + $0x168] sm:$0xff]  ;;  %v6064_v58 = vld [vmem:[%s6604_s17 + $0x160] sm:$0xff] }
 0x158   : > { %2856 = vmatpush2.bf16.msra.mxu1 %v5955_v57  ;;  %v878_v8 = vmul.f32 %v6741_v44, %v803_v36  ;;  %v658_v57 = vpop.xlane.xlu0 %657  ;;  %v810_v30 = vmul.f32 %v6062_v26, %v6012_v53  ;;  %v6063_v36 = vld [vmem:[%s6604_s17 + $0x178] sm:$0xff] }
 0x159   : > { %2857 = vmatprep.subr.bf16.mxu1 %v5964_v59  ;;  %v883_v59 = vmul.f32 %v6737_v41, %v808_v51  ;;  %v697_v63 = vmul.f32 0.00390625, %v658_v57  ;;  %v812_v37 = vmul.f32 %v6063_v36, %v6014_v7  ;;  %v6067_v26 = vld [vmem:[%s6604_s17 + $0x198] sm:$0xff] }
 0x15a   : > { %v6959_v3 = vpack.c.bf16 %v878_v8, %v876_v14  ;;  %v885_v42 = vmul.f32 %v6737_v41, %v810_v30  ;;  %v667_v8 = vpop.xlane.xlu1 %666 }
 0x15b   : > { %v729_v38 = vadd.f32 1e-06, %v697_v63  ;;  %v887_v14 = vmul.f32 %v6737_v41, %v812_v37  ;;  %v811_v63 = vmul.f32 %v6065_v23, %v6014_v7  ;;  %v700_v49 = vmul.f32 0.00390625, %v667_v8  ;;  %v6070_v23 = vld [vmem:[%s6604_s17 + $0x1a8] sm:$0xff] }
 0x15c   : > { %2858 = vmatpush2.bf16.msra.mxu1 %v5962_v18  ;;  %v807_v18 = vmul.f32 %v6061_v16, %v6008_v2  ;;  %v664_v57 = vpop.xlane.xlu0 %663 }
 0x15d   : > { %5702 = vmatprep.subr.bf16.mxu1 %v6734_v56  ;;  %v881_v56 = vmul.f32 %v6737_v41, %v806_v31  ;;  %v6016_v31 = vpop.eup %6015  ;;  %6023 = vrsqrt.f32 %v729_v38  ;;  %v6979_v29 = vpack.c.bf16 %v887_v14, %v885_v42  ;;  %v699_v16 = vmul.f32 0.00390625, %v664_v57  ;;  %v6068_v14 = vld [vmem:[%s6604_s17 + $0x180] sm:$0xff]  ;;  %v6069_v57 = vld [vmem:[%s6604_s17 + $0x190] sm:$0xff] }
 0x15e   : > { %1433 = vmatmul.mubr.bf16.gmra.mxu0 %v6942_v60  ;;  %1610 = vmatmul.mubr.bf16.gmra.mxu1 %v6942_v60  ;;  %v882_v2 = vmul.f32 %v6741_v44, %v807_v18  ;;  %v6018_v51 = vpop.eup %6017  ;;  %6025 = vrsqrt.f32 %v730_v46  ;;  %v6066_v18 = vld [vmem:[%s6604_s17 + $0x188] sm:$0xff]  ;;  %v886_v37 = vmul.f32 %v6741_v44, %v811_v63  ;;  %v732_v7 = vadd.f32 1e-06, %v700_v49  ;;  %v6071_v49 = vld [vmem:[%s6604_s17 + $0x1b8] sm:$0xff] }
 0x15f   : > { %1442 = vmatprep.mubr.bf16.mxu0 %v6946_v24  ;;  %1617 = vmatprep.mubr.bf16.mxu1 %v6946_v24  ;;  %v6963_v25 = vpack.c.bf16 %v883_v59, %v881_v56  ;;  %v809_v56 = vmul.f32 %v6064_v58, %v6012_v53  ;;  %v814_v21 = vmul.f32 %v6066_v18, %v6016_v31  ;;  %v731_v38 = vadd.f32 1e-06, %v699_v16 }
 0x160   : > { %v6976_v59 = vpack.c.bf16 %v882_v2, %v880_v20  ;;  %v816_v30 = vmul.f32 %v6067_v26, %v6018_v51  ;;  %6027 = vrsqrt.f32 %v732_v7  ;;  %v813_v8 = vmul.f32 %v6068_v14, %v6016_v31  ;;  %v6074_v14 = vld [vmem:[%s6604_s17 + $0x1c8] sm:$0xff] }
 0x161   : > { %v884_v53 = vmul.f32 %v6741_v44, %v809_v56  ;;  %v889_v20 = vmul.f32 %v6737_v41, %v814_v21  ;;  %v815_v58 = vmul.f32 %v6069_v57, %v6018_v51  ;;  %6029 = vrsqrt.f32 %v731_v38  ;;  %v6073_v38 = vld [vmem:[%s6604_s17 + $0x1b0] sm:$0xff]  ;;  %v6075_v57 = vld [vmem:[%s6604_s17 + $0x1d8] sm:$0xff] }
 0x162   : > { %v891_v2 = vmul.f32 %v6737_v41, %v816_v30  ;;  %v888_v31 = vmul.f32 %v6741_v44, %v813_v8 }
 0x163   : > { %v6020_v36 = vpop.eup %6019  ;;  %v6991_v42 = vpack.c.bf16 %v886_v37, %v884_v53  ;;  %v890_v51 = vmul.f32 %v6741_v44, %v815_v58  ;;  %v6072_v37 = vld [vmem:[%s6604_s17 + $0x1a0] sm:$0xff] }
 0x164   : > { %v6022_v46 = vpop.eup %6021  ;;  %v6995_v56 = vpack.c.bf16 %v891_v2, %v889_v20  ;;  %v818_v63 = vmul.f32 %v6070_v23, %v6020_v36  ;;  %v817_v7 = vmul.f32 %v6072_v37, %v6020_v36 }
 0x165   : > { %v820_v16 = vmul.f32 %v6071_v49, %v6022_v46  ;;  %v7007_v53 = vpack.c.bf16 %v890_v51, %v888_v31  ;;  %v819_v20 = vmul.f32 %v6073_v38, %v6022_v46  ;;  %v6076_v51 = vld [vmem:[%s6604_s17 + $0x1c0] sm:$0xff]  ;;  %v6078_v38 = vld [vmem:[%s6604_s17 + $0x1e8] sm:$0xff] }
 0x166   : > { %1443 = vmatmul.mubr.bf16.gmra.mxu0 %v6959_v3  ;;  %1618 = vmatmul.mubr.bf16.gmra.mxu1 %v6959_v3  ;;  %v893_v26 = vmul.f32 %v6737_v41, %v818_v63  ;;  %v892_v23 = vmul.f32 %v6741_v44, %v817_v7 }
 0x167   : > { %1452 = vmatprep.mubr.bf16.mxu0 %v6963_v25  ;;  %1625 = vmatprep.mubr.bf16.mxu1 %v6963_v25  ;;  %v895_v30 = vmul.f32 %v6737_v41, %v820_v16  ;;  %v894_v36 = vmul.f32 %v6741_v44, %v819_v20 }
 0x169   : > { %v7011_v2 = vpack.c.bf16 %v895_v30, %v893_v26  ;;  %v7023_v31 = vpack.c.bf16 %v894_v36, %v892_v23  ;;  %v6077_v30 = vld [vmem:[%s6604_s17 + $0x1d0] sm:$0xff]  ;;  %v6080_v36 = vld [vmem:[%s6604_s17 + $0x1e0] sm:$0xff] }
 0x16a   : > { %v6024_v18 = vpop.eup %6023 }
 0x16b   : > { %v6026_v21 = vpop.eup %6025  ;;  %v822_v8 = vmul.f32 %v6074_v14, %v6024_v18  ;;  %v821_v26 = vmul.f32 %v6076_v51, %v6024_v18  ;;  %v6079_v14 = vld [vmem:[%s6604_s17 + $0x1f8] sm:$0xff] }
 0x16c   : > { %v824_v58 = vmul.f32 %v6075_v57, %v6026_v21  ;;  %v823_v37 = vmul.f32 %v6077_v30, %v6026_v21 }
 0x16d   : > { %v6028_v63 = vpop.eup %6027  ;;  %v897_v46 = vmul.f32 %v6737_v41, %v822_v8  ;;  %v896_v8 = vmul.f32 %v6741_v44, %v821_v26 }
 0x16e   : > { %1453 = vmatmul.mubr.bf16.gmra.mxu0 %v6976_v59  ;;  %1626 = vmatmul.mubr.bf16.gmra.mxu1 %v6976_v59  ;;  %v899_v49 = vmul.f32 %v6737_v41, %v824_v58  ;;  %v6030_v16 = vpop.eup %6029  ;;  %v828_v57 = vmul.f32 %v6079_v14, %v6028_v63  ;;  %v898_v58 = vmul.f32 %v6741_v44, %v823_v37 }
 0x16f   : > { %1462 = vmatprep.mubr.bf16.mxu0 %v6979_v29  ;;  %1633 = vmatprep.mubr.bf16.mxu1 %v6979_v29  ;;  %v826_v20 = vmul.f32 %v6078_v38, %v6030_v16 }
 0x170   : > { %v7027_v7 = vpack.c.bf16 %v899_v49, %v897_v46  ;;  %v903_v21 = vmul.f32 %v6737_v41, %v828_v57  ;;  %v7039_v23 = vpack.c.bf16 %v898_v58, %v896_v8  ;;  %v825_v46 = vmul.f32 %v6080_v36, %v6030_v16  ;;  %v6081_v49 = vld [vmem:[%s6604_s17 + $0x1f0] sm:$0xff]  ;;  %s6260_s17 = sshll.u32 %s6414_s3, 4  ;;  %s6261_s17 = int_to_ptr.vmem [resolvable:$false] %s6260_s17 }
 0x171   : > { %v901_v18 = vmul.f32 %v6737_v41, %v826_v20  ;;  %v827_v51 = vmul.f32 %v6081_v49, %v6028_v63  ;;  %s6262_s0 = scalar_lea.vmem %s6261_s17, 8192  ;;  %p6263_p2 = scmp.lt.s32.totalorder %s8032_s16, %s6261_s17 }
 0x172   : > { %v900_v26 = vmul.f32 %v6741_v44, %v825_v46 }
 0x173   : > { %v7043_v30 = vpack.c.bf16 %v903_v21, %v901_v18  ;;  %v902_v37 = vmul.f32 %v6741_v44, %v827_v51 }
 0x175   : > { %v7051_v41 = vpack.c.bf16 %v902_v37, %v900_v26 }
 0x176   : > { %1463 = vmatmul.mubr.bf16.gmra.mxu0 %v6991_v42  ;;  %1634 = vmatmul.mubr.bf16.gmra.mxu1 %v6991_v42 }
 0x177   : > { %1472 = vmatprep.mubr.bf16.mxu0 %v6995_v56  ;;  %1641 = vmatprep.mubr.bf16.mxu1 %v6995_v56 }
 0x17e   : > { %1473 = vmatmul.mubr.bf16.gmra.mxu0 %v7007_v53  ;;  %1642 = vmatmul.mubr.bf16.gmra.mxu1 %v7007_v53 }
 0x17f   : > { %1482 = vmatprep.mubr.bf16.mxu0 %v7011_v2  ;;  %1649 = vmatprep.mubr.bf16.mxu1 %v7011_v2 }
 0x186   : > { %1483 = vmatmul.mubr.bf16.gmra.mxu0 %v7023_v31  ;;  %1650 = vmatmul.mubr.bf16.gmra.mxu1 %v7023_v31 }
 0x187   : > { %1492 = vmatprep.mubr.bf16.mxu0 %v7027_v7  ;;  %1657 = vmatprep.mubr.bf16.mxu1 %v7027_v7 }
 0x18e   : > { %1493 = vmatmul.mubr.bf16.gmra.mxu0 %v7039_v23  ;;  %1658 = vmatmul.mubr.bf16.gmra.mxu1 %v7039_v23 }
 0x18f   : > { %1502 = vmatprep.mubr.bf16.mxu0 %v7043_v30  ;;  %1665 = vmatprep.mubr.bf16.mxu1 %v7043_v30 }
 0x196   : > { %1503 = vmatmul.mubr.bf16.gmra.mxu0 %v7051_v41  ;;  %1666 = vmatmul.mubr.bf16.gmra.mxu1 %v7051_v41 }
 0x197   : > { %2859 = vmatprep.mubr.bf16.mxu1 %v6755_v62  ;;  %3052 = vmatprep.mubr.bf16.mxu0 %v6755_v62 }
 0x19e   : > { %2860 = vmatmul.mubr.bf16.vlgmr.msra.gmra.mxu1 %v6757_v13  ;;  %3053 = vmatmul.mubr.bf16.vlgmr.msra.gmra.mxu0 %v6757_v13 }
 0x19f   : > { %2869 = vmatprep.mubr.bf16.mxu1 %v6760_v6  ;;  %3060 = vmatprep.mubr.bf16.mxu0 %v6760_v6 }
 0x1a0   : > { %5710 = vmatpush3.bf16.msra.mxu1 %v6765_v12 }
 0x1a1   : > { %5703 = vmatprep.subr.bf16.mxu1 %v6771_v15 }
 0x1a4   : > { %5711 = vmatpush3.bf16.msra.mxu1 %v6778_v27 }
 0x1a5   : > { %5704 = vmatprep.subr.bf16.mxu1 %v6789_v39 }
 0x1a6   : > { %2870 = vmatmul.mubr.bf16.gmra.mxu1 %v6780_v28  ;;  %3061 = vmatmul.mubr.bf16.gmra.mxu0 %v6780_v28 }
 0x1a7   : > { %2879 = vmatprep.mubr.bf16.mxu1 %v6785_v35  ;;  %3068 = vmatprep.mubr.bf16.mxu0 %v6785_v35 }
 0x1a8   : > { %5712 = vmatpush3.bf16.msra.mxu1 %v6792_v19 }
 0x1a9   : > { %5705 = vmatprep.subr.bf16.mxu1 %v6800_v47 }
 0x1ac   : > { %5713 = vmatpush3.bf16.msra.mxu1 %v6810_v0 }
 0x1ad   : > { %5706 = vmatprep.subr.bf16.mxu1 %v6823_v4 }
 0x1ae   : > { %2880 = vmatmul.mubr.bf16.gmra.mxu1 %v6812_v55  ;;  %3069 = vmatmul.mubr.bf16.gmra.mxu0 %v6812_v55 }
 0x1af   : > { %2889 = vmatprep.mubr.bf16.mxu1 %v6817_v5  ;;  %3076 = vmatprep.mubr.bf16.mxu0 %v6817_v5 }
 0x1b0   : > { %5714 = vmatpush3.bf16.msra.mxu1 %v6826_v10 }
 0x1b1   : > { %5707 = vmatprep.subr.bf16.mxu1 %v6834_v17 }
 0x1b4   : > { %5715 = vmatpush3.bf16.msra.mxu1 %v6842_v33 }
 0x1b5   : > { %5708 = vmatprep.subr.bf16.mxu1 %v6856_v50 }
 0x1b6   : > { %2890 = vmatmul.mubr.bf16.gmra.mxu1 %v6844_v34  ;;  %3077 = vmatmul.mubr.bf16.gmra.mxu0 %v6844_v34 }
 0x1b7   : > { %2899 = vmatprep.mubr.bf16.mxu1 %v6851_v43  ;;  %3084 = vmatprep.mubr.bf16.mxu0 %v6851_v43 }
 0x1b8   : > { %5716 = vmatpush3.bf16.msra.mxu1 %v6859_v48 }
 0x1b9   : > { %5709 = vmatprep.subr.bf16.mxu1 %v6865_v1 }
 0x1bc   : > { %5717 = vmatpush3.bf16.msra.mxu1 %v6873_v9 }
 0x1be   : > { %2900 = vmatmul.mubr.bf16.gmra.mxu1 %v6875_v11  ;;  %3085 = vmatmul.mubr.bf16.gmra.mxu0 %v6875_v11 }
 0x1bf   : > { %2909 = vmatprep.mubr.bf16.mxu1 %v6881_v22  ;;  %3092 = vmatprep.mubr.bf16.mxu0 %v6881_v22 }
 0x1c6   : > { %2910 = vmatmul.mubr.bf16.gmra.mxu1 %v6894_v54  ;;  %3093 = vmatmul.mubr.bf16.gmra.mxu0 %v6894_v54 }
 0x1c7   : > { %2919 = vmatprep.mubr.bf16.mxu1 %v6898_v61  ;;  %3100 = vmatprep.mubr.bf16.mxu0 %v6898_v61 }
 0x1ce   : > { %2920 = vmatmul.mubr.bf16.gmra.mxu1 %v6910_v40  ;;  %3101 = vmatmul.mubr.bf16.gmra.mxu0 %v6910_v40 }
 0x1cf   : > { %2929 = vmatprep.mubr.bf16.mxu1 %v6914_v52  ;;  %3108 = vmatprep.mubr.bf16.mxu0 %v6914_v52 }
 0x1d6   : > { %2930 = vmatmul.mubr.bf16.gmra.mxu1 %v6926_v32  ;;  %3109 = vmatmul.mubr.bf16.gmra.mxu0 %v6926_v32 }
 0x1d7   : > { %2939 = vmatprep.mubr.bf16.mxu1 %v6930_v45  ;;  %3116 = vmatprep.mubr.bf16.mxu0 %v6930_v45 }
 0x1de   : > { %v7104_v44 = vpop.f32.mrf.mxu0  ;;  %v5494_v62 = vpop.f32.mrf.mxu1  ;;  %2940 = vmatmul.mubr.bf16.gmra.mxu1 %v6942_v60  ;;  %3117 = vmatmul.mubr.bf16.gmra.mxu0 %v6942_v60 }
 0x1df   : > { %1706 = vrot.lane.b32.xlu0 %v7104_v44, %s8259_s1  ;;  %2949 = vmatprep.mubr.bf16.mxu1 %v6946_v24 }
 0x1e0   : > { %3124 = vmatprep.mubr.bf16.mxu0 %v6946_v24  ;;  %v7112_v13 = vpop.f32.mrf.mxu0  ;;  %v5495_v6 = vpop.f32.mrf.mxu1 }
 0x1e1   : > { %v5496_v35 = vadd.f32 %v5495_v6, %v5494_v62 }
 0x1e2   : > { %v7114_v12 = vpop.f32.mrf.mxu0  ;;  %v5497_v15 = vpop.f32.mrf.mxu1 }
 0x1e3   : > { %1866 = vrot.lane.b32.xlu0 %v7112_v13, %s8259_s1  ;;  %1708 = vrot.lane.b32.xlu1 %v7114_v12, %s8259_s1 }
 0x1e4   : > { %v7123_v27 = vpop.f32.mrf.mxu0  ;;  %v5498_v28 = vpop.f32.mrf.mxu1 }
 0x1e5   : > { %v5499_v39 = vadd.f32 %v5498_v28, %v5497_v15 }
 0x1e6   : > { %v7125_v19 = vpop.f32.mrf.mxu0  ;;  %v5500_v47 = vpop.f32.mrf.mxu1  ;;  %2950 = vmatmul.mubr.bf16.gmra.mxu1 %v6959_v3  ;;  %3125 = vmatmul.mubr.bf16.gmra.mxu0 %v6959_v3 }
 0x1e7   : > { %v5068_v0 = vpack.c.bf16 %v5499_v39, %v5496_v35  ;;  %1868 = vrot.lane.b32.xlu1 %v7123_v27, %s8259_s1  ;;  %2959 = vmatprep.mubr.bf16.mxu1 %v6963_v25 }
 0x1e8   : > { %3132 = vmatprep.mubr.bf16.mxu0 %v6963_v25  ;;  %v7133_v55 = vpop.f32.mrf.mxu0  ;;  %v5501_v5 = vpop.f32.mrf.mxu1 }
 0x1e9   : > { %5069 = vst [vmem:[%s7136_s8] sm:$0xff] %v5068_v0   ;;  %1870 = vrot.lane.b32.xlu0 %v7133_v55, %s8259_s1  ;;  %v5502_v34 = vadd.f32 %v5501_v5, %v5500_v47 }
 0x1ea   : > { %v7141_v4 = vpop.f32.mrf.mxu0  ;;  %v5503_v10 = vpop.f32.mrf.mxu1 }
 0x1eb   : > { %1710 = vrot.lane.b32.xlu1 %v7125_v19, %s8259_s1 }
 0x1ec   : > { %v7145_v17 = vpop.f32.mrf.mxu0  ;;  %v5504_v33 = vpop.f32.mrf.mxu1 }
 0x1ed   : > { %v5505_v43 = vadd.f32 %v5504_v33, %v5503_v10 }
 0x1ee   : > { %v7147_v50 = vpop.f32.mrf.mxu0  ;;  %v5506_v48 = vpop.f32.mrf.mxu1  ;;  %2960 = vmatmul.mubr.bf16.gmra.mxu1 %v6976_v59  ;;  %3133 = vmatmul.mubr.bf16.gmra.mxu0 %v6976_v59 }
 0x1ef   : > { %v5073_v1 = vpack.c.bf16 %v5505_v43, %v5502_v34  ;;  %1712 = vrot.lane.b32.xlu1 %v7141_v4, %s8259_s1  ;;  %1714 = vrot.lane.b32.xlu0 %v7147_v50, %s8259_s1 }
 0x1f0   : > { %2969 = vmatprep.mubr.bf16.mxu1 %v6979_v29  ;;  %3140 = vmatprep.mubr.bf16.mxu0 %v6979_v29  ;;  %v7157_v9 = vpop.f32.mrf.mxu0  ;;  %v5507_v11 = vpop.f32.mrf.mxu1 }
 0x1f1   : > { %5415 = vst [vmem:[%s7136_s8 + $0x8] sm:$0xff] %v5073_v1   ;;  %v5508_v52 = vadd.f32 %v5507_v11, %v5506_v48 }
 0x1f2   : > { %v7160_v22 = vpop.f32.mrf.mxu0  ;;  %v5509_v54 = vpop.f32.mrf.mxu1 }
 0x1f3   : > { %1872 = vrot.lane.b32.xlu1 %v7145_v17, %s8259_s1  ;;  %1874 = vrot.lane.b32.xlu0 %v7157_v9, %s8259_s1 }
 0x1f4   : > { %v7166_v61 = vpop.f32.mrf.mxu0  ;;  %v5510_v40 = vpop.f32.mrf.mxu1 }
 0x1f5   : > { %v5511_v32 = vadd.f32 %v5510_v40, %v5509_v54 }
 0x1f6   : > { %v7168_v45 = vpop.f32.mrf.mxu0  ;;  %v5512_v60 = vpop.f32.mrf.mxu1  ;;  %2970 = vmatmul.mubr.bf16.gmra.mxu1 %v6991_v42  ;;  %3141 = vmatmul.mubr.bf16.gmra.mxu0 %v6991_v42 }
 0x1f7   : > { %v5078_v24 = vpack.c.bf16 %v5511_v32, %v5508_v52  ;;  %1716 = vrot.lane.b32.xlu1 %v7160_v22, %s8259_s1  ;;  %1718 = vrot.lane.b32.xlu0 %v7168_v45, %s8259_s1 }
 0x1f8   : > { %2979 = vmatprep.mubr.bf16.mxu1 %v6995_v56  ;;  %3148 = vmatprep.mubr.bf16.mxu0 %v6995_v56  ;;  %v7178_v3 = vpop.f32.mrf.mxu0  ;;  %v5513_v25 = vpop.f32.mrf.mxu1 }
 0x1f9   : > { %5416 = vst [vmem:[%s7136_s8 + $0x10] sm:$0xff] %v5078_v24   ;;  %v5514_v16 = vadd.f32 %v5513_v25, %v5512_v60 }
 0x1fa   : > { %v7181_v59 = vpop.f32.mrf.mxu0  ;;  %v5515_v29 = vpop.f32.mrf.mxu1 }
 0x1fb   : > { %1876 = vrot.lane.b32.xlu1 %v7166_v61, %s8259_s1  ;;  %1878 = vrot.lane.b32.xlu0 %v7178_v3, %s8259_s1 }
 0x1fc   : > { %v7187_v42 = vpop.f32.mrf.mxu0  ;;  %v5516_v63 = vpop.f32.mrf.mxu1 }
 0x1fd   : > { %v5517_v38 = vadd.f32 %v5516_v63, %v5515_v29 }
 0x1fe   : > { %v7189_v56 = vpop.f32.mrf.mxu0  ;;  %v5518_v20 = vpop.f32.mrf.mxu1  ;;  %2980 = vmatmul.mubr.bf16.gmra.mxu1 %v7007_v53  ;;  %3149 = vmatmul.mubr.bf16.gmra.mxu0 %v7007_v53 }
 0x1ff   : > { %v5083_v14 = vpack.c.bf16 %v5517_v38, %v5514_v16  ;;  %1720 = vrot.lane.b32.xlu1 %v7181_v59, %s8259_s1  ;;  %1722 = vrot.lane.b32.xlu0 %v7189_v56, %s8259_s1 }
 0x200   : > { %2989 = vmatprep.mubr.bf16.mxu1 %v7011_v2  ;;  %3156 = vmatprep.mubr.bf16.mxu0 %v7011_v2  ;;  %v7199_v57 = vpop.f32.mrf.mxu0  ;;  %v5519_v8 = vpop.f32.mrf.mxu1 }
 0x201   : > { %5417 = vst [vmem:[%s7136_s8 + $0x18] sm:$0xff] %v5083_v14   ;;  %v5520_v36 = vadd.f32 %v5519_v8, %v5518_v20 }
 0x202   : > { %v7202_v58 = vpop.f32.mrf.mxu0  ;;  %v5521_v18 = vpop.f32.mrf.mxu1 }
 0x203   : > { %1880 = vrot.lane.b32.xlu1 %v7187_v42, %s8259_s1  ;;  %1882 = vrot.lane.b32.xlu0 %v7199_v57, %s8259_s1 }
 0x204   : > { %v7208_v53 = vpop.f32.mrf.mxu0  ;;  %v5522_v21 = vpop.f32.mrf.mxu1 }
 0x205   : > { %v5523_v46 = vadd.f32 %v5522_v21, %v5521_v18 }
 0x206   : > { %v7210_v2 = vpop.f32.mrf.mxu0  ;;  %v5524_v49 = vpop.f32.mrf.mxu1  ;;  %2990 = vmatmul.mubr.bf16.gmra.mxu1 %v7023_v31  ;;  %3157 = vmatmul.mubr.bf16.gmra.mxu0 %v7023_v31 }
 0x207   : > { %v5088_v51 = vpack.c.bf16 %v5523_v46, %v5520_v36  ;;  %1724 = vrot.lane.b32.xlu1 %v7202_v58, %s8259_s1  ;;  %1726 = vrot.lane.b32.xlu0 %v7210_v2, %s8259_s1 }
 0x208   : > { %2999 = vmatprep.mubr.bf16.mxu1 %v7027_v7  ;;  %v7219_v26 = vpop.f32.mrf.mxu0  ;;  %v5525_v37 = vpop.f32.mrf.mxu1 }
 0x209   : > { %5418 = vst [vmem:[%s7136_s8 + $0x20] sm:$0xff] %v5088_v51   ;;  %v5526_v28 = vadd.f32 %v5525_v37, %v5524_v49 }
 0x20a   : > { %v7222_v62 = vpop.f32.mrf.mxu0  ;;  %v5527_v6 = vpop.f32.mrf.mxu1 }
 0x20b   : > { %1884 = vrot.lane.b32.xlu1 %v7208_v53, %s8259_s1  ;;  %1886 = vrot.lane.b32.xlu0 %v7219_v26, %s8259_s1 }
 0x20c   : > { %v7228_v31 = vpop.f32.mrf.mxu0  ;;  %v5528_v15 = vpop.f32.mrf.mxu1 }
 0x20d   : > { %v5529_v35 = vadd.f32 %v5528_v15, %v5527_v6 }
 0x20e   : > { %v7230_v39 = vpop.f32.mrf.mxu0  ;;  %v5530_v47 = vpop.f32.mrf.mxu1  ;;  %3000 = vmatmul.mubr.bf16.gmra.mxu1 %v7039_v23 }
 0x20f   : > { %v5093_v0 = vpack.c.bf16 %v5529_v35, %v5526_v28  ;;  %1728 = vrot.lane.b32.xlu1 %v7222_v62, %s8259_s1  ;;  %1730 = vrot.lane.b32.xlu0 %v7230_v39, %s8259_s1 }
 0x210   : > { %3009 = vmatprep.mubr.bf16.mxu1 %v7043_v30  ;;  %v7238_v5 = vpop.f32.mrf.mxu0  ;;  %v5531_v10 = vpop.f32.mrf.mxu1 }
 0x211   : > { %5419 = vst [vmem:[%s7136_s8 + $0x28] sm:$0xff] %v5093_v0   ;;  %v5532_v1 = vadd.f32 %v5531_v10, %v5530_v47 }
 0x212   : > { %v7241_v33 = vpop.f32.mrf.mxu0  ;;  %v5533_v34 = vpop.f32.mrf.mxu1 }
 0x213   : > { %1888 = vrot.lane.b32.xlu1 %v7228_v31, %s8259_s1  ;;  %1890 = vrot.lane.b32.xlu0 %v7238_v5, %s8259_s1 }
 0x214   : > { %v7247_v43 = vpop.f32.mrf.mxu0  ;;  %v5534_v48 = vpop.f32.mrf.mxu1 }
 0x215   : > { %v5535_v11 = vadd.f32 %v5534_v48, %v5533_v34 }
 0x216   : > { %v7249_v54 = vpop.f32.mrf.mxu0  ;;  %v5536_v40 = vpop.f32.mrf.mxu1  ;;  %3010 = vmatmul.mubr.bf16.gmra.mxu1 %v7051_v41 }
 0x217   : > { %v5098_v52 = vpack.c.bf16 %v5535_v11, %v5532_v1  ;;  %1732 = vrot.lane.b32.xlu1 %v7241_v33, %s8259_s1  ;;  %1734 = vrot.lane.b32.xlu0 %v7249_v54, %s8259_s1 }
 0x218   : > { %3164 = vmatprep.mubr.bf16.mxu1 %v7027_v7  ;;  %v7257_v32 = vpop.f32.mrf.mxu0  ;;  %v5537_v60 = vpop.f32.mrf.mxu1 }
 0x219   : > { %5420 = vst [vmem:[%s7136_s8 + $0x30] sm:$0xff] %v5098_v52   ;;  %v5538_v16 = vadd.f32 %v5537_v60, %v5536_v40 }
 0x21a   : > { %v7260_v24 = vpop.f32.mrf.mxu0  ;;  %v5539_v25 = vpop.f32.mrf.mxu1 }
 0x21b   : > { %1892 = vrot.lane.b32.xlu1 %v7247_v43, %s8259_s1  ;;  %1894 = vrot.lane.b32.xlu0 %v7257_v32, %s8259_s1 }
 0x21c   : > { %v7266_v29 = vpop.f32.mrf.mxu0  ;;  %v5540_v63 = vpop.f32.mrf.mxu1 }
 0x21d   : > { %v5541_v38 = vadd.f32 %v5540_v63, %v5539_v25 }
 0x21e   : > { %v7268_v7 = vpop.f32.mrf.mxu0  ;;  %v5542_v20 = vpop.f32.mrf.mxu1  ;;  %3165 = vmatmul.mubr.bf16.vlgmr.msra.gmra.mxu1 %v7039_v23 }
 0x21f   : > { %v5103_v14 = vpack.c.bf16 %v5541_v38, %v5538_v16  ;;  %1736 = vrot.lane.b32.xlu1 %v7260_v24, %s8259_s1  ;;  %1738 = vrot.lane.b32.xlu0 %v7268_v7, %s8259_s1 }
 0x220   : > { %3172 = vmatprep.mubr.bf16.mxu1 %v7043_v30  ;;  %v7276_v8 = vpop.f32.mrf.mxu0  ;;  %v5543_v18 = vpop.f32.mrf.mxu1 }
 0x221   : > { %5421 = vst [vmem:[%s7136_s8 + $0x38] sm:$0xff] %v5103_v14   ;;  %v5544_v49 = vadd.f32 %v5543_v18, %v5542_v20 }
 0x222   : > { %v7279_v21 = vpop.f32.mrf.mxu0  ;;  %v5545_v36 = vpop.f32.mrf.mxu1 }
 0x223   : > { %1896 = vrot.lane.b32.xlu1 %v7266_v29, %s8259_s1  ;;  %1898 = vrot.lane.b32.xlu0 %v7276_v8, %s8259_s1 }
 0x224   : > { %v7285_v23 = vpop.f32.mrf.mxu0  ;;  %v5546_v46 = vpop.f32.mrf.mxu1 }
 0x225   : > { %v5547_v51 = vadd.f32 %v5546_v46, %v5545_v36 }
 0x226   : > { %v7287_v30 = vpop.f32.mrf.mxu0  ;;  %v5548_v37 = vpop.f32.mrf.mxu1  ;;  %3173 = vmatmul.mubr.bf16.gmra.mxu1 %v7051_v41 }
 0x227   : > { %v5108_v6 = vpack.c.bf16 %v5547_v51, %v5544_v49  ;;  %1740 = vrot.lane.b32.xlu1 %v7279_v21, %s8259_s1  ;;  %1742 = vrot.lane.b32.xlu0 %v7287_v30, %s8259_s1 }
 0x228   : > { %v7294_v15 = vpop.f32.mrf.mxu0  ;;  %v5549_v28 = vpop.f32.mrf.mxu1 }
 0x229   : > { %5422 = vst [vmem:[%s7136_s8 + $0x40] sm:$0xff] %v5108_v6   ;;  %v5550_v10 = vadd.f32 %v5549_v28, %v5548_v37 }
 0x22a   : > { %v7297_v35 = vpop.f32.mrf.mxu0  ;;  %v5551_v47 = vpop.f32.mrf.mxu1 }
 0x22b   : > { %1900 = vrot.lane.b32.xlu1 %v7285_v23, %s8259_s1  ;;  %1902 = vrot.lane.b32.xlu0 %v7294_v15, %s8259_s1 }
 0x22c   : > { %v7303_v41 = vpop.f32.mrf.mxu0  ;;  %v5552_v0 = vpop.f32.mrf.mxu1 }
 0x22d   : > { %v5553_v34 = vadd.f32 %v5552_v0, %v5551_v47 }
 0x22e   : > { %v7305_v48 = vpop.f32.mrf.mxu0  ;;  %v5554_v1 = vpop.f32.mrf.mxu1 }
 0x22f   : > { %8282 = vst [vmem:[#allocation20_spill] sm:$0xff] %v7305_v48  ;;  %v5113_v11 = vpack.c.bf16 %v5553_v34, %v5550_v10  ;;  %1744 = vrot.lane.b32.xlu1 %v7297_v35, %s8259_s1  ;;  %1746 = vrot.lane.b32.xlu0 %v7305_v48, %s8259_s1 }
 0x230   : > { %v7311_v40 = vpop.f32.mrf.mxu0  ;;  %v5555_v52 = vpop.f32.mrf.mxu1 }
 0x231   : > { %8283 = vst [vmem:[#allocation21_spill] sm:$0xff] %v7311_v40  ;;  %5423 = vst [vmem:[%s7136_s8 + $0x48] sm:$0xff] %v5113_v11   ;;  %v5556_v38 = vadd.f32 %v5555_v52, %v5554_v1 }
 0x232   : > { %v7314_v60 = vpop.f32.mrf.mxu0  ;;  %v5557_v25 = vpop.f32.mrf.mxu1 }
 0x233   : > { %8284 = vst [vmem:[#allocation22_spill] sm:$0xff] %v7314_v60  ;;  %1904 = vrot.lane.b32.xlu1 %v7303_v41, %s8259_s1  ;;  %1906 = vrot.lane.b32.xlu0 %v7311_v40, %s8259_s1 }
 0x234   : > { %v7320_v63 = vpop.f32.mrf.mxu0  ;;  %v5558_v16 = vpop.f32.mrf.mxu1 }
 0x235   : > { %8285 = vst [vmem:[#allocation23_spill] sm:$0xff] %v7320_v63  ;;  %v5559_v20 = vadd.f32 %v5558_v16, %v5557_v25 }
 0x236   : > { %v7322_v14 = vpop.f32.mrf.mxu0  ;;  %v5560_v18 = vpop.f32.mrf.mxu1 }
 0x237   : > { %8286 = vst [vmem:[#allocation24_spill] sm:$0xff] %v7322_v14  ;;  %v5118_v36 = vpack.c.bf16 %v5559_v20, %v5556_v38  ;;  %1748 = vrot.lane.b32.xlu1 %v7314_v60, %s8259_s1  ;;  %1750 = vrot.lane.b32.xlu0 %v7322_v14, %s8259_s1 }
 0x238   : > { %v7328_v46 = vpop.f32.mrf.mxu0  ;;  %v5561_v49 = vpop.f32.mrf.mxu1 }
 0x239   : > { %8287 = vst [vmem:[#allocation25_spill] sm:$0xff] %v7328_v46  ;;  %5424 = vst [vmem:[%s7136_s8 + $0x50] sm:$0xff] %v5118_v36   ;;  %v5562_v47 = vadd.f32 %v5561_v49, %v5560_v18 }
 0x23a   : > { %v7331_v51 = vpop.f32.mrf.mxu0  ;;  %v5563_v37 = vpop.f32.mrf.mxu1 }
 0x23b   : > { %8288 = vst [vmem:[#allocation26_spill] sm:$0xff] %v7331_v51  ;;  %1908 = vrot.lane.b32.xlu1 %v7320_v63, %s8259_s1  ;;  %1910 = vrot.lane.b32.xlu0 %v7328_v46, %s8259_s1 }
 0x23c   : > { %v7337_v6 = vpop.f32.mrf.mxu0  ;;  %v5564_v28 = vpop.f32.mrf.mxu1 }
 0x23d   : > { %8289 = vst [vmem:[#allocation27_spill] sm:$0xff] %v7337_v6  ;;  %v5565_v0 = vadd.f32 %v5564_v28, %v5563_v37 }
 0x23e   : > { %v7339_v10 = vpop.f32.mrf.mxu0  ;;  %v5566_v34 = vpop.f32.mrf.mxu1 }
 0x23f   : > { %8290 = vst [vmem:[#allocation28_spill] sm:$0xff] %v7339_v10  ;;  %v5123_v1 = vpack.c.bf16 %v5565_v0, %v5562_v47  ;;  %1752 = vrot.lane.b32.xlu1 %v7331_v51, %s8259_s1  ;;  %1754 = vrot.lane.b32.xlu0 %v7339_v10, %s8259_s1 }
 0x240   : > { %v7345_v11 = vpop.f32.mrf.mxu0  ;;  %v5567_v52 = vpop.f32.mrf.mxu1 }
 0x241   : > { %8291 = vst [vmem:[#allocation29_spill] sm:$0xff] %v7345_v11  ;;  %5425 = vst [vmem:[%s7136_s8 + $0x58] sm:$0xff] %v5123_v1   ;;  %v5568_v18 = vadd.f32 %v5567_v52, %v5566_v34 }
 0x242   : > { %v7348_v25 = vpop.f32.mrf.mxu0  ;;  %v5569_v16 = vpop.f32.mrf.mxu1 }
 0x243   : > { %8292 = vst [vmem:[#allocation30_spill] sm:$0xff] %v7348_v25  ;;  %1912 = vrot.lane.b32.xlu1 %v7337_v6, %s8259_s1  ;;  %1914 = vrot.lane.b32.xlu0 %v7345_v11, %s8259_s1 }
 0x244   : > { %v7354_v38 = vpop.f32.mrf.mxu0  ;;  %v5570_v20 = vpop.f32.mrf.mxu1 }
 0x245   : > { %8293 = vst [vmem:[#allocation31_spill] sm:$0xff] %v7354_v38  ;;  %v5571_v36 = vadd.f32 %v5570_v20, %v5569_v16 }
 0x246   : > { %v7356_v49 = vpop.f32.mrf.mxu0  ;;  %v5572_v37 = vpop.f32.mrf.mxu1 }
 0x247   : > { %8294 = vst [vmem:[#allocation32_spill] sm:$0xff] %v7356_v49  ;;  %v5128_v28 = vpack.c.bf16 %v5571_v36, %v5568_v18  ;;  %1756 = vrot.lane.b32.xlu1 %v7348_v25, %s8259_s1  ;;  %1758 = vrot.lane.b32.xlu0 %v7356_v49, %s8259_s1 }
 0x248   : > { %v7362_v47 = vpop.f32.mrf.mxu0  ;;  %v5573_v0 = vpop.f32.mrf.mxu1 }
 0x249   : > { %8295 = vst [vmem:[#allocation33_spill] sm:$0xff] %v7362_v47  ;;  %5426 = vst [vmem:[%s7136_s8 + $0x60] sm:$0xff] %v5128_v28   ;;  %v5574_v16 = vadd.f32 %v5573_v0, %v5572_v37  ;;  %v968_v28 = vld [vmem:[#allocation10] sm:$0xff]  ;;  %v937_v0 = vld [vmem:[#allocation8 + $0x8] sm:$0xff] }
 0x24a   : > { %v7365_v1 = vpop.f32.mrf.mxu0  ;;  %v5575_v11 = vpop.f32.mrf.mxu1  ;;  %v1675_v51 = vmul.f32 %v7114_v12, %v937_v0 }
 0x24b   : > { %8296 = vst [vmem:[#allocation34_spill] sm:$0xff] %v7365_v1  ;;  %1916 = vrot.lane.b32.xlu1 %v7354_v38, %s8259_s1  ;;  %1918 = vrot.lane.b32.xlu0 %v7362_v47, %s8259_s1  ;;  %v936_v47 = vld [vmem:[#allocation8] sm:$0xff] }
 0x24c   : > { %v7371_v34 = vpop.f32.mrf.mxu0  ;;  %v5576_v52 = vpop.f32.mrf.mxu1 }
 0x24d   : > { %8297 = vst [vmem:[#allocation35_spill] sm:$0xff] %v7371_v34  ;;  %v5577_v20 = vadd.f32 %v5576_v52, %v5575_v11  ;;  %v969_v52 = vld [vmem:[#allocation10 + $0x8] sm:$0xff] }
 0x24e   : > { %v7373_v18 = vpop.f32.mrf.mxu0  ;;  %v5578_v36 = vpop.f32.mrf.mxu1 }
 0x24f   : > { %8298 = vst [vmem:[#allocation36_spill] sm:$0xff] %v7373_v18  ;;  %v5133_v49 = vpack.c.bf16 %v5577_v20, %v5574_v16  ;;  %1760 = vrot.lane.b32.xlu1 %v7365_v1, %s8259_s1  ;;  %1762 = vrot.lane.b32.xlu0 %v7373_v18, %s8259_s1  ;;  %v1674_v16 = vmul.f32 %v7104_v44, %v936_v47 }
 0x250   : > { %v7379_v38 = vpop.f32.mrf.mxu0  ;;  %v5579_v25 = vpop.f32.mrf.mxu1 }
 0x251   : > { %8299 = vst [vmem:[#allocation37_spill] sm:$0xff] %v7379_v38  ;;  %5427 = vst [vmem:[%s7136_s8 + $0x68] sm:$0xff] %v5133_v49   ;;  %v1707_v10 = vpop.permute.xlu0 %1706  ;;  %v5580_v1 = vadd.f32 %v5579_v25, %v5578_v36 }
 0x252   : > { %v1770_v6 = vmul.f32 %v1707_v10, %v968_v28  ;;  %v7382_v37 = vpop.f32.mrf.mxu0  ;;  %v5581_v11 = vpop.f32.mrf.mxu1 }
 0x253   : > { %8300 = vst [vmem:[#allocation38_spill] sm:$0xff] %v7382_v37  ;;  %1920 = vrot.lane.b32.xlu1 %v7371_v34, %s8259_s1  ;;  %1922 = vrot.lane.b32.xlu0 %v7379_v38, %s8259_s1 }
 0x254   : > { %v7389_v20 = vpop.f32.mrf.mxu0  ;;  %v5582_v18 = vpop.f32.mrf.mxu1  ;;  %v1802_v14 = vadd.f32 %v1770_v6, %v1674_v16  ;;  %v1835_v6 = vmul.f32 %v7123_v27, %v937_v0  ;;  %v938_v27 = vld [vmem:[#allocation8 + $0x10] sm:$0xff] }
 0x255   : > { %8301 = vst [vmem:[#allocation39_spill] sm:$0xff] %v7389_v20  ;;  %v5583_v49 = vadd.f32 %v5582_v18, %v5581_v11  ;;  %v1709_v10 = vpop.permute.xlu1 %1708  ;;  %v1867_v46 = vpop.permute.xlu0 %1866  ;;  %v1834_v11 = vmul.f32 %v7112_v13, %v936_v47  ;;  %v970_v47 = vld [vmem:[#allocation10 + $0x10] sm:$0xff] }
 0x256   : > { %v1771_v63 = vmul.f32 %v1709_v10, %v969_v52  ;;  %v7392_v40 = vpop.f32.mrf.mxu0  ;;  %v5584_v34 = vpop.f32.mrf.mxu1  ;;  %v1930_v25 = vmul.f32 %v1867_v46, %v968_v28  ;;  %v1994_v16 = vmul.f32 0.088388346, %v1802_v14 }
 0x257   : > { %8302 = vst [vmem:[#allocation40_spill] sm:$0xff] %v7392_v40  ;;  %v5138_v60 = vpack.c.bf16 %v5583_v49, %v5580_v1  ;;  %1764 = vrot.lane.b32.xlu1 %v7382_v37, %s8259_s1  ;;  %1766 = vrot.lane.b32.xlu0 %v7392_v40, %s8259_s1 }
 0x258   : > { %v1803_v44 = vadd.f32 %v1771_v63, %v1675_v51  ;;  %v7398_v18 = vpop.f32.mrf.mxu0  ;;  %v5585_v36 = vpop.f32.mrf.mxu1  ;;  %v1962_v46 = vadd.f32 %v1930_v25, %v1834_v11  ;;  %v939_v11 = vld [vmem:[#allocation8 + $0x18] sm:$0xff] }
 0x259   : > { %8303 = vst [vmem:[#allocation41_spill] sm:$0xff] %v7398_v18  ;;  %5428 = vst [vmem:[%s7136_s8 + $0x70] sm:$0xff] %v5138_v60   ;;  %v1869_v12 = vpop.permute.xlu1 %1868  ;;  %v5586_v14 = vadd.f32 %v5585_v36, %v5584_v34  ;;  %v1676_v34 = vmul.f32 %v7125_v19, %v938_v27 }
 0x25a   : > { %v1995_v10 = vmul.f32 0.088388346, %v1803_v44  ;;  %v1931_v1 = vmul.f32 %v1869_v12, %v969_v52  ;;  %v7403_v49 = vpop.f32.mrf.mxu0  ;;  %v5587_v38 = vpop.f32.mrf.mxu1 }
 0x25b   : > { %8304 = vst [vmem:[#allocation42_spill] sm:$0xff] %v7403_v49  ;;  %1924 = vrot.lane.b32.xlu1 %v7389_v20, %s8259_s1  ;;  %1926 = vrot.lane.b32.xlu0 %v7398_v18, %s8259_s1  ;;  %v1871_v28 = vpop.permute.xlu0 %1870  ;;  %v1836_v18 = vmul.f32 %v7133_v55, %v938_v27  ;;  %v973_v55 = vld [vmem:[#allocation10 + $0x28] sm:$0xff] }
 0x25c   : > { %v4908_v63 = vpack.c.bf16 %v1995_v10, %v1994_v16  ;;  %v1963_v13 = vadd.f32 %v1931_v1, %v1835_v6  ;;  %v7409_v60 = vpop.f32.mrf.mxu0  ;;  %v5588_v51 = vpop.f32.mrf.mxu1  ;;  %v1932_v19 = vmul.f32 %v1871_v28, %v970_v47  ;;  %v941_v28 = vld [vmem:[#allocation8 + $0x28] sm:$0xff] }
 0x25d   : > { %8305 = vst [vmem:[#allocation43_spill] sm:$0xff] %v7409_v60  ;;  %v5589_v0 = vadd.f32 %v5588_v51, %v5587_v38  ;;  %v1711_v52 = vpop.permute.xlu1 %1710  ;;  %v971_v38 = vld [vmem:[#allocation10 + $0x18] sm:$0xff] }
 0x25e   : > { %4909 = vst [vmem:[%s7412_s9] sm:$0xff] %v4908_v63   ;;  %v4988_v44 = vpack.c.bf16 %v1963_v13, %v1962_v46  ;;  %v1772_v12 = vmul.f32 %v1711_v52, %v970_v47  ;;  %v7415_v16 = vpop.f32.mrf.mxu1  ;;  %v5606_v25 = vpop.f32.mrf.mxu0  ;;  %v1677_v46 = vmul.f32 %v7141_v4, %v939_v11  ;;  %v972_v52 = vld [vmem:[#allocation10 + $0x20] sm:$0xff]  ;;  %v1837_v4 = vmul.f32 %v7145_v17, %v939_v11 }
 0x25f   : > { %8306 = vst [vmem:[#allocation44_spill] sm:$0xff] %v7415_v16  ;;  %v5143_v6 = vpack.c.bf16 %v5589_v0, %v5586_v14  ;;  %3213 = vrot.lane.b32.xlu0 %v7415_v16, %s8259_s1  ;;  %1768 = vrot.lane.b32.xlu1 %v7403_v49, %s8259_s1  ;;  %v1964_v27 = vadd.f32 %v1932_v19, %v1836_v18  ;;  %v942_v19 = vld [vmem:[#allocation8 + $0x30] sm:$0xff] }
 0x260   : > { %4989 = vst [vmem:[%s7423_s11] sm:$0xff] %v4988_v44   ;;  %v7426_v36 = vpop.f32.mrf.mxu1  ;;  %v5607_v10 = vpop.f32.mrf.mxu0  ;;  %v1804_v13 = vadd.f32 %v1772_v12, %v1676_v34  ;;  %v940_v12 = vld [vmem:[#allocation8 + $0x20] sm:$0xff] }
 0x261   : > { %8307 = vst [vmem:[#allocation45_spill] sm:$0xff] %v7426_v36  ;;  %5429 = vst [vmem:[%s7136_s8 + $0x78] sm:$0xff] %v5143_v6   ;;  %v1713_v1 = vpop.permute.xlu1 %1712  ;;  %v1715_v63 = vpop.permute.xlu0 %1714  ;;  %v5608_v34 = vadd.f32 %v5607_v10, %v5606_v25  ;;  %v1678_v17 = vmul.f32 %v7147_v50, %v940_v12  ;;  %v974_v50 = vld [vmem:[#allocation10 + $0x30] sm:$0xff]  ;;  %v1838_v18 = vmul.f32 %v7157_v9, %v940_v12  ;;  %v975_v9 = vld [vmem:[#allocation10 + $0x38] sm:$0xff] }
 0x262   : > { %v1773_v51 = vmul.f32 %v1713_v1, %v971_v38  ;;  %v7430_v14 = vpop.f32.mrf.mxu1  ;;  %v5609_v0 = vpop.f32.mrf.mxu0  ;;  %v1996_v20 = vmul.f32 0.088388346, %v1804_v13  ;;  %v1679_v13 = vmul.f32 %v7160_v22, %v941_v28 }
 0x263   : > { %3373 = vrot.lane.b32.xlu0 %v7426_v36, %s8259_s1  ;;  %1928 = vrot.lane.b32.xlu1 %v7409_v60, %s8259_s1  ;;  %v1774_v36 = vmul.f32 %v1715_v63, %v972_v52 }
 0x264   : > { %v1805_v44 = vadd.f32 %v1773_v51, %v1677_v46  ;;  %v7436_v16 = vpop.f32.mrf.mxu1  ;;  %v5610_v6 = vpop.f32.mrf.mxu0 }
 0x265   : > { %v5611_v1 = vadd.f32 %v5610_v6, %v5609_v0  ;;  %v1873_v49 = vpop.permute.xlu1 %1872  ;;  %v1875_v40 = vpop.permute.xlu0 %1874  ;;  %v1806_v51 = vadd.f32 %v1774_v36, %v1678_v17  ;;  %v1839_v36 = vmul.f32 %v7166_v61, %v941_v28  ;;  %v1680_v61 = vmul.f32 %v7168_v45, %v942_v19  ;;  %v976_v45 = vld [vmem:[#allocation10 + $0x40] sm:$0xff] }
 0x266   : > { %v1997_v37 = vmul.f32 0.088388346, %v1805_v44  ;;  %v1933_v48 = vmul.f32 %v1873_v49, %v971_v38  ;;  %v7440_v60 = vpop.f32.mrf.mxu1  ;;  %v5612_v47 = vpop.f32.mrf.mxu0 }
 0x267   : > { %v5308_v46 = vpack.c.bf16 %v5611_v1, %v5608_v34  ;;  %3217 = vrot.lane.b32.xlu0 %v7440_v60, %s8259_s1  ;;  %3215 = vrot.lane.b32.xlu1 %v7430_v14, %s8259_s1 }
 0x268   : > { %v4913_v25 = vpack.c.bf16 %v1997_v37, %v1996_v20  ;;  %v1965_v11 = vadd.f32 %v1933_v48, %v1837_v4  ;;  %v7447_v49 = vpop.f32.mrf.mxu1  ;;  %v5613_v38 = vpop.f32.mrf.mxu0  ;;  %v1934_v48 = vmul.f32 %v1875_v40, %v972_v52  ;;  %v943_v52 = vld [vmem:[#allocation8 + $0x38] sm:$0xff] }
 0x269   : > { %5462 = vst [vmem:[%s7136_s8 + $0x80] sm:$0xff] %v5308_v46   ;;  %v1717_v10 = vpop.permute.xlu1 %1716  ;;  %v1719_v63 = vpop.permute.xlu0 %1718  ;;  %v5614_v4 = vadd.f32 %v5613_v38, %v5612_v47 }
 0x26a   : > { %5385 = vst [vmem:[%s7412_s9 + $0x8] sm:$0xff] %v4913_v25   ;;  %v4993_v0 = vpack.c.bf16 %v1965_v11, %v1964_v27  ;;  %v1775_v44 = vmul.f32 %v1717_v10, %v973_v55  ;;  %v7452_v6 = vpop.f32.mrf.mxu1  ;;  %v5615_v34 = vpop.f32.mrf.mxu0  ;;  %v1998_v27 = vmul.f32 0.088388346, %v1806_v51  ;;  %v1776_v11 = vmul.f32 %v1719_v63, %v974_v50 }
 0x26b   : > { %3377 = vrot.lane.b32.xlu0 %v7447_v49, %s8259_s1  ;;  %3375 = vrot.lane.b32.xlu1 %v7436_v16, %s8259_s1  ;;  %v1966_v12 = vadd.f32 %v1934_v48, %v1838_v18 }
 0x26c   : > { %5400 = vst [vmem:[%s7423_s11 + $0x8] sm:$0xff] %v4993_v0   ;;  %v1807_v37 = vadd.f32 %v1775_v44, %v1679_v13  ;;  %v7459_v20 = vpop.f32.mrf.mxu1  ;;  %v5616_v22 = vpop.f32.mrf.mxu0  ;;  %v1681_v44 = vmul.f32 %v7181_v59, %v943_v52 }
 0x26d   : > { %v5617_v1 = vadd.f32 %v5616_v22, %v5615_v34  ;;  %v1877_v46 = vpop.permute.xlu1 %1876  ;;  %v1879_v17 = vpop.permute.xlu0 %1878  ;;  %v1808_v34 = vadd.f32 %v1776_v11, %v1680_v61 }
 0x26e   : > { %v1999_v25 = vmul.f32 0.088388346, %v1807_v37  ;;  %v1935_v10 = vmul.f32 %v1877_v46, %v973_v55  ;;  %v7463_v0 = vpop.f32.mrf.mxu1  ;;  %v5618_v40 = vpop.f32.mrf.mxu0  ;;  %v1936_v48 = vmul.f32 %v1879_v17, %v974_v50  ;;  %v1840_v46 = vmul.f32 %v7178_v3, %v942_v19  ;;  %v945_v17 = vld [vmem:[#allocation8 + $0x48] sm:$0xff] }
 0x26f   : > { %v5313_v13 = vpack.c.bf16 %v5617_v1, %v5614_v4  ;;  %3221 = vrot.lane.b32.xlu0 %v7463_v0, %s8259_s1  ;;  %3219 = vrot.lane.b32.xlu1 %v7452_v6, %s8259_s1  ;;  %v977_v3 = vld [vmem:[#allocation10 + $0x48] sm:$0xff] }
 0x270   : > { %v4918_v47 = vpack.c.bf16 %v1999_v25, %v1998_v27  ;;  %v1967_v28 = vadd.f32 %v1935_v10, %v1839_v36  ;;  %v7470_v55 = vpop.f32.mrf.mxu1  ;;  %v5619_v38 = vpop.f32.mrf.mxu0  ;;  %v1841_v27 = vmul.f32 %v7187_v42, %v943_v52  ;;  %v944_v25 = vld [vmem:[#allocation8 + $0x40] sm:$0xff]  ;;  %v1968_v19 = vadd.f32 %v1936_v48, %v1840_v46 }
 0x271   : > { %5463 = vst [vmem:[%s7136_s8 + $0x88] sm:$0xff] %v5313_v13   ;;  %v1721_v63 = vpop.permute.xlu1 %1720  ;;  %v1723_v51 = vpop.permute.xlu0 %1722  ;;  %v5620_v11 = vadd.f32 %v5619_v38, %v5618_v40  ;;  %v1682_v42 = vmul.f32 %v7189_v56, %v944_v25  ;;  %v978_v56 = vld [vmem:[#allocation10 + $0x50] sm:$0xff] }
 0x272   : > { %5386 = vst [vmem:[%s7412_s9 + $0x10] sm:$0xff] %v4918_v47   ;;  %v4998_v37 = vpack.c.bf16 %v1967_v28, %v1966_v12  ;;  %v1777_v22 = vmul.f32 %v1721_v63, %v975_v9  ;;  %v7475_v4 = vpop.f32.mrf.mxu1  ;;  %v5621_v1 = vpop.f32.mrf.mxu0  ;;  %v2000_v12 = vmul.f32 0.088388346, %v1808_v34  ;;  %v1778_v28 = vmul.f32 %v1723_v51, %v976_v45 }
 0x273   : > { %3381 = vrot.lane.b32.xlu0 %v7470_v55, %s8259_s1  ;;  %3379 = vrot.lane.b32.xlu1 %v7459_v20, %s8259_s1 }
 0x274   : > { %5401 = vst [vmem:[%s7423_s11 + $0x10] sm:$0xff] %v4998_v37   ;;  %v1809_v18 = vadd.f32 %v1777_v22, %v1681_v44  ;;  %v7482_v36 = vpop.f32.mrf.mxu1  ;;  %v5622_v59 = vpop.f32.mrf.mxu0  ;;  %v1683_v22 = vmul.f32 %v7202_v58, %v945_v17 }
 0x275   : > { %v5623_v10 = vadd.f32 %v5622_v59, %v5621_v1  ;;  %v1881_v13 = vpop.permute.xlu1 %1880  ;;  %v1883_v61 = vpop.permute.xlu0 %1882  ;;  %v1810_v1 = vadd.f32 %v1778_v28, %v1682_v42 }
 0x276   : > { %v2001_v47 = vmul.f32 0.088388346, %v1809_v18  ;;  %v1937_v63 = vmul.f32 %v1881_v13, %v975_v9  ;;  %v7486_v37 = vpop.f32.mrf.mxu1  ;;  %v5624_v50 = vpop.f32.mrf.mxu0  ;;  %v1938_v48 = vmul.f32 %v1883_v61, %v976_v45  ;;  %v1842_v13 = vmul.f32 %v7199_v57, %v944_v25  ;;  %v947_v61 = vld [vmem:[#allocation8 + $0x58] sm:$0xff] }
 0x277   : > { %v5318_v44 = vpack.c.bf16 %v5623_v10, %v5620_v11  ;;  %3225 = vrot.lane.b32.xlu0 %v7486_v37, %s8259_s1  ;;  %3223 = vrot.lane.b32.xlu1 %v7475_v4, %s8259_s1  ;;  %v979_v57 = vld [vmem:[#allocation10 + $0x58] sm:$0xff] }
 0x278   : > { %v4923_v40 = vpack.c.bf16 %v2001_v47, %v2000_v12  ;;  %v1969_v52 = vadd.f32 %v1937_v63, %v1841_v27  ;;  %v7493_v9 = vpop.f32.mrf.mxu1  ;;  %v5625_v38 = vpop.f32.mrf.mxu0  ;;  %v1843_v12 = vmul.f32 %v7208_v53, %v945_v17  ;;  %v946_v47 = vld [vmem:[#allocation8 + $0x50] sm:$0xff]  ;;  %v1970_v25 = vadd.f32 %v1938_v48, %v1842_v13 }
 0x279   : > { %5464 = vst [vmem:[%s7136_s8 + $0x90] sm:$0xff] %v5318_v44   ;;  %v1725_v51 = vpop.permute.xlu1 %1724  ;;  %v1727_v34 = vpop.permute.xlu0 %1726  ;;  %v5626_v28 = vadd.f32 %v5625_v38, %v5624_v50  ;;  %v1684_v53 = vmul.f32 %v7210_v2, %v946_v47  ;;  %v980_v2 = vld [vmem:[#allocation10 + $0x60] sm:$0xff] }
 0x27a   : > { %5387 = vst [vmem:[%s7412_s9 + $0x18] sm:$0xff] %v4923_v40   ;;  %v5003_v18 = vpack.c.bf16 %v1969_v52, %v1968_v19  ;;  %v1779_v59 = vmul.f32 %v1725_v51, %v977_v3  ;;  %v7498_v11 = vpop.f32.mrf.mxu1  ;;  %v5627_v10 = vpop.f32.mrf.mxu0  ;;  %v2002_v19 = vmul.f32 0.088388346, %v1810_v1  ;;  %v1780_v52 = vmul.f32 %v1727_v34, %v978_v56 }
 0x27b   : > { %3385 = vrot.lane.b32.xlu0 %v7493_v9, %s8259_s1  ;;  %3383 = vrot.lane.b32.xlu1 %v7482_v36, %s8259_s1 }
 0x27c   : > { %5402 = vst [vmem:[%s7423_s11 + $0x18] sm:$0xff] %v5003_v18   ;;  %v1811_v46 = vadd.f32 %v1779_v59, %v1683_v22  ;;  %v7505_v27 = vpop.f32.mrf.mxu1  ;;  %v5628_v58 = vpop.f32.mrf.mxu0  ;;  %v1685_v59 = vmul.f32 %v7222_v62, %v947_v61 }
 0x27d   : > { %v5629_v63 = vadd.f32 %v5628_v58, %v5627_v10  ;;  %v1885_v44 = vpop.permute.xlu1 %1884  ;;  %v1887_v42 = vpop.permute.xlu0 %1886  ;;  %v1812_v10 = vadd.f32 %v1780_v52, %v1684_v53 }
 0x27e   : > { %v2003_v40 = vmul.f32 0.088388346, %v1811_v46  ;;  %v1939_v51 = vmul.f32 %v1885_v44, %v977_v3  ;;  %v7509_v18 = vpop.f32.mrf.mxu1  ;;  %v5630_v45 = vpop.f32.mrf.mxu0  ;;  %v1940_v48 = vmul.f32 %v1887_v42, %v978_v56  ;;  %v1844_v44 = vmul.f32 %v7219_v26, %v946_v47  ;;  %v949_v42 = vld [vmem:[#allocation8 + $0x68] sm:$0xff] }
 0x27f   : > { %v5323_v22 = vpack.c.bf16 %v5629_v63, %v5626_v28  ;;  %3229 = vrot.lane.b32.xlu0 %v7509_v18, %s8259_s1  ;;  %3227 = vrot.lane.b32.xlu1 %v7498_v11, %s8259_s1  ;;  %v981_v26 = vld [vmem:[#allocation10 + $0x68] sm:$0xff] }
 0x280   : > { %v4928_v50 = vpack.c.bf16 %v2003_v40, %v2002_v19  ;;  %v1971_v17 = vadd.f32 %v1939_v51, %v1843_v12  ;;  %v7516_v3 = vpop.f32.mrf.mxu1  ;;  %v5631_v38 = vpop.f32.mrf.mxu0  ;;  %v1845_v19 = vmul.f32 %v7228_v31, %v947_v61  ;;  %v948_v40 = vld [vmem:[#allocation8 + $0x60] sm:$0xff]  ;;  %v1972_v47 = vadd.f32 %v1940_v48, %v1844_v44 }
 0x281   : > { %5465 = vst [vmem:[%s7136_s8 + $0x98] sm:$0xff] %v5323_v22   ;;  %v1729_v34 = vpop.permute.xlu1 %1728  ;;  %v1731_v1 = vpop.permute.xlu0 %1730  ;;  %v5632_v52 = vadd.f32 %v5631_v38, %v5630_v45  ;;  %v1686_v31 = vmul.f32 %v7230_v39, %v948_v40  ;;  %v982_v39 = vld [vmem:[#allocation10 + $0x70] sm:$0xff] }
 0x282   : > { %5388 = vst [vmem:[%s7412_s9 + $0x20] sm:$0xff] %v4928_v50   ;;  %v5008_v46 = vpack.c.bf16 %v1971_v17, %v1970_v25  ;;  %v1781_v58 = vmul.f32 %v1729_v34, %v979_v57  ;;  %v7521_v28 = vpop.f32.mrf.mxu1  ;;  %v5633_v63 = vpop.f32.mrf.mxu0  ;;  %v2004_v25 = vmul.f32 0.088388346, %v1812_v10  ;;  %v1782_v17 = vmul.f32 %v1731_v1, %v980_v2 }
 0x283   : > { %3389 = vrot.lane.b32.xlu0 %v7516_v3, %s8259_s1  ;;  %3387 = vrot.lane.b32.xlu1 %v7505_v27, %s8259_s1 }
 0x284   : > { %5403 = vst [vmem:[%s7423_s11 + $0x20] sm:$0xff] %v5008_v46   ;;  %v1813_v13 = vadd.f32 %v1781_v58, %v1685_v59  ;;  %v7528_v12 = vpop.f32.mrf.mxu1  ;;  %v5634_v62 = vpop.f32.mrf.mxu0  ;;  %v1687_v58 = vmul.f32 %v7241_v33, %v949_v42 }
 0x285   : > { %v5635_v51 = vadd.f32 %v5634_v62, %v5633_v63  ;;  %v1889_v22 = vpop.permute.xlu1 %1888  ;;  %v1891_v53 = vpop.permute.xlu0 %1890  ;;  %v1814_v63 = vadd.f32 %v1782_v17, %v1686_v31 }
 0x286   : > { %v2005_v50 = vmul.f32 0.088388346, %v1813_v13  ;;  %v1941_v34 = vmul.f32 %v1889_v22, %v979_v57  ;;  %v7532_v46 = vpop.f32.mrf.mxu1  ;;  %v5636_v56 = vpop.f32.mrf.mxu0  ;;  %v1942_v48 = vmul.f32 %v1891_v53, %v980_v2  ;;  %v1846_v22 = vmul.f32 %v7238_v5, %v948_v40  ;;  %v951_v53 = vld [vmem:[#allocation8 + $0x78] sm:$0xff] }
 0x287   : > { %v5328_v59 = vpack.c.bf16 %v5635_v51, %v5632_v52  ;;  %3233 = vrot.lane.b32.xlu0 %v7532_v46, %s8259_s1  ;;  %3231 = vrot.lane.b32.xlu1 %v7521_v28, %s8259_s1  ;;  %v983_v5 = vld [vmem:[#allocation10 + $0x78] sm:$0xff] }
 0x288   : > { %v4933_v45 = vpack.c.bf16 %v2005_v50, %v2004_v25  ;;  %v1973_v61 = vadd.f32 %v1941_v34, %v1845_v19  ;;  %v7539_v57 = vpop.f32.mrf.mxu1  ;;  %v5637_v38 = vpop.f32.mrf.mxu0  ;;  %v1847_v25 = vmul.f32 %v7247_v43, %v949_v42  ;;  %v950_v50 = vld [vmem:[#allocation8 + $0x70] sm:$0xff]  ;;  %v1974_v40 = vadd.f32 %v1942_v48, %v1846_v22 }
 0x289   : > { %5466 = vst [vmem:[%s7136_s8 + $0xa0] sm:$0xff] %v5328_v59   ;;  %v1733_v1 = vpop.permute.xlu1 %1732  ;;  %v1735_v10 = vpop.permute.xlu0 %1734  ;;  %v5638_v17 = vadd.f32 %v5637_v38, %v5636_v56  ;;  %v1688_v43 = vmul.f32 %v7249_v54, %v950_v50  ;;  %v984_v54 = vld [vmem:[#allocation10 + $0x80] sm:$0xff] }
 0x28a   : > { %5389 = vst [vmem:[%s7412_s9 + $0x28] sm:$0xff] %v4933_v45   ;;  %v5013_v13 = vpack.c.bf16 %v1973_v61, %v1972_v47  ;;  %v1783_v62 = vmul.f32 %v1733_v1, %v981_v26  ;;  %v7544_v52 = vpop.f32.mrf.mxu1  ;;  %v5639_v51 = vpop.f32.mrf.mxu0  ;;  %v2006_v47 = vmul.f32 0.088388346, %v1814_v63  ;;  %v1784_v61 = vmul.f32 %v1735_v10, %v982_v39 }
 0x28b   : > { %3393 = vrot.lane.b32.xlu0 %v7539_v57, %s8259_s1  ;;  %3391 = vrot.lane.b32.xlu1 %v7528_v12, %s8259_s1 }
 0x28c   : > { %5404 = vst [vmem:[%s7423_s11 + $0x28] sm:$0xff] %v5013_v13   ;;  %v1815_v44 = vadd.f32 %v1783_v62, %v1687_v58  ;;  %v7551_v19 = vpop.f32.mrf.mxu1  ;;  %v5640_v33 = vpop.f32.mrf.mxu0  ;;  %v1689_v62 = vmul.f32 %v7260_v24, %v951_v53 }
 0x28d   : > { %v5641_v34 = vadd.f32 %v5640_v33, %v5639_v51  ;;  %v1893_v59 = vpop.permute.xlu1 %1892  ;;  %v1895_v31 = vpop.permute.xlu0 %1894  ;;  %v1816_v51 = vadd.f32 %v1784_v61, %v1688_v43 }
 0x28e   : > { %v2007_v45 = vmul.f32 0.088388346, %v1815_v44  ;;  %v1943_v1 = vmul.f32 %v1893_v59, %v981_v26  ;;  %v7555_v13 = vpop.f32.mrf.mxu1  ;;  %v5642_v2 = vpop.f32.mrf.mxu0  ;;  %v1944_v48 = vmul.f32 %v1895_v31, %v982_v39  ;;  %v1848_v59 = vmul.f32 %v7257_v32, %v950_v50  ;;  %v953_v31 = vld [vmem:[#allocation8 + $0x88] sm:$0xff] }
 0x28f   : > { %v5333_v58 = vpack.c.bf16 %v5641_v34, %v5638_v17  ;;  %3237 = vrot.lane.b32.xlu0 %v7555_v13, %s8259_s1  ;;  %3235 = vrot.lane.b32.xlu1 %v7544_v52, %s8259_s1  ;;  %v985_v32 = vld [vmem:[#allocation10 + $0x88] sm:$0xff] }
 0x290   : > { %v4938_v56 = vpack.c.bf16 %v2007_v45, %v2006_v47  ;;  %v1975_v42 = vadd.f32 %v1943_v1, %v1847_v25  ;;  %v7562_v26 = vpop.f32.mrf.mxu1  ;;  %v5643_v38 = vpop.f32.mrf.mxu0  ;;  %v1849_v47 = vmul.f32 %v7266_v29, %v951_v53  ;;  %v952_v45 = vld [vmem:[#allocation8 + $0x80] sm:$0xff]  ;;  %v1976_v50 = vadd.f32 %v1944_v48, %v1848_v59 }
 0x291   : > { %5467 = vst [vmem:[%s7136_s8 + $0xa8] sm:$0xff] %v5333_v58   ;;  %v1737_v10 = vpop.permute.xlu1 %1736  ;;  %v1739_v63 = vpop.permute.xlu0 %1738  ;;  %v5644_v61 = vadd.f32 %v5643_v38, %v5642_v2  ;;  %v1690_v29 = vmul.f32 %v7268_v7, %v952_v45  ;;  %v986_v7 = vld [vmem:[#allocation10 + $0x90] sm:$0xff] }
 0x292   : > { %5390 = vst [vmem:[%s7412_s9 + $0x30] sm:$0xff] %v4938_v56   ;;  %v5018_v44 = vpack.c.bf16 %v1975_v42, %v1974_v40  ;;  %v1785_v33 = vmul.f32 %v1737_v10, %v983_v5  ;;  %v7567_v17 = vpop.f32.mrf.mxu1  ;;  %v5645_v34 = vpop.f32.mrf.mxu0  ;;  %v2008_v40 = vmul.f32 0.088388346, %v1816_v51  ;;  %v1786_v42 = vmul.f32 %v1739_v63, %v984_v54 }
 0x293   : > { %3397 = vrot.lane.b32.xlu0 %v7562_v26, %s8259_s1  ;;  %3395 = vrot.lane.b32.xlu1 %v7551_v19, %s8259_s1 }
 0x294   : > { %5405 = vst [vmem:[%s7423_s11 + $0x30] sm:$0xff] %v5018_v44   ;;  %v1817_v22 = vadd.f32 %v1785_v33, %v1689_v62  ;;  %v7574_v25 = vpop.f32.mrf.mxu1  ;;  %v5646_v24 = vpop.f32.mrf.mxu0  ;;  %v1691_v33 = vmul.f32 %v7279_v21, %v953_v31 }
 0x295   : > { %v5647_v1 = vadd.f32 %v5646_v24, %v5645_v34  ;;  %v1897_v58 = vpop.permute.xlu1 %1896  ;;  %v1899_v43 = vpop.permute.xlu0 %1898  ;;  %v1818_v34 = vadd.f32 %v1786_v42, %v1690_v29 }
 0x296   : > { %v2009_v56 = vmul.f32 0.088388346, %v1817_v22  ;;  %v1945_v10 = vmul.f32 %v1897_v58, %v983_v5  ;;  %v7578_v44 = vpop.f32.mrf.mxu1  ;;  %v5648_v39 = vpop.f32.mrf.mxu0  ;;  %v1946_v48 = vmul.f32 %v1899_v43, %v984_v54  ;;  %v1850_v58 = vmul.f32 %v7276_v8, %v952_v45  ;;  %v955_v43 = vld [vmem:[#allocation8 + $0x98] sm:$0xff] }
 0x297   : > { %v5338_v62 = vpack.c.bf16 %v5647_v1, %v5644_v61  ;;  %3241 = vrot.lane.b32.xlu0 %v7578_v44, %s8259_s1  ;;  %3239 = vrot.lane.b32.xlu1 %v7567_v17, %s8259_s1  ;;  %v987_v8 = vld [vmem:[#allocation10 + $0x98] sm:$0xff] }
 0x298   : > { %v4943_v2 = vpack.c.bf16 %v2009_v56, %v2008_v40  ;;  %v1977_v53 = vadd.f32 %v1945_v10, %v1849_v47  ;;  %v7585_v5 = vpop.f32.mrf.mxu1  ;;  %v5649_v38 = vpop.f32.mrf.mxu0  ;;  %v1851_v40 = vmul.f32 %v7285_v23, %v953_v31  ;;  %v954_v56 = vld [vmem:[#allocation8 + $0x90] sm:$0xff]  ;;  %v1978_v45 = vadd.f32 %v1946_v48, %v1850_v58 }
 0x299   : > { %5468 = vst [vmem:[%s7136_s8 + $0xb0] sm:$0xff] %v5338_v62   ;;  %v1741_v63 = vpop.permute.xlu1 %1740  ;;  %v1743_v51 = vpop.permute.xlu0 %1742  ;;  %v5650_v42 = vadd.f32 %v5649_v38, %v5648_v39  ;;  %v1692_v23 = vmul.f32 %v7287_v30, %v954_v56  ;;  %v7615_v30 = vld [vmem:[#allocation10 + $0xa0] sm:$0xff] }
 0x29a   : > { %5391 = vst [vmem:[%s7412_s9 + $0x38] sm:$0xff] %v4943_v2   ;;  %v5023_v22 = vpack.c.bf16 %v1977_v53, %v1976_v50  ;;  %v1787_v24 = vmul.f32 %v1741_v63, %v985_v32  ;;  %v7590_v61 = vpop.f32.mrf.mxu1  ;;  %v5651_v1 = vpop.f32.mrf.mxu0  ;;  %v2010_v50 = vmul.f32 0.088388346, %v1818_v34  ;;  %v1788_v53 = vmul.f32 %v1743_v51, %v986_v7  ;;  %8308 = vst [vmem:[#allocation46_spill] sm:$0xff] %v7615_v30 }
 0x29b   : > { %3401 = vrot.lane.b32.xlu0 %v7585_v5, %s8259_s1  ;;  %3399 = vrot.lane.b32.xlu1 %v7574_v25, %s8259_s1 }
 0x29c   : > { %5406 = vst [vmem:[%s7423_s11 + $0x38] sm:$0xff] %v5023_v22   ;;  %v1819_v59 = vadd.f32 %v1787_v24, %v1691_v33  ;;  %v7597_v47 = vpop.f32.mrf.mxu1  ;;  %v5652_v21 = vpop.f32.mrf.mxu0  ;;  %v1693_v24 = vmul.f32 %v7297_v35, %v955_v43 }
 0x29d   : > { %v5653_v10 = vadd.f32 %v5652_v21, %v5651_v1  ;;  %v1901_v62 = vpop.permute.xlu1 %1900  ;;  %v1903_v29 = vpop.permute.xlu0 %1902  ;;  %v1820_v1 = vadd.f32 %v1788_v53, %v1692_v23 }
 0x29e   : > { %v2011_v2 = vmul.f32 0.088388346, %v1819_v59  ;;  %v1947_v63 = vmul.f32 %v1901_v62, %v985_v32  ;;  %v7601_v22 = vpop.f32.mrf.mxu1  ;;  %v5654_v54 = vpop.f32.mrf.mxu0  ;;  %v1948_v48 = vmul.f32 %v1903_v29, %v986_v7  ;;  %v1852_v62 = vmul.f32 %v7294_v15, %v954_v56  ;;  %v8313_v56 = vld [vmem:[#allocation20_spill] sm:$0xff] }
 0x29f   : > { %v5343_v33 = vpack.c.bf16 %v5653_v10, %v5650_v42  ;;  %3245 = vrot.lane.b32.xlu0 %v7601_v22, %s8259_s1  ;;  %3243 = vrot.lane.b32.xlu1 %v7590_v61, %s8259_s1 }
 0x2a0   : > { %v4948_v39 = vpack.c.bf16 %v2011_v2, %v2010_v50  ;;  %v1979_v31 = vadd.f32 %v1947_v63, %v1851_v40  ;;  %v7608_v32 = vpop.f32.mrf.mxu1  ;;  %v5655_v38 = vpop.f32.mrf.mxu0  ;;  %v1853_v50 = vmul.f32 %v7303_v41, %v955_v43  ;;  %v7626_v2 = vld [vmem:[#allocation8 + $0xa0] sm:$0xff]  ;;  %v7637_v41 = vld [vmem:[#allocation10 + $0xa8] sm:$0xff]  ;;  %v1980_v43 = vadd.f32 %v1948_v48, %v1852_v62  ;;  %v7650_v62 = vld [vmem:[#allocation10 + $0xb0] sm:$0xff] }
 0x2a1   : > { %5469 = vst [vmem:[%s7136_s8 + $0xb8] sm:$0xff] %v5343_v33   ;;  %v1745_v51 = vpop.permute.xlu1 %1744  ;;  %v1747_v34 = vpop.permute.xlu0 %1746  ;;  %8309 = vst [vmem:[#allocation47_spill] sm:$0xff] %v7626_v2  ;;  %v5656_v53 = vadd.f32 %v5655_v38, %v5654_v54  ;;  %v1694_v54 = vmul.f32 %v8313_v56, %v7626_v2  ;;  %v8320_v56 = vld [vmem:[#allocation23_spill] sm:$0xff] }
 0x2a2   : > { %5392 = vst [vmem:[%s7412_s9 + $0x40] sm:$0xff] %v4948_v39   ;;  %v5028_v59 = vpack.c.bf16 %v1979_v31, %v1978_v45  ;;  %v1789_v21 = vmul.f32 %v1745_v51, %v987_v8  ;;  %v7613_v42 = vpop.f32.mrf.mxu1  ;;  %v5657_v10 = vpop.f32.mrf.mxu0  ;;  %v2012_v45 = vmul.f32 0.088388346, %v1820_v1  ;;  %v1790_v31 = vmul.f32 %v1747_v34, %v7615_v30  ;;  %8312 = vst [vmem:[#allocation50_spill] sm:$0xff] %v7637_v41 }
 0x2a3   : > { %3405 = vrot.lane.b32.xlu0 %v7608_v32, %s8259_s1  ;;  %3403 = vrot.lane.b32.xlu1 %v7597_v47, %s8259_s1  ;;  %8317 = vst [vmem:[#allocation51_spill] sm:$0xff] %v7650_v62 }
 0x2a4   : > { %5407 = vst [vmem:[%s7423_s11 + $0x40] sm:$0xff] %v5028_v59   ;;  %v1821_v58 = vadd.f32 %v1789_v21, %v1693_v24  ;;  %v7622_v40 = vpop.f32.mrf.mxu1  ;;  %v5658_v35 = vpop.f32.mrf.mxu0  ;;  %v7631_v24 = vld [vmem:[#allocation8 + $0xa8] sm:$0xff] }
 0x2a5   : > { %v5659_v63 = vadd.f32 %v5658_v35, %v5657_v10  ;;  %v1905_v33 = vpop.permute.xlu1 %1904  ;;  %v1907_v23 = vpop.permute.xlu0 %1906  ;;  %8311 = vst [vmem:[#allocation49_spill] sm:$0xff] %v7631_v24  ;;  %v8315_v10 = vld [vmem:[#allocation22_spill] sm:$0xff]  ;;  %v1822_v35 = vadd.f32 %v1790_v31, %v1694_v54  ;;  %v1855_v54 = vmul.f32 %v8320_v56, %v7631_v24 }
 0x2a6   : > { %v2013_v39 = vmul.f32 0.088388346, %v1821_v58  ;;  %v1949_v7 = vmul.f32 %v1905_v33, %v987_v8  ;;  %v7629_v29 = vpop.f32.mrf.mxu1  ;;  %v5660_v51 = vpop.f32.mrf.mxu0  ;;  %v1695_v58 = vmul.f32 %v8315_v10, %v7631_v24 }
 0x2a7   : > { %8310 = vst [vmem:[#allocation48_spill] sm:$0xff] %v7629_v29  ;;  %v5348_v15 = vpack.c.bf16 %v5659_v63, %v5656_v53  ;;  %3247 = vrot.lane.b32.xlu1 %v7613_v42, %s8259_s1  ;;  %3249 = vrot.lane.b32.xlu0 %v7629_v29, %s8259_s1 }
 0x2a8   : > { %v4953_v8 = vpack.c.bf16 %v2013_v39, %v2012_v45  ;;  %v1981_v38 = vadd.f32 %v1949_v7, %v1853_v50  ;;  %v7641_v34 = vpop.f32.mrf.mxu1  ;;  %v5661_v1 = vpop.f32.mrf.mxu0  ;;  %v1950_v50 = vmul.f32 %v1907_v23, %v7615_v30  ;;  %v8319_v7 = vld [vmem:[#allocation21_spill] sm:$0xff] }
 0x2a9   : > { %8314 = vst [vmem:[#allocation20_spill] sm:$0xff] %v7641_v34  ;;  %5470 = vst [vmem:[%s7136_s8 + $0xc0] sm:$0xff] %v5348_v15   ;;  %v1749_v59 = vpop.permute.xlu1 %1748  ;;  %v1751_v21 = vpop.permute.xlu0 %1750  ;;  %v1854_v15 = vmul.f32 %v8319_v7, %v7626_v2  ;;  %v7670_v7 = vld [vmem:[#allocation8 + $0xb8] sm:$0xff] }
 0x2aa   : > { %5393 = vst [vmem:[%s7412_s9 + $0x48] sm:$0xff] %v4953_v8   ;;  %v5033_v53 = vpack.c.bf16 %v1981_v38, %v1980_v43  ;;  %v1791_v63 = vmul.f32 %v1749_v59, %v7637_v41  ;;  %v7648_v33 = vpop.f32.mrf.mxu1  ;;  %v5663_v48 = vpop.f32.mrf.mxu0  ;;  %v7664_v43 = vld [vmem:[#allocation8 + $0xb0] sm:$0xff]  ;;  %v5662_v8 = vadd.f32 %v5661_v1, %v5660_v51  ;;  %v1792_v23 = vmul.f32 %v1751_v21, %v7650_v62  ;;  %v7676_v51 = vld [vmem:[#allocation10 + $0xb8] sm:$0xff]  ;;  %v8325_v1 = vld [vmem:[#allocation24_spill] sm:$0xff] }
 0x2ab   : > { %8316 = vst [vmem:[#allocation22_spill] sm:$0xff] %v7648_v33  ;;  %3407 = vrot.lane.b32.xlu1 %v7622_v40, %s8259_s1  ;;  %3409 = vrot.lane.b32.xlu0 %v7641_v34, %s8259_s1  ;;  %8321 = vst [vmem:[#allocation21_spill] sm:$0xff] %v7664_v43  ;;  %v2014_v34 = vmul.f32 0.088388346, %v1822_v35  ;;  %v1696_v21 = vmul.f32 %v8325_v1, %v7664_v43  ;;  %v1982_v35 = vadd.f32 %v1950_v50, %v1854_v15 }
 0x2ac   : > { %5408 = vst [vmem:[%s7423_s11 + $0x48] sm:$0xff] %v5033_v53   ;;  %v1823_v45 = vadd.f32 %v1791_v63, %v1695_v58  ;;  %v7658_v39 = vpop.f32.mrf.mxu1  ;;  %v5664_v31 = vpop.f32.mrf.mxu0  ;;  %8323 = vst [vmem:[#allocation53_spill] sm:$0xff] %v7670_v7 }
 0x2ad   : > { %8318 = vst [vmem:[#allocation52_spill] sm:$0xff] %v7658_v39  ;;  %v5665_v38 = vadd.f32 %v5664_v31, %v5663_v48  ;;  %v1909_v59 = vpop.permute.xlu1 %1908  ;;  %v1911_v10 = vpop.permute.xlu0 %1910  ;;  %8324 = vst [vmem:[#allocation54_spill] sm:$0xff] %v7676_v51 }
 0x2ae   : > { %v2015_v53 = vmul.f32 0.088388346, %v1823_v45  ;;  %v1951_v58 = vmul.f32 %v1909_v59, %v7637_v41  ;;  %v7668_v63 = vpop.f32.mrf.mxu1  ;;  %v5666_v30 = vpop.f32.mrf.mxu0  ;;  %v8327_v41 = vld [vmem:[#allocation26_spill] sm:$0xff]  ;;  %v1952_v15 = vmul.f32 %v1911_v10, %v7650_v62 }
 0x2af   : > { %8322 = vst [vmem:[#allocation23_spill] sm:$0xff] %v7668_v63  ;;  %v5353_v56 = vpack.c.bf16 %v5665_v38, %v5662_v8  ;;  %3251 = vrot.lane.b32.xlu1 %v7648_v33, %s8259_s1  ;;  %3253 = vrot.lane.b32.xlu0 %v7668_v63, %s8259_s1  ;;  %v1697_v24 = vmul.f32 %v8327_v41, %v7670_v7 }
 0x2b0   : > { %v4958_v48 = vpack.c.bf16 %v2015_v53, %v2014_v34  ;;  %v1983_v45 = vadd.f32 %v1951_v58, %v1855_v54  ;;  %v7680_v31 = vpop.f32.mrf.mxu1  ;;  %v5667_v59 = vpop.f32.mrf.mxu0  ;;  %v1824_v63 = vadd.f32 %v1792_v23, %v1696_v21  ;;  %v7689_v34 = vld [vmem:[#allocation10 + $0xc0] sm:$0xff]  ;;  %v8331_v23 = vld [vmem:[#allocation25_spill] sm:$0xff] }
 0x2b1   : > { %8326 = vst [vmem:[#allocation24_spill] sm:$0xff] %v7680_v31  ;;  %5471 = vst [vmem:[%s7136_s8 + $0xc8] sm:$0xff] %v5353_v56   ;;  %v1753_v8 = vpop.permute.xlu1 %1752  ;;  %v1755_v38 = vpop.permute.xlu0 %1754  ;;  %v1856_v58 = vmul.f32 %v8331_v23, %v7664_v43  ;;  %v8332_v56 = vld [vmem:[#allocation27_spill] sm:$0xff]  ;;  %v7703_v21 = vld [vmem:[#allocation8 + $0xc0] sm:$0xff] }
 0x2b2   : > { %5394 = vst [vmem:[%s7412_s9 + $0x50] sm:$0xff] %v4958_v48   ;;  %v5038_v2 = vpack.c.bf16 %v1983_v45, %v1982_v35  ;;  %v1793_v33 = vmul.f32 %v1753_v8, %v7676_v51  ;;  %v7687_v29 = vpop.f32.mrf.mxu1  ;;  %v5669_v50 = vpop.f32.mrf.mxu0  ;;  %8329 = vst [vmem:[#allocation55_spill] sm:$0xff] %v7689_v34  ;;  %v1857_v1 = vmul.f32 %v8332_v56, %v7670_v7  ;;  %v7709_v23 = vld [vmem:[#allocation8 + $0xc8] sm:$0xff] }
 0x2b3   : > { %8328 = vst [vmem:[#allocation26_spill] sm:$0xff] %v7687_v29  ;;  %3411 = vrot.lane.b32.xlu1 %v7658_v39, %s8259_s1  ;;  %3413 = vrot.lane.b32.xlu0 %v7680_v31, %s8259_s1  ;;  %8333 = vst [vmem:[#allocation25_spill] sm:$0xff] %v7703_v21  ;;  %v5668_v35 = vadd.f32 %v5667_v59, %v5666_v30  ;;  %v2016_v31 = vmul.f32 0.088388346, %v1824_v63  ;;  %v7715_v30 = vld [vmem:[#allocation10 + $0xc8] sm:$0xff]  ;;  %v8337_v63 = vld [vmem:[#allocation28_spill] sm:$0xff] }
 0x2b4   : > { %5409 = vst [vmem:[%s7423_s11 + $0x50] sm:$0xff] %v5038_v2   ;;  %v1825_v41 = vadd.f32 %v1793_v33, %v1697_v24  ;;  %v7697_v54 = vpop.f32.mrf.mxu1  ;;  %v5670_v53 = vpop.f32.mrf.mxu0  ;;  %v1794_v24 = vmul.f32 %v1755_v38, %v7689_v34  ;;  %8335 = vst [vmem:[#allocation57_spill] sm:$0xff] %v7709_v23  ;;  %v1698_v59 = vmul.f32 %v8337_v63, %v7703_v21 }
 0x2b5   : > { %8330 = vst [vmem:[#allocation56_spill] sm:$0xff] %v7697_v54  ;;  %v5671_v48 = vadd.f32 %v5670_v53, %v5669_v50  ;;  %v1913_v45 = vpop.permute.xlu1 %1912  ;;  %v1915_v8 = vpop.permute.xlu0 %1914  ;;  %8336 = vst [vmem:[#allocation58_spill] sm:$0xff] %v7715_v30  ;;  %v1984_v38 = vadd.f32 %v1952_v15, %v1856_v58 }
 0x2b6   : > { %v2017_v2 = vmul.f32 0.088388346, %v1825_v41  ;;  %v1953_v33 = vmul.f32 %v1913_v45, %v7676_v51  ;;  %v7707_v10 = vpop.f32.mrf.mxu1  ;;  %v5672_v62 = vpop.f32.mrf.mxu0  ;;  %v8339_v51 = vld [vmem:[#allocation30_spill] sm:$0xff]  ;;  %v1954_v58 = vmul.f32 %v1915_v8, %v7689_v34 }
 0x2b7   : > { %8334 = vst [vmem:[#allocation27_spill] sm:$0xff] %v7707_v10  ;;  %v5358_v56 = vpack.c.bf16 %v5671_v48, %v5668_v35  ;;  %3255 = vrot.lane.b32.xlu1 %v7687_v29, %s8259_s1  ;;  %3257 = vrot.lane.b32.xlu0 %v7707_v10, %s8259_s1  ;;  %v1699_v7 = vmul.f32 %v8339_v51, %v7709_v23 }
 0x2b8   : > { %v4963_v50 = vpack.c.bf16 %v2017_v2, %v2016_v31  ;;  %v1985_v41 = vadd.f32 %v1953_v33, %v1857_v1  ;;  %v7719_v53 = vpop.f32.mrf.mxu1  ;;  %v5673_v45 = vpop.f32.mrf.mxu0  ;;  %v1826_v10 = vadd.f32 %v1794_v24, %v1698_v59  ;;  %v7728_v31 = vld [vmem:[#allocation10 + $0xd0] sm:$0xff]  ;;  %v8343_v24 = vld [vmem:[#allocation29_spill] sm:$0xff] }
 0x2b9   : > { %8338 = vst [vmem:[#allocation28_spill] sm:$0xff] %v7719_v53  ;;  %5472 = vst [vmem:[%s7136_s8 + $0xd0] sm:$0xff] %v5358_v56   ;;  %v1757_v35 = vpop.permute.xlu1 %1756  ;;  %v1759_v48 = vpop.permute.xlu0 %1758  ;;  %v1858_v33 = vmul.f32 %v8343_v24, %v7703_v21  ;;  %v8344_v56 = vld [vmem:[#allocation31_spill] sm:$0xff]  ;;  %v7742_v59 = vld [vmem:[#allocation8 + $0xd0] sm:$0xff] }
 0x2ba   : > { %5395 = vst [vmem:[%s7412_s9 + $0x58] sm:$0xff] %v4963_v50   ;;  %v5043_v43 = vpack.c.bf16 %v1985_v41, %v1984_v38  ;;  %v1795_v29 = vmul.f32 %v1757_v35, %v7715_v30  ;;  %v7726_v39 = vpop.f32.mrf.mxu1  ;;  %v5675_v15 = vpop.f32.mrf.mxu0  ;;  %8341 = vst [vmem:[#allocation59_spill] sm:$0xff] %v7728_v31  ;;  %v1859_v63 = vmul.f32 %v8344_v56, %v7709_v23  ;;  %v7748_v24 = vld [vmem:[#allocation8 + $0xd8] sm:$0xff] }
 0x2bb   : > { %8340 = vst [vmem:[#allocation30_spill] sm:$0xff] %v7726_v39  ;;  %3415 = vrot.lane.b32.xlu1 %v7697_v54, %s8259_s1  ;;  %3417 = vrot.lane.b32.xlu0 %v7719_v53, %s8259_s1  ;;  %8345 = vst [vmem:[#allocation29_spill] sm:$0xff] %v7742_v59  ;;  %v5674_v38 = vadd.f32 %v5673_v45, %v5672_v62  ;;  %v2018_v53 = vmul.f32 0.088388346, %v1826_v10  ;;  %v7754_v62 = vld [vmem:[#allocation10 + $0xd8] sm:$0xff]  ;;  %v8349_v10 = vld [vmem:[#allocation32_spill] sm:$0xff] }
 0x2bc   : > { %5410 = vst [vmem:[%s7423_s11 + $0x58] sm:$0xff] %v5043_v43   ;;  %v1827_v51 = vadd.f32 %v1795_v29, %v1699_v7  ;;  %v7736_v1 = vpop.f32.mrf.mxu1  ;;  %v5676_v2 = vpop.f32.mrf.mxu0  ;;  %v1796_v29 = vmul.f32 %v1759_v48, %v7728_v31  ;;  %8347 = vst [vmem:[#allocation61_spill] sm:$0xff] %v7748_v24  ;;  %v1700_v45 = vmul.f32 %v8349_v10, %v7742_v59 }
 0x2bd   : > { %8342 = vst [vmem:[#allocation60_spill] sm:$0xff] %v7736_v1  ;;  %v5677_v50 = vadd.f32 %v5676_v2, %v5675_v15  ;;  %v1917_v41 = vpop.permute.xlu1 %1916  ;;  %v1919_v35 = vpop.permute.xlu0 %1918  ;;  %8348 = vst [vmem:[#allocation62_spill] sm:$0xff] %v7754_v62  ;;  %v1986_v48 = vadd.f32 %v1954_v58, %v1858_v33 }
 0x2be   : > { %v2019_v43 = vmul.f32 0.088388346, %v1827_v51  ;;  %v1955_v7 = vmul.f32 %v1917_v41, %v7715_v30  ;;  %v7746_v8 = vpop.f32.mrf.mxu1  ;;  %v5678_v34 = vpop.f32.mrf.mxu0  ;;  %v8351_v30 = vld [vmem:[#allocation34_spill] sm:$0xff]  ;;  %v1956_v33 = vmul.f32 %v1919_v35, %v7728_v31 }
 0x2bf   : > { %8346 = vst [vmem:[#allocation31_spill] sm:$0xff] %v7746_v8  ;;  %v5363_v56 = vpack.c.bf16 %v5677_v50, %v5674_v38  ;;  %3259 = vrot.lane.b32.xlu1 %v7726_v39, %s8259_s1  ;;  %3261 = vrot.lane.b32.xlu0 %v7746_v8, %s8259_s1  ;;  %v1701_v23 = vmul.f32 %v8351_v30, %v7748_v24 }
 0x2c0   : > { %v4968_v15 = vpack.c.bf16 %v2019_v43, %v2018_v53  ;;  %v1987_v51 = vadd.f32 %v1955_v7, %v1859_v63  ;;  %v7758_v2 = vpop.f32.mrf.mxu1  ;;  %v5679_v41 = vpop.f32.mrf.mxu0  ;;  %v1828_v8 = vadd.f32 %v1796_v29, %v1700_v45  ;;  %v7767_v53 = vld [vmem:[#allocation10 + $0xe0] sm:$0xff]  ;;  %v8354_v29 = vld [vmem:[#allocation33_spill] sm:$0xff] }
 0x2c1   : > { %8350 = vst [vmem:[#allocation32_spill] sm:$0xff] %v7758_v2  ;;  %5473 = vst [vmem:[%s7136_s8 + $0xd8] sm:$0xff] %v5363_v56   ;;  %v1761_v38 = vpop.permute.xlu1 %1760  ;;  %v1763_v50 = vpop.permute.xlu0 %1762  ;;  %v1860_v7 = vmul.f32 %v8354_v29, %v7742_v59  ;;  %v8355_v56 = vld [vmem:[#allocation35_spill] sm:$0xff]  ;;  %v7781_v45 = vld [vmem:[#allocation8 + $0xe0] sm:$0xff] }
 0x2c2   : > { %5396 = vst [vmem:[%s7412_s9 + $0x60] sm:$0xff] %v4968_v15   ;;  %v5048_v21 = vpack.c.bf16 %v1987_v51, %v1986_v48  ;;  %v1797_v39 = vmul.f32 %v1761_v38, %v7754_v62  ;;  %v7765_v54 = vpop.f32.mrf.mxu1  ;;  %v5681_v58 = vpop.f32.mrf.mxu0  ;;  %8353 = vst [vmem:[#allocation63_spill] sm:$0xff] %v7767_v53  ;;  %v1861_v10 = vmul.f32 %v8355_v56, %v7748_v24  ;;  %v7787_v29 = vld [vmem:[#allocation8 + $0xe8] sm:$0xff] }
 0x2c3   : > { %8352 = vst [vmem:[#allocation34_spill] sm:$0xff] %v7765_v54  ;;  %3419 = vrot.lane.b32.xlu1 %v7736_v1, %s8259_s1  ;;  %3421 = vrot.lane.b32.xlu0 %v7758_v2, %s8259_s1  ;;  %8356 = vst [vmem:[#allocation33_spill] sm:$0xff] %v7781_v45  ;;  %v5680_v48 = vadd.f32 %v5679_v41, %v5678_v34  ;;  %v2020_v2 = vmul.f32 0.088388346, %v1828_v8  ;;  %v7793_v34 = vld [vmem:[#allocation10 + $0xe8] sm:$0xff]  ;;  %v8360_v8 = vld [vmem:[#allocation36_spill] sm:$0xff] }
 0x2c4   : > { %5411 = vst [vmem:[%s7423_s11 + $0x60] sm:$0xff] %v5048_v21   ;;  %v1829_v30 = vadd.f32 %v1797_v39, %v1701_v23  ;;  %v7775_v63 = vpop.f32.mrf.mxu1  ;;  %v5682_v43 = vpop.f32.mrf.mxu0  ;;  %v1798_v39 = vmul.f32 %v1763_v50, %v7767_v53  ;;  %8358 = vst [vmem:[#allocation64_spill] sm:$0xff] %v7787_v29  ;;  %v1702_v41 = vmul.f32 %v8360_v8, %v7781_v45 }
 0x2c5   : > { %v5683_v15 = vadd.f32 %v5682_v43, %v5681_v58  ;;  %v1921_v51 = vpop.permute.xlu1 %1920  ;;  %v1923_v38 = vpop.permute.xlu0 %1922  ;;  %8359 = vst [vmem:[#allocation65_spill] sm:$0xff] %v7793_v34  ;;  %v1988_v50 = vadd.f32 %v1956_v33, %v1860_v7 }
 0x2c6   : > { %v2021_v21 = vmul.f32 0.088388346, %v1829_v30  ;;  %v1957_v23 = vmul.f32 %v1921_v51, %v7754_v62  ;;  %v7785_v35 = vpop.f32.mrf.mxu1  ;;  %v5684_v31 = vpop.f32.mrf.mxu0  ;;  %v8362_v62 = vld [vmem:[#allocation38_spill] sm:$0xff]  ;;  %v1958_v7 = vmul.f32 %v1923_v38, %v7767_v53 }
 0x2c7   : > { %8357 = vst [vmem:[#allocation35_spill] sm:$0xff] %v7785_v35  ;;  %v5368_v56 = vpack.c.bf16 %v5683_v15, %v5680_v48  ;;  %3263 = vrot.lane.b32.xlu1 %v7765_v54, %s8259_s1  ;;  %3265 = vrot.lane.b32.xlu0 %v7785_v35, %s8259_s1  ;;  %v1703_v24 = vmul.f32 %v8362_v62, %v7787_v29 }
 0x2c8   : > { %v4973_v58 = vpack.c.bf16 %v2021_v21, %v2020_v2  ;;  %v1989_v30 = vadd.f32 %v1957_v23, %v1861_v10  ;;  %v7797_v43 = vpop.f32.mrf.mxu1  ;;  %v5685_v51 = vpop.f32.mrf.mxu0  ;;  %v1830_v35 = vadd.f32 %v1798_v39, %v1702_v41  ;;  %v7806_v2 = vld [vmem:[#allocation10 + $0xf0] sm:$0xff]  ;;  %v8364_v39 = vld [vmem:[#allocation37_spill] sm:$0xff] }
 0x2c9   : > { %8361 = vst [vmem:[#allocation36_spill] sm:$0xff] %v7797_v43  ;;  %5474 = vst [vmem:[%s7136_s8 + $0xe0] sm:$0xff] %v5368_v56   ;;  %v1765_v48 = vpop.permute.xlu1 %1764  ;;  %v1767_v15 = vpop.permute.xlu0 %1766  ;;  %v1862_v23 = vmul.f32 %v8364_v39, %v7781_v45  ;;  %v8365_v56 = vld [vmem:[#allocation39_spill] sm:$0xff]  ;;  %v7820_v41 = vld [vmem:[#allocation8 + $0xf0] sm:$0xff] }
 0x2ca   : > { %5397 = vst [vmem:[%s7412_s9 + $0x68] sm:$0xff] %v4973_v58   ;;  %v5053_v59 = vpack.c.bf16 %v1989_v30, %v1988_v50  ;;  %v1799_v54 = vmul.f32 %v1765_v48, %v7793_v34  ;;  %v7804_v1 = vpop.f32.mrf.mxu1  ;;  %v5687_v33 = vpop.f32.mrf.mxu0  ;;  %8363 = vst [vmem:[#allocation38_spill] sm:$0xff] %v7806_v2  ;;  %v1863_v8 = vmul.f32 %v8365_v56, %v7787_v29  ;;  %v7826_v39 = vld [vmem:[#allocation8 + $0xf8] sm:$0xff] }
 0x2cb   : > { %3423 = vrot.lane.b32.xlu1 %v7775_v63, %s8259_s1  ;;  %3425 = vrot.lane.b32.xlu0 %v7797_v43, %s8259_s1  ;;  %8366 = vst [vmem:[#allocation37_spill] sm:$0xff] %v7820_v41  ;;  %v5686_v50 = vadd.f32 %v5685_v51, %v5684_v31  ;;  %8368 = vst [vmem:[#allocation66_spill] sm:$0xff] %v7826_v39  ;;  %v7832_v31 = vld [vmem:[#allocation10 + $0xf8] sm:$0xff] }
 0x2cc   : > { %5412 = vst [vmem:[%s7423_s11 + $0x68] sm:$0xff] %v5053_v59   ;;  %v1831_v62 = vadd.f32 %v1799_v54, %v1703_v24  ;;  %v7814_v10 = vpop.f32.mrf.mxu1  ;;  %v5688_v21 = vpop.f32.mrf.mxu0  ;;  %v2022_v59 = vmul.f32 0.088388346, %v1830_v35  ;;  %v1800_v54 = vmul.f32 %v1767_v15, %v7806_v2  ;;  %8369 = vst [vmem:[#allocation67_spill] sm:$0xff] %v7832_v31  ;;  %v8370_v35 = vld [vmem:[#allocation40_spill] sm:$0xff]  ;;  %v1990_v15 = vadd.f32 %v1958_v7, %v1862_v23  ;;  %v8373_v23 = vld [vmem:[#allocation41_spill] sm:$0xff] }
 0x2cd   : > { %v5689_v58 = vadd.f32 %v5688_v21, %v5687_v33  ;;  %v1925_v30 = vpop.permute.xlu1 %1924  ;;  %v1927_v48 = vpop.permute.xlu0 %1926  ;;  %v1704_v51 = vmul.f32 %v8370_v35, %v7820_v41 }
 0x2ce   : > { %v2023_v43 = vmul.f32 0.088388346, %v1831_v62  ;;  %v1959_v24 = vmul.f32 %v1925_v30, %v7793_v34  ;;  %v7824_v38 = vpop.f32.mrf.mxu1 }
 0x2cf   : > { %8367 = vst [vmem:[#allocation39_spill] sm:$0xff] %v7824_v38  ;;  %v5373_v45 = vpack.c.bf16 %v5689_v58, %v5686_v50  ;;  %3267 = vrot.lane.b32.xlu1 %v7804_v1, %s8259_s1  ;;  %3269 = vrot.lane.b32.xlu0 %v7824_v38, %s8259_s1  ;;  %v8372_v58 = vld [vmem:[#allocation42_spill] sm:$0xff]  ;;  %v1832_v34 = vadd.f32 %v1800_v54, %v1704_v51 }
 0x2d0   : > { %v4978_v33 = vpack.c.bf16 %v2023_v43, %v2022_v59  ;;  %v1991_v62 = vadd.f32 %v1959_v24, %v1863_v8  ;;  %v7836_v21 = vpop.f32.mrf.mxu1  ;;  %v1705_v30 = vmul.f32 %v8372_v58, %v7826_v39  ;;  %v1864_v8 = vmul.f32 %v8373_v23, %v7820_v41  ;;  %v8374_v59 = vld [vmem:[#allocation43_spill] sm:$0xff] }
 0x2d1   : > { %8371 = vst [vmem:[#allocation40_spill] sm:$0xff] %v7836_v21  ;;  %5475 = vst [vmem:[%s7136_s8 + $0xe8] sm:$0xff] %v5373_v45   ;;  %v1769_v56 = vpop.permute.xlu1 %1768  ;;  %v3214_v50 = vpop.permute.xlu0 %3213  ;;  %v1960_v45 = vmul.f32 %v1927_v48, %v7806_v2  ;;  %v1865_v54 = vmul.f32 %v8374_v59, %v7826_v39  ;;  %v2024_v51 = vmul.f32 0.088388346, %v1832_v34  ;;  %v6083_v48 = vld [vmem:[#allocation8] sm:$0xff]  ;;  %v6085_v2 = vld [vmem:[#allocation10 + $0x8] sm:$0xff] }
 0x2d2   : > { %5398 = vst [vmem:[%s7412_s9 + $0x70] sm:$0xff] %v4978_v33   ;;  %v5058_v29 = vpack.c.bf16 %v1991_v62, %v1990_v15  ;;  %v1801_v38 = vmul.f32 %v1769_v56, %v7832_v31  ;;  %v7843_v53 = vpop.f32.mrf.mxu1  ;;  %v6082_v33 = vld [vmem:[#allocation10] sm:$0xff] }
 0x2d3   : > { %3427 = vrot.lane.b32.xlu1 %v7814_v10, %s8259_s1  ;;  %3429 = vrot.lane.b32.xlu0 %v7836_v21, %s8259_s1  ;;  %v3277_v62 = vmul.f32 %v6082_v33, %v3214_v50 }
 0x2d4   : > { %5413 = vst [vmem:[%s7423_s11 + $0x70] sm:$0xff] %v5058_v29   ;;  %v1833_v43 = vadd.f32 %v1801_v38, %v1705_v30  ;;  %v7851_v7 = vpop.f32.mrf.mxu1  ;;  %v8376_v38 = vld [vmem:[#allocation44_spill] sm:$0xff]  ;;  %v1992_v30 = vadd.f32 %v1960_v45, %v1864_v8 }
 0x2d5   : > { %v1929_v24 = vpop.permute.xlu1 %1928  ;;  %v3374_v35 = vpop.permute.xlu0 %3373  ;;  %v3181_v58 = vmul.f32 %v6083_v48, %v8376_v38 }
 0x2d6   : > { %v2025_v15 = vmul.f32 0.088388346, %v1833_v43  ;;  %v1961_v29 = vmul.f32 %v1929_v24, %v7832_v31  ;;  %v7858_v56 = vpop.f32.mrf.mxu1  ;;  %v6084_v24 = vld [vmem:[#allocation8 + $0x8] sm:$0xff]  ;;  %v3437_v45 = vmul.f32 %v6082_v33, %v3374_v35 }
 0x2d7   : > { %8375 = vst [vmem:[#allocation42_spill] sm:$0xff] %v7858_v56  ;;  %3271 = vrot.lane.b32.xlu1 %v7843_v53, %s8259_s1  ;;  %3273 = vrot.lane.b32.xlu0 %v7858_v56, %s8259_s1  ;;  %v3182_v31 = vmul.f32 %v6084_v24, %v7430_v14  ;;  %v3309_v39 = vadd.f32 %v3277_v62, %v3181_v58 }
 0x2d8   : > { %v4983_v34 = vpack.c.bf16 %v2025_v15, %v2024_v51  ;;  %v1993_v43 = vadd.f32 %v1961_v29, %v1865_v54  ;;  %v7865_v23 = vpop.f32.mrf.mxu1  ;;  %v8379_v51 = vld [vmem:[#allocation45_spill] sm:$0xff]  ;;  %v3342_v15 = vmul.f32 %v6084_v24, %v7436_v16 }
 0x2d9   : > { %8377 = vst [vmem:[#allocation41_spill] sm:$0xff] %v7865_v23  ;;  %v3216_v50 = vpop.permute.xlu1 %3215  ;;  %v3218_v59 = vpop.permute.xlu0 %3217  ;;  %v3341_v14 = vmul.f32 %v6083_v48, %v8379_v51  ;;  %v3501_v38 = vmul.f32 0.088388346, %v3309_v39  ;;  %v6088_v39 = vld [vmem:[#allocation8 + $0x18] sm:$0xff] }
 0x2da   : > { %5399 = vst [vmem:[%s7412_s9 + $0x78] sm:$0xff] %v4983_v34   ;;  %v5063_v41 = vpack.c.bf16 %v1993_v43, %v1992_v30  ;;  %v3278_v21 = vmul.f32 %v6085_v2, %v3216_v50  ;;  %v7869_v56 = vpop.f32.mrf.mxu1  ;;  %v6086_v30 = vld [vmem:[#allocation10 + $0x10] sm:$0xff]  ;;  %v6089_v51 = vld [vmem:[#allocation10 + $0x18] sm:$0xff] }
 0x2db   : > { %3431 = vrot.lane.b32.xlu1 %v7851_v7, %s8259_s1  ;;  %3433 = vrot.lane.b32.xlu0 %v7865_v23, %s8259_s1  ;;  %v3279_v34 = vmul.f32 %v6086_v30, %v3218_v59 }
 0x2dc   : > { %5414 = vst [vmem:[%s7423_s11 + $0x78] sm:$0xff] %v5063_v41   ;;  %v3310_v8 = vadd.f32 %v3278_v21, %v3182_v31  ;;  %v7876_v54 = vpop.f32.mrf.mxu1  ;;  %v6087_v41 = vld [vmem:[#allocation8 + $0x10] sm:$0xff]  ;;  %v3469_v21 = vadd.f32 %v3437_v45, %v3341_v14 }
 0x2dd   : > { %8378 = vst [vmem:[#allocation43_spill] sm:$0xff] %v7876_v54  ;;  %v3376_v62 = vpop.permute.xlu1 %3375  ;;  %v3378_v29 = vpop.permute.xlu0 %3377  ;;  %v3183_v31 = vmul.f32 %v6087_v41, %v7440_v60 }
 0x2de   : > { %v3502_v58 = vmul.f32 0.088388346, %v3310_v8  ;;  %v3438_v43 = vmul.f32 %v6085_v2, %v3376_v62  ;;  %v5690_v50 = vpop.f32.mrf.mxu1  ;;  %v3184_v8 = vmul.f32 %v6088_v39, %v7452_v6  ;;  %v3439_v60 = vmul.f32 %v6086_v30, %v3378_v29  ;;  %v6091_v29 = vld [vmem:[#allocation8 + $0x20] sm:$0xff] }
 0x2df   : > { %3275 = vrot.lane.b32.xlu1 %v7869_v56, %s8259_s1  ;;  %v3311_v59 = vadd.f32 %v3279_v34, %v3183_v31  ;;  %v3185_v30 = vmul.f32 %v6091_v29, %v7463_v0 }
 0x2e0   : > { %v5148_v35 = vpack.c.bf16 %v3502_v58, %v3501_v38  ;;  %v3470_v33 = vadd.f32 %v3438_v43, %v3342_v15  ;;  %v5691_v16 = vpop.f32.mrf.mxu1  ;;  %v3343_v15 = vmul.f32 %v6087_v41, %v7447_v49  ;;  %v3344_v38 = vmul.f32 %v6088_v39, %v7459_v20  ;;  %v6092_v39 = vld [vmem:[#allocation8 + $0x28] sm:$0xff] }
 0x2e1   : > { %v3220_v48 = vpop.permute.xlu1 %3219  ;;  %v3222_v24 = vpop.permute.xlu0 %3221  ;;  %v5692_v58 = vadd.f32 %v5691_v16, %v5690_v50  ;;  %v3503_v31 = vmul.f32 0.088388346, %v3311_v59 }
 0x2e2   : > { %5430 = vst [vmem:[%s7412_s9 + $0x80] sm:$0xff] %v5148_v35   ;;  %v5228_v2 = vpack.c.bf16 %v3470_v33, %v3469_v21  ;;  %v3280_v62 = vmul.f32 %v6089_v51, %v3220_v48  ;;  %v5693_v23 = vpop.f32.mrf.mxu1  ;;  %v6090_v35 = vld [vmem:[#allocation10 + $0x20] sm:$0xff]  ;;  %v3471_v49 = vadd.f32 %v3439_v60, %v3343_v15  ;;  %v3345_v60 = vmul.f32 %v6091_v29, %v7470_v55 }
 0x2e3   : > { %3435 = vrot.lane.b32.xlu1 %v7876_v54, %s8259_s1  ;;  %v3281_v33 = vmul.f32 %v6090_v35, %v3222_v24  ;;  %v3346_v15 = vmul.f32 %v6092_v39, %v7482_v36  ;;  %s6256_s1 = scalar_lea.vmem %s8032_s16, 4096 }
 0x2e4   : > { %5446 = vst [vmem:[%s7423_s11 + $0x80] sm:$0xff] %v5228_v2   ;;  %v3312_v45 = vadd.f32 %v3280_v62, %v3184_v8  ;;  %v5694_v14 = vpop.f32.mrf.mxu1  ;;  %v3186_v8 = vmul.f32 %v6092_v39, %v7475_v4  ;;  %v6097_v39 = vld [vmem:[#allocation10 + $0x38] sm:$0xff]  ;;  %p6257_p13 = scmp.ne.s32.totalorder %s8032_s16, %s6256_s1  ;;  %p6264_p12 = scmp.lt.s32.totalorder %s6262_s0, %s6256_s1 }
 0x2e5   : > { %v5695_v43 = vadd.f32 %v5694_v14, %v5693_v23  ;;  %v3380_v6 = vpop.permute.xlu1 %3379  ;;  %v3382_v34 = vpop.permute.xlu0 %3381  ;;  %v3313_v59 = vadd.f32 %v3281_v33, %v3185_v30  ;;  %v6094_v33 = vld [vmem:[#allocation10 + $0x30] sm:$0xff] }
 0x2e6   : > { %v3504_v21 = vmul.f32 0.088388346, %v3312_v45  ;;  %v3440_v48 = vmul.f32 %v6089_v51, %v3380_v6  ;;  %v5696_v54 = vpop.f32.mrf.mxu1  ;;  %v6093_v51 = vld [vmem:[#allocation10 + $0x28] sm:$0xff]  ;;  %v3441_v14 = vmul.f32 %v6090_v35, %v3382_v34  ;;  %v6095_v34 = vld [vmem:[#allocation8 + $0x30] sm:$0xff]  ;;  %p6258_p0 = pnand %p6257_p13, %p6573_p5  ;;  %p6265_p4 = por %p6264_p12, %p6263_p2 }
 0x2e7   : > { %v5378_v2 = vpack.c.bf16 %v5695_v43, %v5692_v58  ;;  %v3505_v4 = vmul.f32 0.088388346, %v3313_v59  ;;  %v3187_v35 = vmul.f32 %v6095_v34, %v7486_v37 }
 0x2e8   : > { %v5153_v41 = vpack.c.bf16 %v3504_v21, %v3503_v31  ;;  %v3472_v20 = vadd.f32 %v3440_v48, %v3344_v38  ;;  %v5697_v50 = vpop.f32.mrf.mxu1  ;;  %p6259_p1 = pneg %p6258_p0 }
 0x2e9   : > { %5476 = vst [vmem:[%s7136_s8 + $0xf0] sm:$0xff] %v5378_v2   ;;  %v3224_v23 = vpop.permute.xlu1 %3223  ;;  %v3226_v16 = vpop.permute.xlu0 %3225  ;;  %v5698_v38 = vadd.f32 %v5697_v50, %v5696_v54 }
 0x2ea   : > { %5431 = vst [vmem:[%s7412_s9 + $0x88] sm:$0xff] %v5153_v41   ;;  %v5233_v24 = vpack.c.bf16 %v3472_v20, %v3471_v49  ;;  %v3282_v62 = vmul.f32 %v6093_v51, %v3224_v23  ;;  %v5699_v45 = vpop.f32.mrf.mxu1  ;;  %v3283_v48 = vmul.f32 %v6094_v33, %v3226_v16  ;;  %v3473_v49 = vadd.f32 %v3441_v14, %v3345_v60  ;;  %v6096_v41 = vld [vmem:[#allocation8 + $0x38] sm:$0xff]  ;;  %v6099_v60 = vld [vmem:[#allocation8 + $0x40] sm:$0xff]  ;;  %p6266_p6 = pnand %p6265_p4, %p6259_p1 }
 0x2eb   : > { %v3188_v20 = vmul.f32 %v6096_v41, %v7498_v11  ;;  %v3348_v37 = vmul.f32 %v6096_v41, %v7505_v27 }
 0x2ec   : > { %5447 = vst [vmem:[%s7423_s11 + $0x88] sm:$0xff] %v5233_v24   ;;  %v3314_v0 = vadd.f32 %v3282_v62, %v3186_v8  ;;  %v5700_v58 = vpop.f32.mrf.mxu1  ;;  %v3315_v50 = vadd.f32 %v3283_v48, %v3187_v35  ;;  %v3347_v24 = vmul.f32 %v6095_v34, %v7493_v9  ;;  %v6100_v9 = vld [vmem:[#allocation8 + $0x48] sm:$0xff]  ;;  %v3349_v35 = vmul.f32 %v6099_v60, %v7516_v3  ;;  %v6104_v3 = vld [vmem:[#allocation8 + $0x58] sm:$0xff] }
 0x2ed   : > { %v5701_v43 = vadd.f32 %v5700_v58, %v5699_v45  ;;  %v3384_v6 = vpop.permute.xlu1 %3383  ;;  %v3386_v31 = vpop.permute.xlu0 %3385  ;;  %v3190_v27 = vmul.f32 %v6100_v9, %v7521_v28  ;;  %v6101_v48 = vld [vmem:[#allocation10 + $0x48] sm:$0xff] }
 0x2ee   : > { %v3506_v21 = vmul.f32 0.088388346, %v3314_v0  ;;  %v3442_v2 = vmul.f32 %v6093_v51, %v3384_v6  ;;  %v3443_v8 = vmul.f32 %v6094_v33, %v3386_v31  ;;  %v3507_v45 = vmul.f32 0.088388346, %v3315_v50  ;;  %v6098_v0 = vld [vmem:[#allocation10 + $0x40] sm:$0xff] }
 0x2ef   : > { %v5383_v30 = vpack.c.bf16 %v5701_v43, %v5698_v38 }
 0x2f0   : > { %v5158_v55 = vpack.c.bf16 %v3506_v21, %v3505_v4  ;;  %v3474_v29 = vadd.f32 %v3442_v2, %v3346_v15  ;;  %v3189_v15 = vmul.f32 %v6099_v60, %v7509_v18  ;;  %v3475_v38 = vadd.f32 %v3443_v8, %v3347_v24 }
 0x2f1   : > { %5477 = vst [vmem:[%s7136_s8 + $0xf8] sm:$0xff] %v5383_v30   ;;  %v3228_v36 = vpop.permute.xlu1 %3227  ;;  %v3230_v54 = vpop.permute.xlu0 %3229  ;;  %v3350_v18 = vmul.f32 %v6100_v9, %v7528_v12  ;;  %v3192_v12 = vmul.f32 %v6104_v3, %v7544_v52 }
 0x2f2   : > { %5432 = vst [vmem:[%s7412_s9 + $0x90] sm:$0xff] %v5158_v55   ;;  %v5238_v23 = vpack.c.bf16 %v3474_v29, %v3473_v49  ;;  %v3284_v16 = vmul.f32 %v6097_v39, %v3228_v36  ;;  %v3285_v58 = vmul.f32 %v6098_v0, %v3230_v54  ;;  %v6102_v54 = vld [vmem:[#allocation10 + $0x50] sm:$0xff] }
 0x2f4   : > { %5448 = vst [vmem:[%s7423_s11 + $0x90] sm:$0xff] %v5238_v23   ;;  %v3316_v59 = vadd.f32 %v3284_v16, %v3188_v20  ;;  %v3317_v21 = vadd.f32 %v3285_v58, %v3189_v15  ;;  %v6103_v20 = vld [vmem:[#allocation8 + $0x50] sm:$0xff] }
 0x2f5   : > { %v3388_v51 = vpop.permute.xlu1 %3387  ;;  %v3390_v62 = vpop.permute.xlu0 %3389  ;;  %v3191_v50 = vmul.f32 %v6103_v20, %v7532_v46  ;;  %v3352_v46 = vmul.f32 %v6104_v3, %v7551_v19 }
 0x2f6   : > { %v3508_v14 = vmul.f32 0.088388346, %v3316_v59  ;;  %v3444_v11 = vmul.f32 %v6097_v39, %v3388_v51  ;;  %v3445_v30 = vmul.f32 %v6098_v0, %v3390_v62  ;;  %v3509_v29 = vmul.f32 0.088388346, %v3317_v21  ;;  %v6105_v51 = vld [vmem:[#allocation10 + $0x58] sm:$0xff] }
 0x2f7   : > { %v3351_v0 = vmul.f32 %v6103_v20, %v7539_v57  ;;  %v6108_v57 = vld [vmem:[#allocation8 + $0x68] sm:$0xff]  ;;  %v6111_v20 = vld [vmem:[#allocation8 + $0x70] sm:$0xff] }
 0x2f8   : > { %v5163_v43 = vpack.c.bf16 %v3508_v14, %v3507_v45  ;;  %v3476_v6 = vadd.f32 %v3444_v11, %v3348_v37  ;;  %v3477_v23 = vadd.f32 %v3445_v30, %v3349_v35  ;;  %v3194_v19 = vmul.f32 %v6108_v57, %v7567_v17  ;;  %v6109_v30 = vld [vmem:[#allocation10 + $0x68] sm:$0xff] }
 0x2f9   : > { %v3232_v31 = vpop.permute.xlu1 %3231  ;;  %v3234_v4 = vpop.permute.xlu0 %3233 }
 0x2fa   : > { %5433 = vst [vmem:[%s7412_s9 + $0x98] sm:$0xff] %v5163_v43   ;;  %v5243_v33 = vpack.c.bf16 %v3476_v6, %v3475_v38  ;;  %v3286_v2 = vmul.f32 %v6101_v48, %v3232_v31  ;;  %v3287_v41 = vmul.f32 %v6102_v54, %v3234_v4  ;;  %v6106_v38 = vld [vmem:[#allocation10 + $0x60] sm:$0xff] }
 0x2fb   : > { %v6107_v6 = vld [vmem:[#allocation8 + $0x60] sm:$0xff] }
 0x2fc   : > { %5449 = vst [vmem:[%s7423_s11 + $0x98] sm:$0xff] %v5243_v33   ;;  %v3318_v34 = vadd.f32 %v3286_v2, %v3190_v27  ;;  %v3319_v24 = vadd.f32 %v3287_v41, %v3191_v50  ;;  %v3193_v31 = vmul.f32 %v6107_v6, %v7555_v13  ;;  %v3354_v13 = vmul.f32 %v6108_v57, %v7574_v25  ;;  %v6110_v41 = vld [vmem:[#allocation10 + $0x70] sm:$0xff] }
 0x2fd   : > { %v3392_v49 = vpop.permute.xlu1 %3391  ;;  %v3394_v55 = vpop.permute.xlu0 %3393  ;;  %v3195_v50 = vmul.f32 %v6111_v20, %v7578_v44 }
 0x2fe   : > { %v3510_v36 = vmul.f32 0.088388346, %v3318_v34  ;;  %v3446_v28 = vmul.f32 %v6101_v48, %v3392_v49  ;;  %v3447_v45 = vmul.f32 %v6102_v54, %v3394_v55  ;;  %v3511_v60 = vmul.f32 0.088388346, %v3319_v24  ;;  %v6113_v24 = vld [vmem:[#allocation10 + $0x78] sm:$0xff] }
 0x2ff   : > { %v3353_v49 = vmul.f32 %v6107_v6, %v7562_v26  ;;  %v6112_v26 = vld [vmem:[#allocation8 + $0x78] sm:$0xff] }
 0x300   : > { %v5168_v39 = vpack.c.bf16 %v3510_v36, %v3509_v29  ;;  %v3478_v16 = vadd.f32 %v3446_v28, %v3350_v18  ;;  %v3479_v4 = vadd.f32 %v3447_v45, %v3351_v0  ;;  %v3196_v25 = vmul.f32 %v6112_v26, %v7590_v61 }
 0x301   : > { %v3236_v8 = vpop.permute.xlu1 %3235  ;;  %v3238_v59 = vpop.permute.xlu0 %3237  ;;  %v3355_v45 = vmul.f32 %v6111_v20, %v7585_v5  ;;  %v3356_v44 = vmul.f32 %v6112_v26, %v7597_v47  ;;  %v6116_v5 = vld [vmem:[#allocation8 + $0x88] sm:$0xff]  ;;  %v8381_v20 = vld [vmem:[#allocation22_spill] sm:$0xff]  ;;  %v8382_v26 = vld [vmem:[#allocation20_spill] sm:$0xff] }
 0x302   : > { %5434 = vst [vmem:[%s7412_s9 + $0xa0] sm:$0xff] %v5168_v39   ;;  %v5248_v37 = vpack.c.bf16 %v3478_v16, %v3477_v23  ;;  %v3288_v62 = vmul.f32 %v6105_v51, %v3236_v8  ;;  %v3289_v43 = vmul.f32 %v6106_v38, %v3238_v59  ;;  %v3198_v47 = vmul.f32 %v6116_v5, %v7613_v42 }
 0x304   : > { %5450 = vst [vmem:[%s7423_s11 + $0xa0] sm:$0xff] %v5248_v37   ;;  %v3320_v14 = vadd.f32 %v3288_v62, %v3192_v12  ;;  %v3321_v48 = vadd.f32 %v3289_v43, %v3193_v31 }
 0x305   : > { %v3396_v58 = vpop.permute.xlu1 %3395  ;;  %v3398_v11 = vpop.permute.xlu0 %3397 }
 0x306   : > { %v3512_v15 = vmul.f32 0.088388346, %v3320_v14  ;;  %v3448_v52 = vmul.f32 %v6105_v51, %v3396_v58  ;;  %v3449_v35 = vmul.f32 %v6106_v38, %v3398_v11  ;;  %v3513_v36 = vmul.f32 0.088388346, %v3321_v48  ;;  %v6114_v11 = vld [vmem:[#allocation10 + $0x80] sm:$0xff] }
 0x308   : > { %v5173_v9 = vpack.c.bf16 %v3512_v15, %v3511_v60  ;;  %v3480_v27 = vadd.f32 %v3448_v52, %v3352_v46  ;;  %v3481_v23 = vadd.f32 %v3449_v35, %v3353_v49  ;;  %v6115_v15 = vld [vmem:[#allocation8 + $0x80] sm:$0xff] }
 0x309   : > { %v3240_v21 = vpop.permute.xlu1 %3239  ;;  %v3242_v33 = vpop.permute.xlu0 %3241  ;;  %v3197_v38 = vmul.f32 %v6115_v15, %v7601_v22  ;;  %v3357_v48 = vmul.f32 %v6115_v15, %v7608_v32  ;;  %v3358_v22 = vmul.f32 %v6116_v5, %v7622_v40  ;;  %v6120_v32 = vld [vmem:[#allocation8 + $0x98] sm:$0xff]  ;;  %v8389_v5 = vld [vmem:[#allocation50_spill] sm:$0xff] }
 0x30a   : > { %5435 = vst [vmem:[%s7412_s9 + $0xa8] sm:$0xff] %v5173_v9   ;;  %v5253_v2 = vpack.c.bf16 %v3480_v27, %v3479_v4  ;;  %v3290_v34 = vmul.f32 %v6109_v30, %v3240_v21  ;;  %v3291_v28 = vmul.f32 %v6110_v41, %v3242_v33  ;;  %v6117_v21 = vld [vmem:[#allocation10 + $0x88] sm:$0xff]  ;;  %v3200_v40 = vmul.f32 %v6120_v32, %v8381_v20  ;;  %v8396_v20 = vld [vmem:[#allocation30_spill] sm:$0xff] }
 0x30c   : > { %5451 = vst [vmem:[%s7423_s11 + $0xa8] sm:$0xff] %v5253_v2   ;;  %v3322_v18 = vadd.f32 %v3290_v34, %v3194_v19  ;;  %v3323_v3 = vadd.f32 %v3291_v28, %v3195_v50 }
 0x30d   : > { %v3400_v55 = vpop.permute.xlu1 %3399  ;;  %v3402_v29 = vpop.permute.xlu0 %3401 }
 0x30e   : > { %v3514_v54 = vmul.f32 0.088388346, %v3322_v18  ;;  %v3450_v17 = vmul.f32 %v6109_v30, %v3400_v55  ;;  %v3451_v51 = vmul.f32 %v6110_v41, %v3402_v29  ;;  %v3515_v46 = vmul.f32 0.088388346, %v3323_v3  ;;  %v6118_v18 = vld [vmem:[#allocation10 + $0x90] sm:$0xff]  ;;  %v8380_v55 = vld [vmem:[#allocation48_spill] sm:$0xff] }
 0x30f   : > { %v8383_v3 = vld [vmem:[#allocation52_spill] sm:$0xff] }
 0x310   : > { %v5178_v39 = vpack.c.bf16 %v3514_v54, %v3513_v36  ;;  %v3482_v16 = vadd.f32 %v3450_v17, %v3354_v13  ;;  %v3483_v43 = vadd.f32 %v3451_v51, %v3355_v45  ;;  %v6119_v13 = vld [vmem:[#allocation8 + $0x90] sm:$0xff] }
 0x311   : > { %v3244_v8 = vpop.permute.xlu1 %3243  ;;  %v3246_v59 = vpop.permute.xlu0 %3245  ;;  %v3199_v29 = vmul.f32 %v6119_v13, %v8380_v55  ;;  %v8384_v45 = vld [vmem:[#allocation46_spill] sm:$0xff]  ;;  %v8394_v55 = vld [vmem:[#allocation27_spill] sm:$0xff] }
 0x312   : > { %5436 = vst [vmem:[%s7412_s9 + $0xb0] sm:$0xff] %v5178_v39   ;;  %v5258_v12 = vpack.c.bf16 %v3482_v16, %v3481_v23  ;;  %v3292_v37 = vmul.f32 %v6113_v24, %v3244_v8  ;;  %v3293_v60 = vmul.f32 %v6114_v11, %v3246_v59  ;;  %v6121_v39 = vld [vmem:[#allocation10 + $0x98] sm:$0xff] }
 0x314   : > { %5452 = vst [vmem:[%s7423_s11 + $0xb0] sm:$0xff] %v5258_v12   ;;  %v3324_v62 = vadd.f32 %v3292_v37, %v3196_v25  ;;  %v3325_v9 = vadd.f32 %v3293_v60, %v3197_v38  ;;  %v3359_v25 = vmul.f32 %v6119_v13, %v8382_v26  ;;  %v3360_v12 = vmul.f32 %v6120_v32, %v8383_v3  ;;  %v8393_v13 = vld [vmem:[#allocation21_spill] sm:$0xff]  ;;  %v8398_v26 = vld [vmem:[#allocation28_spill] sm:$0xff] }
 0x315   : > { %v3404_v14 = vpop.permute.xlu1 %3403  ;;  %v3406_v0 = vpop.permute.xlu0 %3405  ;;  %v8395_v32 = vld [vmem:[#allocation53_spill] sm:$0xff]  ;;  %v8399_v3 = vld [vmem:[#allocation60_spill] sm:$0xff] }
 0x316   : > { %v3516_v58 = vmul.f32 0.088388346, %v3324_v62  ;;  %v3452_v61 = vmul.f32 %v6113_v24, %v3404_v14  ;;  %v3453_v57 = vmul.f32 %v6114_v11, %v3406_v0  ;;  %v3517_v34 = vmul.f32 0.088388346, %v3325_v9  ;;  %v8385_v0 = vld [vmem:[#allocation47_spill] sm:$0xff]  ;;  %v6122_v9 = vld [vmem:[#allocation10 + $0xa0] sm:$0xff] }
 0x318   : > { %v5183_v52 = vpack.c.bf16 %v3516_v58, %v3515_v46  ;;  %v3484_v6 = vadd.f32 %v3452_v61, %v3356_v44  ;;  %v3485_v36 = vadd.f32 %v3453_v57, %v3357_v48  ;;  %v8386_v46 = vld [vmem:[#allocation23_spill] sm:$0xff]  ;;  %v8390_v57 = vld [vmem:[#allocation24_spill] sm:$0xff] }
 0x319   : > { %v3248_v31 = vpop.permute.xlu1 %3247  ;;  %v3250_v4 = vpop.permute.xlu0 %3249  ;;  %v3201_v58 = vmul.f32 %v8386_v46, %v8385_v0  ;;  %v8391_v48 = vld [vmem:[#allocation56_spill] sm:$0xff]  ;;  %v8401_v0 = vld [vmem:[#allocation25_spill] sm:$0xff]  ;;  %v8402_v46 = vld [vmem:[#allocation31_spill] sm:$0xff] }
 0x31a   : > { %5437 = vst [vmem:[%s7412_s9 + $0xb8] sm:$0xff] %v5183_v52   ;;  %v5263_v27 = vpack.c.bf16 %v3484_v6, %v3483_v43  ;;  %v3294_v33 = vmul.f32 %v6117_v21, %v3248_v31  ;;  %v3295_v49 = vmul.f32 %v6118_v18, %v3250_v4  ;;  %v8387_v43 = vld [vmem:[#allocation49_spill] sm:$0xff]  ;;  %v8388_v52 = vld [vmem:[#allocation26_spill] sm:$0xff] }
 0x31b   : > { %v3202_v6 = vmul.f32 %v8388_v52, %v8387_v43  ;;  %v8404_v52 = vld [vmem:[#allocation34_spill] sm:$0xff] }
 0x31c   : > { %5453 = vst [vmem:[%s7423_s11 + $0xb8] sm:$0xff] %v5263_v27   ;;  %v3326_v19 = vadd.f32 %v3294_v33, %v3198_v47  ;;  %v3327_v50 = vadd.f32 %v3295_v49, %v3199_v29  ;;  %v6123_v33 = vld [vmem:[#allocation8 + $0xa0] sm:$0xff]  ;;  %v3203_v29 = vmul.f32 %v8394_v55, %v8393_v13 }
 0x31d   : > { %v3408_v2 = vpop.permute.xlu1 %3407  ;;  %v3410_v30 = vpop.permute.xlu0 %3409 }
 0x31e   : > { %v3518_v35 = vmul.f32 0.088388346, %v3326_v19  ;;  %v3454_v42 = vmul.f32 %v6117_v21, %v3408_v2  ;;  %v3455_v8 = vmul.f32 %v6118_v18, %v3410_v30  ;;  %v3519_v51 = vmul.f32 0.088388346, %v3327_v50  ;;  %v8392_v18 = vld [vmem:[#allocation51_spill] sm:$0xff] }
 0x31f   : > { %v3361_v19 = vmul.f32 %v6123_v33, %v8390_v57 }
 0x320   : > { %v5188_v54 = vpack.c.bf16 %v3518_v35, %v3517_v34  ;;  %v3486_v41 = vadd.f32 %v3454_v42, %v3358_v22  ;;  %v3487_v11 = vadd.f32 %v3455_v8, %v3359_v25  ;;  %v3362_v22 = vmul.f32 %v8391_v48, %v8387_v43  ;;  %v8403_v43 = vld [vmem:[#allocation57_spill] sm:$0xff] }
 0x321   : > { %v3252_v28 = vpop.permute.xlu1 %3251  ;;  %v3254_v17 = vpop.permute.xlu0 %3253  ;;  %v3363_v25 = vmul.f32 %v8398_v26, %v8393_v13  ;;  %v3366_v57 = vmul.f32 %v7775_v63, %v8403_v43 }
 0x322   : > { %5438 = vst [vmem:[%s7412_s9 + $0xc0] sm:$0xff] %v5188_v54   ;;  %v5268_v23 = vpack.c.bf16 %v3486_v41, %v3485_v36  ;;  %v3296_v16 = vmul.f32 %v6121_v39, %v3252_v28  ;;  %v3297_v44 = vmul.f32 %v3254_v17, %v8384_v45  ;;  %v8400_v45 = vld [vmem:[#allocation55_spill] sm:$0xff] }
 0x324   : > { %5454 = vst [vmem:[%s7423_s11 + $0xc0] sm:$0xff] %v5268_v23   ;;  %v3328_v59 = vadd.f32 %v3296_v16, %v3200_v40  ;;  %v3329_v31 = vadd.f32 %v3297_v44, %v3201_v58  ;;  %v3204_v40 = vmul.f32 %v8396_v20, %v8395_v32  ;;  %v3205_v58 = vmul.f32 %v8402_v46, %v8401_v0 }
 0x325   : > { %v3412_v24 = vpop.permute.xlu1 %3411  ;;  %v3414_v37 = vpop.permute.xlu0 %3413 }
 0x326   : > { %v3520_v62 = vmul.f32 0.088388346, %v3328_v59  ;;  %v3456_v14 = vmul.f32 %v6121_v39, %v3412_v24  ;;  %v3457_v27 = vmul.f32 %v6122_v9, %v3414_v37  ;;  %v3521_v34 = vmul.f32 0.088388346, %v3329_v31  ;;  %v8397_v39 = vld [vmem:[#allocation54_spill] sm:$0xff] }
 0x328   : > { %v5193_v60 = vpack.c.bf16 %v3520_v62, %v3519_v51  ;;  %v3488_v61 = vadd.f32 %v3456_v14, %v3360_v12  ;;  %v3489_v36 = vadd.f32 %v3457_v27, %v3361_v19  ;;  %v3364_v12 = vmul.f32 %v8399_v3, %v8395_v32  ;;  %v8411_v32 = vld [vmem:[#allocation62_spill] sm:$0xff] }
 0x329   : > { %v3256_v15 = vpop.permute.xlu1 %3255  ;;  %v3258_v38 = vpop.permute.xlu0 %3257 }
 0x32a   : > { %5439 = vst [vmem:[%s7412_s9 + $0xc8] sm:$0xff] %v5193_v60   ;;  %v5273_v4 = vpack.c.bf16 %v3488_v61, %v3487_v11  ;;  %v3298_v47 = vmul.f32 %v3256_v15, %v8389_v5  ;;  %v3299_v49 = vmul.f32 %v3258_v38, %v8392_v18 }
 0x32c   : > { %5455 = vst [vmem:[%s7423_s11 + $0xc8] sm:$0xff] %v5273_v4   ;;  %v3330_v21 = vadd.f32 %v3298_v47, %v3202_v6  ;;  %v3331_v50 = vadd.f32 %v3299_v49, %v3203_v29  ;;  %v3206_v6 = vmul.f32 %v8404_v52, %v8403_v43  ;;  %v8409_v49 = vld [vmem:[#allocation35_spill] sm:$0xff]  ;;  %v8418_v43 = vld [vmem:[#allocation40_spill] sm:$0xff] }
 0x32d   : > { %v3416_v2 = vpop.permute.xlu1 %3415  ;;  %v3418_v30 = vpop.permute.xlu0 %3417 }
 0x32e   : > { %v3522_v35 = vmul.f32 0.088388346, %v3330_v21  ;;  %v3458_v42 = vmul.f32 %v3416_v2, %v8389_v5  ;;  %v3459_v8 = vmul.f32 %v3418_v30, %v8392_v18  ;;  %v3523_v51 = vmul.f32 0.088388346, %v3331_v50  ;;  %v8405_v5 = vld [vmem:[#allocation58_spill] sm:$0xff]  ;;  %v8406_v21 = vld [vmem:[#allocation32_spill] sm:$0xff] }
 0x32f   : > { %v3365_v33 = vmul.f32 %v8406_v21, %v8401_v0  ;;  %v8407_v30 = vld [vmem:[#allocation59_spill] sm:$0xff]  ;;  %v8408_v18 = vld [vmem:[#allocation29_spill] sm:$0xff]  ;;  %v8416_v0 = vld [vmem:[#allocation64_spill] sm:$0xff] }
 0x330   : > { %v5198_v54 = vpack.c.bf16 %v3522_v35, %v3521_v34  ;;  %v3490_v41 = vadd.f32 %v3458_v42, %v3362_v22  ;;  %v3491_v11 = vadd.f32 %v3459_v8, %v3363_v25  ;;  %v3207_v42 = vmul.f32 %v8409_v49, %v8408_v18  ;;  %v8413_v25 = vld [vmem:[#allocation63_spill] sm:$0xff]  ;;  %v8421_v21 = vld [vmem:[#allocation42_spill] sm:$0xff] }
 0x331   : > { %v3260_v28 = vpop.permute.xlu1 %3259  ;;  %v3262_v17 = vpop.permute.xlu0 %3261  ;;  %v3210_v46 = vmul.f32 %v7843_v53, %v8416_v0 }
 0x332   : > { %5440 = vst [vmem:[%s7412_s9 + $0xd0] sm:$0xff] %v5198_v54   ;;  %v5278_v23 = vpack.c.bf16 %v3490_v41, %v3489_v36  ;;  %v3300_v16 = vmul.f32 %v3260_v28, %v8397_v39  ;;  %v3301_v44 = vmul.f32 %v3262_v17, %v8400_v45  ;;  %v8410_v41 = vld [vmem:[#allocation61_spill] sm:$0xff] }
 0x333   : > { %v3208_v63 = vmul.f32 %v7804_v1, %v8410_v41 }
 0x334   : > { %5456 = vst [vmem:[%s7423_s11 + $0xd0] sm:$0xff] %v5278_v23   ;;  %v3332_v59 = vadd.f32 %v3300_v16, %v3204_v40  ;;  %v3333_v31 = vadd.f32 %v3301_v44, %v3205_v58  ;;  %v8412_v23 = vld [vmem:[#allocation36_spill] sm:$0xff]  ;;  %v3368_v16 = vmul.f32 %v7814_v10, %v8410_v41 }
 0x335   : > { %v3420_v24 = vpop.permute.xlu1 %3419  ;;  %v3422_v37 = vpop.permute.xlu0 %3421 }
 0x336   : > { %v3524_v62 = vmul.f32 0.088388346, %v3332_v59  ;;  %v3460_v14 = vmul.f32 %v3420_v24, %v8397_v39  ;;  %v3461_v9 = vmul.f32 %v3422_v37, %v8400_v45  ;;  %v3525_v22 = vmul.f32 0.088388346, %v3333_v31  ;;  %v8414_v24 = vld [vmem:[#allocation33_spill] sm:$0xff]  ;;  %v8415_v37 = vld [vmem:[#allocation39_spill] sm:$0xff] }
 0x337   : > { %v3367_v39 = vmul.f32 %v8412_v23, %v8408_v18  ;;  %v3369_v52 = vmul.f32 %v8418_v43, %v8414_v24  ;;  %v8423_v18 = vld [vmem:[#allocation67_spill] sm:$0xff] }
 0x338   : > { %v5203_v60 = vpack.c.bf16 %v3524_v62, %v3523_v51  ;;  %v3492_v61 = vadd.f32 %v3460_v14, %v3364_v12  ;;  %v3493_v13 = vadd.f32 %v3461_v9, %v3365_v33  ;;  %v3209_v51 = vmul.f32 %v8415_v37, %v8414_v24 }
 0x339   : > { %v3264_v15 = vpop.permute.xlu1 %3263  ;;  %v3266_v38 = vpop.permute.xlu0 %3265 }
 0x33a   : > { %5441 = vst [vmem:[%s7412_s9 + $0xd8] sm:$0xff] %v5203_v60   ;;  %v5283_v4 = vpack.c.bf16 %v3492_v61, %v3491_v11  ;;  %v3302_v47 = vmul.f32 %v3264_v15, %v8405_v5  ;;  %v3303_v34 = vmul.f32 %v3266_v38, %v8407_v30  ;;  %v8417_v11 = vld [vmem:[#allocation65_spill] sm:$0xff] }
 0x33c   : > { %5457 = vst [vmem:[%s7423_s11 + $0xd8] sm:$0xff] %v5283_v4   ;;  %v3334_v27 = vadd.f32 %v3302_v47, %v3206_v6  ;;  %v3335_v28 = vadd.f32 %v3303_v34, %v3207_v42  ;;  %v3370_v6 = vmul.f32 %v7851_v7, %v8416_v0  ;;  %v8422_v7 = vld [vmem:[#allocation66_spill] sm:$0xff] }
 0x33d   : > { %v3424_v19 = vpop.permute.xlu1 %3423  ;;  %v3426_v48 = vpop.permute.xlu0 %3425 }
 0x33e   : > { %v3526_v2 = vmul.f32 0.088388346, %v3334_v27  ;;  %v3462_v35 = vmul.f32 %v3424_v19, %v8405_v5  ;;  %v3463_v40 = vmul.f32 %v3426_v48, %v8407_v30  ;;  %v3527_v1 = vmul.f32 0.088388346, %v3335_v28  ;;  %v8419_v5 = vld [vmem:[#allocation38_spill] sm:$0xff]  ;;  %v8420_v27 = vld [vmem:[#allocation37_spill] sm:$0xff] }
 0x33f   : > { %v3211_v33 = vmul.f32 %v8421_v21, %v8420_v27  ;;  %v3212_v30 = vmul.f32 %v7869_v56, %v8422_v7  ;;  %v8425_v56 = vld [vmem:[#allocation43_spill] sm:$0xff] }
 0x340   : > { %v5208_v55 = vpack.c.bf16 %v3526_v2, %v3525_v22  ;;  %v3494_v29 = vadd.f32 %v3462_v35, %v3366_v57  ;;  %v3495_v62 = vadd.f32 %v3463_v40, %v3367_v39 }
 0x341   : > { %v3268_v36 = vpop.permute.xlu1 %3267  ;;  %v3270_v54 = vpop.permute.xlu0 %3269 }
 0x342   : > { %5442 = vst [vmem:[%s7412_s9 + $0xe0] sm:$0xff] %v5208_v55   ;;  %v5288_v17 = vpack.c.bf16 %v3494_v29, %v3493_v13  ;;  %v3304_v20 = vmul.f32 %v3268_v36, %v8411_v32  ;;  %v3305_v3 = vmul.f32 %v3270_v54, %v8413_v25  ;;  %v8424_v55 = vld [vmem:[#allocation41_spill] sm:$0xff]  ;;  %v3372_v54 = vmul.f32 %v8425_v56, %v8422_v7 }
 0x343   : > { %v3371_v29 = vmul.f32 %v8424_v55, %v8420_v27 }
 0x344   : > { %5458 = vst [vmem:[%s7423_s11 + $0xe0] sm:$0xff] %v5288_v17   ;;  %v3336_v50 = vadd.f32 %v3304_v20, %v3208_v63  ;;  %v3337_v10 = vadd.f32 %v3305_v3, %v3209_v51 }
 0x345   : > { %v3428_v8 = vpop.permute.xlu1 %3427  ;;  %v3430_v59 = vpop.permute.xlu0 %3429 }
 0x346   : > { %v3528_v26 = vmul.f32 0.088388346, %v3336_v50  ;;  %v3464_v12 = vmul.f32 %v3428_v8, %v8411_v32  ;;  %v3465_v15 = vmul.f32 %v3430_v59, %v8413_v25  ;;  %v3529_v53 = vmul.f32 0.088388346, %v3337_v10 }
 0x348   : > { %v5213_v45 = vpack.c.bf16 %v3528_v26, %v3527_v1  ;;  %v3496_v44 = vadd.f32 %v3464_v12, %v3368_v16  ;;  %v3497_v57 = vadd.f32 %v3465_v15, %v3369_v52 }
 0x349   : > { %v3272_v14 = vpop.permute.xlu1 %3271  ;;  %v3274_v61 = vpop.permute.xlu0 %3273 }
 0x34a   : > { %5443 = vst [vmem:[%s7412_s9 + $0xe8] sm:$0xff] %v5213_v45   ;;  %v5293_v58 = vpack.c.bf16 %v3496_v44, %v3495_v62  ;;  %v3306_v60 = vmul.f32 %v3272_v14, %v8417_v11  ;;  %v3307_v47 = vmul.f32 %v3274_v61, %v8419_v5 }
 0x34c   : > { %5459 = vst [vmem:[%s7423_s11 + $0xe8] sm:$0xff] %v5293_v58   ;;  %v3338_v38 = vadd.f32 %v3306_v60, %v3210_v46  ;;  %v3339_v34 = vadd.f32 %v3307_v47, %v3211_v33 }
 0x34d   : > { %v3432_v31 = vpop.permute.xlu1 %3431  ;;  %v3434_v22 = vpop.permute.xlu0 %3433 }
 0x34e   : > { %v3530_v4 = vmul.f32 0.088388346, %v3338_v38  ;;  %v3466_v9 = vmul.f32 %v3432_v31, %v8417_v11  ;;  %v3467_v42 = vmul.f32 %v3434_v22, %v8419_v5  ;;  %v3531_v41 = vmul.f32 0.088388346, %v3339_v34 }
 0x350   : > { %v5218_v19 = vpack.c.bf16 %v3530_v4, %v3529_v53  ;;  %v3498_v48 = vadd.f32 %v3466_v9, %v3370_v6  ;;  %v3499_v17 = vadd.f32 %v3467_v42, %v3371_v29 }
 0x351   : > { %v3276_v2 = vpop.permute.xlu1 %3275 }
 0x352   : > { %5444 = vst [vmem:[%s7412_s9 + $0xf0] sm:$0xff] %v5218_v19   ;;  %v5298_v35 = vpack.c.bf16 %v3498_v48, %v3497_v57  ;;  %v3308_v49 = vmul.f32 %v3276_v2, %v8423_v18 }
 0x354   : > { %5460 = vst [vmem:[%s7423_s11 + $0xf0] sm:$0xff] %v5298_v35   ;;  %v3340_v13 = vadd.f32 %v3308_v49, %v3212_v30 }
 0x355   : > { %v3436_v36 = vpop.permute.xlu1 %3435 }
 0x356   : > { %v3532_v63 = vmul.f32 0.088388346, %v3340_v13  ;;  %v3468_v28 = vmul.f32 %v3436_v36, %v8423_v18 }
 0x358   : > { %v5223_v32 = vpack.c.bf16 %v3532_v63, %v3531_v41  ;;  %v3500_v20 = vadd.f32 %v3468_v28, %v3372_v54 }
 0x35a   : > { %5445 = vst [vmem:[%s7412_s9 + $0xf8] sm:$0xff] %v5223_v32   ;;  %v5303_v40 = vpack.c.bf16 %v3500_v20, %v3499_v17 }
 0x35b   : > { %6269 = shalt.err (!%p6266_p6)
}
 0x35c   : > { %s6270_s9 = scalar_lea.hbm %s8030_s14, 4096  ;;  %s6274_s8 = scalar_lea.hbm %s8158_s5, 8192 }
 0x35d   : > { %p6271_p8 = scmp.ne.s32.totalorder %s8030_s14, %s6270_s9  ;;  %p6275_p7 = scmp.lt.s32.totalorder %s8030_s14, %s8158_s5 }
 0x35e   : > { %p6276_p11 = scmp.lt.s32.totalorder %s6274_s8, %s6270_s9 }
 0x35f   : > { %p6272_p9 = pnand %p6271_p8, %p6573_p5 }
 0x360   : > { %p6277_p10 = por %p6276_p11, %p6275_p7 }
 0x361   : > { %p6273_p3 = pneg %p6272_p9 }
 0x363   : > { %p6278_p13 = pnand %p6277_p10, %p6273_p3 }
 0x365   : > { %6281 = shalt.err (!%p6278_p13)
}
 0x366   : > { %s6415_s0 = smov 4   ;;  %s8426_s1 = smov 64   ;;  %5461 = vst [vmem:[%s7423_s11 + $0xf8] sm:$0xff] %v5303_v40  }
 0x367   : > { %s8427_s17 = scalar_lea.sflag [#allocation4], %s6600_s22  ;;  %s8428_s13 = sand.u32 1, %s6489_s30  }
 0x368   : > { %5736 = dma.vmem_to_hbm [thread:$0]  (%p6573_p5), %s8032_s16, 4096, %s8030_s14, %s8427_s17, %s8426_s1, %s8426_s1, %s6415_s0  }
 0x369   : > { %s8078_s9 = scalar_lea.sflag [#allocation13], %s8428_s13  ;;  %s6282_s18 = scalar_lea.vmem %s8039_s12, 4096 }
 0x36a   : > { %p6283_p0 = scmp.ne.s32.totalorder %s8039_s12, %s6282_s18  ;;  %s6416_s21 = smov [#allocation12]  }
 0x36b   : > { %s6286_s22 = sshll.u32 %s6416_s21, 4  ;;  %s6287_s22 = int_to_ptr.vmem [resolvable:$false] %s6286_s22 }
 0x36c   : > { %p6284_p1 = pnand %p6283_p0, %p6573_p5  ;;  %s6288_s8 = scalar_lea.vmem %s6287_s22, 8192 }
 0x36d   : > { %p6289_p12 = scmp.lt.s32.totalorder %s8039_s12, %s6287_s22  ;;  %p6290_p4 = scmp.lt.s32.totalorder %s6288_s8, %s6282_s18 }
 0x36e   : > { %p6285_p2 = pneg %p6284_p1 }
 0x36f   : > { %p6291_p6 = por %p6290_p4, %p6289_p12 }
 0x371   : > { %p6292_p8 = pnand %p6291_p6, %p6285_p2 }
 0x373   : > { %6295 = shalt.err (!%p6292_p8)
}
 0x374   : > { %s6296_s30 = scalar_lea.hbm %s8037_s2, 4096  ;;  %s6300_s14 = scalar_lea.hbm %s8159_s6, 8192 }
 0x375   : > { %p6297_p9 = scmp.ne.s32.totalorder %s8037_s2, %s6296_s30  ;;  %p6301_p11 = scmp.lt.s32.totalorder %s8037_s2, %s8159_s6 }
 0x376   : > { %p6302_p10 = scmp.lt.s32.totalorder %s6300_s14, %s6296_s30 }
 0x377   : > { %p6298_p3 = pnand %p6297_p9, %p6573_p5 }
 0x378   : > { %p6303_p13 = por %p6302_p10, %p6301_p11 }
 0x379   : > { %p6299_p7 = pneg %p6298_p3 }
 0x37b   : > { %p6304_p0 = pnand %p6303_p13, %p6299_p7 }
 0x37d   : > { %6307 = shalt.err (!%p6304_p0)
}
 0x37e   : > { %5737 = dma.vmem_to_hbm [thread:$0]  (%p6573_p5), %s8039_s12, 4096, %s8037_s2, %s8078_s9, %s8426_s1, %s8426_s1, %s6415_s0  }
 0x37f   : > { %s6308_s13 = scalar_lea.vmem %s8047_s23, 4096  ;;  %s6417_s18 = smov [#allocation14]  }
 0x380   : > { %p6309_p1 = scmp.ne.s32.totalorder %s8047_s23, %s6308_s13  ;;  %s6312_s21 = sshll.u32 %s6417_s18, 4  ;;  %s6313_s21 = int_to_ptr.vmem [resolvable:$false] %s6312_s21 }
 0x381   : > { %s6314_s22 = scalar_lea.vmem %s6313_s21, 8192  ;;  %p6315_p4 = scmp.lt.s32.totalorder %s8047_s23, %s6313_s21 }
 0x382   : > { %p6310_p2 = pnand %p6309_p1, %p6573_p5  ;;  %p6316_p6 = scmp.lt.s32.totalorder %s6314_s22, %s6308_s13 }
 0x384   : > { %p6311_p12 = pneg %p6310_p2  ;;  %p6317_p8 = por %p6316_p6, %p6315_p4 }
 0x386   : > { %p6318_p9 = pnand %p6317_p8, %p6311_p12 }
 0x388   : > { %6321 = shalt.err (!%p6318_p9)
}
 0x389   : > { %s6322_s8 = scalar_lea.hbm %s8045_s27, 4096  ;;  %s6326_s30 = scalar_lea.hbm %s8160_s7, 8192 }
 0x38a   : > { %p6323_p3 = scmp.ne.s32.totalorder %s8045_s27, %s6322_s8  ;;  %p6327_p10 = scmp.lt.s32.totalorder %s8045_s27, %s8160_s7 }
 0x38b   : > { %p6328_p13 = scmp.lt.s32.totalorder %s6326_s30, %s6322_s8 }
 0x38c   : > { %p6324_p7 = pnand %p6323_p3, %p6573_p5 }
 0x38d   : > { %p6329_p0 = por %p6328_p13, %p6327_p10 }
 0x38e   : > { %p6325_p11 = pneg %p6324_p7 }
 0x390   : > { %p6330_p1 = pnand %p6329_p0, %p6325_p11 }
 0x392   : > { %6333 = shalt.err (!%p6330_p1)
}
 0x393   : > { %5738 = dma.vmem_to_hbm [thread:$0]  (%p6573_p5), %s8047_s23, 4096, %s8045_s27, %s8078_s9, %s8426_s1, %s8426_s1, %s6415_s0  }
 0x394 PF: > { %s4102_s14 = sand.u32 1, %s6380_s24   ;;  %p8429_p2 = scmp.ne.s32.totalorder %s8266_s10, 0 }
 0x395   : > { %p8430_p12 = scmp.ge.s32.totalorder %s6400_s29, 2  ;;  %s4103_s3 = scalar_lea.sflag [#allocation4], %s4102_s14 }
 0x397   : > { %p5760_p4 = pnand %p8430_p12, %p8429_p2 }
 0x399   : > { %p5761_p6 = pneg %p5760_p4 }
 0x39b   : > { %6371 = dma.done.wait (%p5761_p6), %s4103_s3, 4096  }
 0x39c   : > { %6373 = vsyncadd (%p5761_p6), %s4103_s3, 4294963200  ;;  %s8431_s20 = sadd.s32 4294967294, %s6400_s29  }
 0x39d   : > { %s4111_s17 = sand.u32 1, %s8431_s20  }
 0x39e   : > { %s4112_s13 = scalar_lea.sflag [#allocation13], %s4111_s17 }
 0x39f   : > { %6375 = dma.done.wait (%p5761_p6), %s4112_s13, 8192  }
 0x3a0   : > { %6377 = vsyncadd (%p5761_p6), %s4112_s13, 4294959104  ;;  %s29_s29 = sadd.s32 1, %s6400_s29   ;;  %s8432_s24 = smov %s6384_s25 }
 0x3a1   : > { %p26_p5 = scmp.ge.s32.totalorder %s29_s29, 4   ;;  %s8433_s25 = smov %s6388_s26 }
 0x3a2   : > { %s8434_s26 = smov %s6582_s15  ;;  %s8435_s27 = smov %s6396_s28 }
 0x3a3   : > { %s8436_s28 = smov %s8438_s19  ;;  %28 = sbr.rel (!%p26_p5) target bundleno = 15 (0xf), region = 140 }
 0x3a8   :  { %4126 = vsyncpa [#allocation3], 1 }
 0x3a9   :  { %4128 = vsyncpa [#allocation3 + $0x1], 1 }
 0x3aa   :  { %4129 = vsyncpa [#allocation6], 1 }
 0x3ab   :  { %4130 = vsyncpa [#allocation9], 1 }
 0x3ac   :  { %4131 = vsyncpa [#allocation4], 1 }
 0x3ad   :  { %4133 = vsyncpa [#allocation4 + $0x1], 1 }
 0x3ae   :  { %4134 = vsyncpa [#allocation13], 1 }
 0x3af   :  { %4136 = vsyncpa [#allocation13 + $0x1], 1 }

</bundles_post_ra>
